<compile_context>
chip_gen: v6e
topology: v6e:2x2x1
jax: 0.10.0
libtpu: 0.0.40
codegen_flags: <defaults>
</compile_context>

<pallas_src>
import functools
import math
from math import log

import jax
import jax.numpy as jnp
from jax import lax
from jax.experimental import pallas as pl
from jax.experimental.pallas import tpu as pltpu

EPS = 1e-5


# ----------------------------- Pallas kernel ------------------------------ #
def _rpn_head_kernel(x_ref, w9_ref, shift_ref, wh_ref, bh_ref, out_ref, *, wp):
    # x_ref:     (1, 1, L_in, Cin) flattened (rows, padded width) halo tile, bf16
    #            L_in = (t_h + 3) * wp  (1 top pad row, 2 bottom rows of slack)
    # w9_ref:    (9, Cin, F)   conv3x3 weights with BN scale folded in, bf16
    # shift_ref: (1, F)        folded BN shift, f32
    # wh_ref:    (A_total, F)  fused loc+cls 1x1 weights, bf16
    # bh_ref:    (A_total, 1)  fused loc+cls bias, f32
    # out_ref:   (1, A_total, Lacc) transposed head output, f32; Lacc = t_h * wp
    l_acc = out_ref.shape[2]

    # 3x3 conv as 9 accumulating MXU matmuls over the padded width. Tap
    # (kh, kw) is the flat halo tile shifted by the static sublane offset
    # kh*wp + kw -- no per-tap reshape / W-slice, so no materialized copies.
    acc = jnp.dot(x_ref[0, 0, 0:l_acc, :], w9_ref[0],
                  preferred_element_type=jnp.float32)
    for k in range(1, 9):
        kh, kw = divmod(k, 3)
        off = kh * wp + kw
        acc = acc + jnp.dot(x_ref[0, 0, off:off + l_acc, :], w9_ref[k],
                            preferred_element_type=jnp.float32)

    # folded BatchNorm shift + ReLU (f32, VPU)
    feat = jnp.maximum(acc + shift_ref[...], 0.0).astype(wh_ref.dtype)

    # fused loc+cls 1x1 heads, computed transposed so the store is lane-dense:
    # (A_total, F) contracted with (Lacc, F) over F -> (A_total, Lacc)
    head = lax.dot_general(wh_ref[...], feat,
                           dimension_numbers=(((1,), (1,)), ((), ())),
                           preferred_element_type=jnp.float32)
    out_ref[0] = (head + bh_ref[...]).astype(out_ref.dtype)


# ------------------------------- tiling ------------------------------------ #
def _round_up(x, m):
    return (x + m - 1) // m * m


def _pick_tiling(H, W, max_tile_elems):
    """Pick (t_h, Wp): t_h divides H, Wp >= W+2 and Wp % 8 == 0, and the
    per-tile flattened output width t_h*Wp is a multiple of 128 whenever the
    level is spatially tiled (lane-dense output BlockSpec requirement)."""
    best = None
    for t_h in range(1, H + 1):
        if H % t_h:
            continue
        if t_h == H:
            wp = _round_up(W + 2, 8)            # single tile: full-extent block
        else:
            align = max(8, 128 // math.gcd(t_h, 128))
            wp = _round_up(W + 2, align)        # makes t_h*wp % 128 == 0
        if t_h * wp <= max_tile_elems and (best is None or t_h > best[0]):
            best = (t_h, wp)
    if best is None:                            # nothing fits the cap: one
        best = (H, _round_up(W + 2, 8))         # full-extent tile (always legal)
    return best


def _default_max_tile_elems():
    """Generation-aware spatial tile cap (elements of t_h*Wp)."""
    try:
        vmem_bytes = pltpu.get_tpu_info().vmem_capacity_bytes
    except Exception:
        vmem_bytes = 64 * 1024 * 1024           # assume the smaller (v7x) VMEM
    return 8192 if vmem_bytes >= (100 << 20) else 4096


# ------------------------------- wrapper ----------------------------------- #
def rpn_head_level(x_nchw, kp, num_anchors, *, max_tile_elems=None):
    """Run the RPN head on one feature level with the Pallas kernel."""
    B, Cin, H, W = x_nchw.shape
    A_total, F = kp["w_head"].shape
    A4 = num_anchors * 4
    if max_tile_elems is None:
        max_tile_elems = _default_max_tile_elems()

    t_h, Wp = _pick_tiling(H, W, max_tile_elems)
    n_t = H // t_h
    Lacc = t_h * Wp                 # flattened output width per tile
    L_in = (t_h + 3) * Wp           # flattened halo-tile length
    HWp = H * Wp
    cdt = kp["w9"].dtype

    # NCHW -> NHWC, cast to bf16, pad H by (1, 2) and W up to Wp. Then build
    # overlapping halo windows and flatten (rows, padded width) -> one axis.
    # This is the only wrapper-side data-movement pass (~1x the input).
    x = jnp.transpose(x_nchw, (0, 2, 3, 1)).astype(cdt)           # (B,H,W,Cin)
    xp = jnp.pad(x, ((0, 0), (1, 2), (1, Wp - W - 1), (0, 0)))    # (B,H+3,Wp,Cin)
    row_idx = jnp.arange(n_t)[:, None] * t_h + jnp.arange(t_h + 3)[None, :]
    x_tiles = xp[:, row_idx].reshape(B, n_t, L_in, Cin)           # (B,n_t,L_in,Cin)

    itemsize = kp["w9"].dtype.itemsize
    const_bytes = sum(int(v.size) * v.dtype.itemsize
                      for v in (kp["w9"], kp["w_head"], kp["shift"], kp["b_head"]))
    flops = 2 * B * HWp * (9 * Cin * F + F * A_total)
    bytes_accessed = int(B * n_t * L_in * Cin * itemsize
                         + B * A_total * HWp * 4 + const_bytes)

    # per-step VMEM footprint -> scoped limit (double-buffered in/out/consts
    # plus the f32 accumulator and bf16 feature block), capped at v7x's 64 MiB.
    in_b = L_in * Cin * itemsize
    out_b = A_total * Lacc * 4
    work_b = Lacc * F * (4 + 2) + 2 * Lacc * Cin * itemsize
    vmem_limit = 2 * (in_b + out_b + const_bytes) + work_b
    vmem_limit = int(min(max(vmem_limit * 3 // 2 + (4 << 20), 32 << 20), 64 << 20))

    def const_spec(arr):
        n = arr.ndim
        return pl.BlockSpec(arr.shape, lambda b, t, _n=n: (0,) * _n)

    kernel = functools.partial(_rpn_head_kernel, wp=Wp)
    out = pl.pallas_call(
        kernel,
        out_shape=jax.ShapeDtypeStruct((B, A_total, HWp), jnp.float32),
        grid_spec=pltpu.PrefetchScalarGridSpec(
            num_scalar_prefetch=0,
            grid=(B, n_t),
            in_specs=[
                pl.BlockSpec((1, 1, L_in, Cin), lambda b, t: (b, t, 0, 0)),
                const_spec(kp["w9"]),
                const_spec(kp["shift"]),
                const_spec(kp["w_head"]),
                const_spec(kp["b_head"]),
            ],
            out_specs=pl.BlockSpec((1, A_total, Lacc), lambda b, t: (b, 0, t)),
        ),
        compiler_params=pltpu.CompilerParams(
            dimension_semantics=("parallel", "parallel"),
            vmem_limit_bytes=vmem_limit),
        cost_estimate=pl.CostEstimate(flops=flops, transcendentals=0,
                                      bytes_accessed=bytes_accessed),
    )(x_tiles, kp["w9"], kp["shift"], kp["w_head"], kp["b_head"])

    # Strip the pad columns and transpose to channels-last; the pad removal
    # rides along with the transpose pass the to_pred layout needs anyway.
    out = out.reshape(B, A_total, H, Wp)[..., :W]                 # (B,A,H,W)
    out = jnp.transpose(out, (0, 2, 3, 1)).reshape(B, H * W, A_total)
    loc = out[..., :A4].reshape(B, H * W * num_anchors, 4)
    cls = out[..., A4:].reshape(B, H * W * num_anchors, 2)
    return loc, cls


def rpn_head_forward(ps, kp, num_anchors, *, max_tile_elems=None):
    """Multi-level forward: per-level head, concat along dim 1."""
    loc_preds, cls_preds = [], []
    for p in ps:
        loc_p, cls_p = rpn_head_level(p, kp, num_anchors,
                                      max_tile_elems=max_tile_elems)
        loc_preds.append(loc_p)
        cls_preds.append(cls_p)
    return (jnp.concatenate(loc_preds, axis=1),
            jnp.concatenate(cls_preds, axis=1))


# -------------------------- parameter construction ------------------------- #
def init_params(key, in_channels, f_channels, num_anchors,
                compute_dtype=jnp.bfloat16):
    A4, A2 = num_anchors * 4, num_anchors * 2
    A_total = A4 + A2
    ks = jax.random.split(key, 8)
    raw = {
        # conv3x3 (bias=False, followed by BN), PyTorch OIHW layout
        "w_conv": jax.random.normal(ks[0], (f_channels, in_channels, 3, 3),
                                    jnp.float32) * 0.1,
        "gamma": 1.0 + 0.1 * jax.random.normal(ks[1], (f_channels,), jnp.float32),
        "beta": 0.1 * jax.random.normal(ks[2], (f_channels,), jnp.float32),
        "mean": 0.1 * jax.random.normal(ks[3], (f_channels,), jnp.float32),
        "var": jax.nn.softplus(jax.random.normal(ks[4], (f_channels,),
                                                 jnp.float32)) + 0.5,
        # 1x1 heads (with bias)
        "w_loc": jax.random.normal(ks[5], (A4, f_channels, 1, 1), jnp.float32) * 0.1,
        "b_loc": 0.1 * jax.random.normal(ks[6], (A4,), jnp.float32),
        "w_cls": jax.random.normal(ks[7], (A2, f_channels, 1, 1), jnp.float32) * 0.1,
        # bias_init_constant(cls_conv, inverse_sigmoid(0.01))
        "b_cls": jnp.full((A2,), float(log(0.01 / 0.99)), jnp.float32),
    }
    # fold BN (eval) into the conv: scale into the weights, shift as a bias
    scale = raw["gamma"] / jnp.sqrt(raw["var"] + EPS)
    shift = raw["beta"] - raw["mean"] * scale
    w9 = jnp.transpose(raw["w_conv"], (2, 3, 1, 0)) * scale       # (3,3,Cin,F)
    w9 = w9.reshape(9, in_channels, f_channels).astype(compute_dtype)
    # fused loc+cls head: (A_total, F) weights + (A_total, 1) bias
    w_head = jnp.concatenate([raw["w_loc"].reshape(A4, f_channels),
                              raw["w_cls"].reshape(A2, f_channels)],
                             axis=0).astype(compute_dtype)
    b_head = jnp.concatenate([raw["b_loc"], raw["b_cls"]]
                             ).reshape(A_total, 1).astype(jnp.float32)
    kp = {
        "w9": w9,
        "shift": shift.reshape(1, f_channels).astype(jnp.float32),
        "w_head": w_head,
        "b_head": b_head,
    }
    return raw, kp


# --------------------------- pure-JAX reference ---------------------------- #
def _ref_level(x, raw, num_anchors):
    dn = ("NCHW", "OIHW", "NCHW")
    conv = lax.conv_general_dilated(x, raw["w_conv"], (1, 1), "SAME",
                                    dimension_numbers=dn)
    bn = ((conv - raw["mean"][None, :, None, None])
          / jnp.sqrt(raw["var"][None, :, None, None] + EPS)
          * raw["gamma"][None, :, None, None] + raw["beta"][None, :, None, None])
    feat = jnp.maximum(bn, 0.0)
    loc = lax.conv_general_dilated(feat, raw["w_loc"], (1, 1), "SAME",
                                   dimension_numbers=dn) \
        + raw["b_loc"][None, :, None, None]
    cls = lax.conv_general_dilated(feat, raw["w_cls"], (1, 1), "SAME",
                                   dimension_numbers=dn) \
        + raw["b_cls"][None, :, None, None]
    B = x.shape[0]

    def to_pred(t, c):
        return jnp.transpose(t, (0, 2, 3, 1)).reshape(B, -1, c)

    return to_pred(loc, 4), to_pred(cls, 2)


def rpn_head_reference(ps, raw, num_anchors):
    locs, clss = zip(*[_ref_level(p, raw, num_anchors) for p in ps])
    return jnp.concatenate(locs, axis=1), jnp.concatenate(clss, axis=1)


# ---------------------------------- main ----------------------------------- #
if __name__ == "__main__":
    num_anchors = 3
    in_channels = 4
    f_channels = 32

    key = jax.random.PRNGKey(0)
    kx1, kx2, kparam = jax.random.split(key, 3)
    # two pyramid levels (NCHW, matching the PyTorch module's inputs)
    p1 = jax.random.normal(kx1, (2, in_channels, 16, 16), jnp.float32)
    p2 = jax.random.normal(kx2, (2, in_channels, 8, 8), jnp.float32)

    raw, kp = init_params(kparam, in_channels, f_channels, num_anchors)

    # small max_tile_elems so the toy level-1 input actually exercises the
    # multi-tile (halo) spatial grid; production uses the generation-aware
    # default (4096-8192).
    fwd = jax.jit(lambda a, b: rpn_head_forward([a, b], kp, num_anchors,
                                                max_tile_elems=256))
    loc_p, cls_p = jax.block_until_ready(fwd(p1, p2))

    # sanity check against a pure-JAX f32 reference (kernel uses bf16 operands)
    loc_ref, cls_ref = rpn_head_reference([p1, p2], raw, num_anchors)
    assert loc_p.shape == (2, (16 * 16 + 8 * 8) * num_anchors, 4)
    assert cls_p.shape == (2, (16 * 16 + 8 * 8) * num_anchors, 2)
    assert jnp.allclose(loc_p, loc_ref, atol=3e-2, rtol=3e-2)
    assert jnp.allclose(cls_p, cls_ref, atol=3e-2, rtol=3e-2)

    print("KERNEL_OK")
</pallas_src>

<mosaic_0001>
module attributes {stable_mosaic.version = 11 : i64} {
  func.func @_rpn_head_kernel(%arg0: i32, %arg1: i32, %arg2: memref<1x1x352x4xbf16, #tpu.memory_space<vmem>>, %arg3: memref<9x4x32xbf16, #tpu.memory_space<vmem>>, %arg4: memref<1x32xf32, #tpu.memory_space<vmem>>, %arg5: memref<18x32xbf16, #tpu.memory_space<vmem>>, %arg6: memref<18x1xf32, #tpu.memory_space<vmem>>, %arg7: memref<1x18x256xf32, #tpu.memory_space<vmem>>) attributes {dimension_semantics = [#tpu.dimension_semantics<parallel>, #tpu.dimension_semantics<parallel>], iteration_bounds = array<i64: 2, 2>, scalar_prefetch = 0 : i64, scratch_operands = 0 : i64, tpu.core_type = #tpu.core_type<tc>, window_params = [{transform_indices = @transform_0, window_bounds = array<i64: 1, 1, 352, 4>}, {pipeline_mode = #tpu.pipeline_mode<synchronous>, transform_indices = @transform_1, window_bounds = array<i64: 9, 4, 32>}, {pipeline_mode = #tpu.pipeline_mode<synchronous>, transform_indices = @transform_2, window_bounds = array<i64: 1, 32>}, {pipeline_mode = #tpu.pipeline_mode<synchronous>, transform_indices = @transform_3, window_bounds = array<i64: 18, 32>}, {pipeline_mode = #tpu.pipeline_mode<synchronous>, transform_indices = @transform_4, window_bounds = array<i64: 18, 1>}, {transform_indices = @transform_5, window_bounds = array<i64: 1, 18, 256>}]} {
    %c0 = arith.constant 0 : index
    %c0_0 = arith.constant 0 : index
    %c0_1 = arith.constant 0 : index
    %c0_2 = arith.constant 0 : index
    %0 = vector.load %arg2[%c0, %c0_0, %c0_1, %c0_2] : memref<1x1x352x4xbf16, #tpu.memory_space<vmem>>, vector<1x1x256x4xbf16>
    %1 = vector.shape_cast %0 : vector<1x1x256x4xbf16> to vector<256x4xbf16>
    %c0_3 = arith.constant 0 : index
    %c0_4 = arith.constant 0 : index
    %c0_5 = arith.constant 0 : index
    %2 = vector.load %arg3[%c0_3, %c0_4, %c0_5] : memref<9x4x32xbf16, #tpu.memory_space<vmem>>, vector<1x4x32xbf16>
    %3 = vector.shape_cast %2 : vector<1x4x32xbf16> to vector<4x32xbf16>
    %cst = arith.constant dense<0.000000e+00> : vector<256x32xf32>
    %4 = tpu.matmul %1, %3, %cst {dimension_numbers = #tpu.dot_dimension_numbers<[1], [0], [0], [1], [0, 0, 1, 1], [], []>} : vector<256x4xbf16>, vector<4x32xbf16>, vector<256x32xf32> -> vector<256x32xf32>
    %c0_6 = arith.constant 0 : index
    %c0_7 = arith.constant 0 : index
    %c1 = arith.constant 1 : index
    %c0_8 = arith.constant 0 : index
    %5 = vector.load %arg2[%c0_6, %c0_7, %c1, %c0_8] : memref<1x1x352x4xbf16, #tpu.memory_space<vmem>>, vector<1x1x256x4xbf16>
    %6 = vector.shape_cast %5 : vector<1x1x256x4xbf16> to vector<256x4xbf16>
    %c1_9 = arith.constant 1 : index
    %c0_10 = arith.constant 0 : index
    %c0_11 = arith.constant 0 : index
    %7 = vector.load %arg3[%c1_9, %c0_10, %c0_11] : memref<9x4x32xbf16, #tpu.memory_space<vmem>>, vector<1x4x32xbf16>
    %8 = vector.shape_cast %7 : vector<1x4x32xbf16> to vector<4x32xbf16>
    %cst_12 = arith.constant dense<0.000000e+00> : vector<256x32xf32>
    %9 = tpu.matmul %6, %8, %cst_12 {dimension_numbers = #tpu.dot_dimension_numbers<[1], [0], [0], [1], [0, 0, 1, 1], [], []>} : vector<256x4xbf16>, vector<4x32xbf16>, vector<256x32xf32> -> vector<256x32xf32>
    %10 = arith.addf %4, %9 : vector<256x32xf32>
    %c0_13 = arith.constant 0 : index
    %c0_14 = arith.constant 0 : index
    %c2 = arith.constant 2 : index
    %c0_15 = arith.constant 0 : index
    %11 = vector.load %arg2[%c0_13, %c0_14, %c2, %c0_15] : memref<1x1x352x4xbf16, #tpu.memory_space<vmem>>, vector<1x1x256x4xbf16>
    %12 = vector.shape_cast %11 : vector<1x1x256x4xbf16> to vector<256x4xbf16>
    %c2_16 = arith.constant 2 : index
    %c0_17 = arith.constant 0 : index
    %c0_18 = arith.constant 0 : index
    %13 = vector.load %arg3[%c2_16, %c0_17, %c0_18] : memref<9x4x32xbf16, #tpu.memory_space<vmem>>, vector<1x4x32xbf16>
    %14 = vector.shape_cast %13 : vector<1x4x32xbf16> to vector<4x32xbf16>
    %cst_19 = arith.constant dense<0.000000e+00> : vector<256x32xf32>
    %15 = tpu.matmul %12, %14, %cst_19 {dimension_numbers = #tpu.dot_dimension_numbers<[1], [0], [0], [1], [0, 0, 1, 1], [], []>} : vector<256x4xbf16>, vector<4x32xbf16>, vector<256x32xf32> -> vector<256x32xf32>
    %16 = arith.addf %10, %15 : vector<256x32xf32>
    %c0_20 = arith.constant 0 : index
    %c0_21 = arith.constant 0 : index
    %c32 = arith.constant 32 : index
    %c0_22 = arith.constant 0 : index
    %17 = vector.load %arg2[%c0_20, %c0_21, %c32, %c0_22] : memref<1x1x352x4xbf16, #tpu.memory_space<vmem>>, vector<1x1x256x4xbf16>
    %18 = vector.shape_cast %17 : vector<1x1x256x4xbf16> to vector<256x4xbf16>
    %c3 = arith.constant 3 : index
    %c0_23 = arith.constant 0 : index
    %c0_24 = arith.constant 0 : index
    %19 = vector.load %arg3[%c3, %c0_23, %c0_24] : memref<9x4x32xbf16, #tpu.memory_space<vmem>>, vector<1x4x32xbf16>
    %20 = vector.shape_cast %19 : vector<1x4x32xbf16> to vector<4x32xbf16>
    %cst_25 = arith.constant dense<0.000000e+00> : vector<256x32xf32>
    %21 = tpu.matmul %18, %20, %cst_25 {dimension_numbers = #tpu.dot_dimension_numbers<[1], [0], [0], [1], [0, 0, 1, 1], [], []>} : vector<256x4xbf16>, vector<4x32xbf16>, vector<256x32xf32> -> vector<256x32xf32>
    %22 = arith.addf %16, %21 : vector<256x32xf32>
    %c0_26 = arith.constant 0 : index
    %c0_27 = arith.constant 0 : index
    %c33 = arith.constant 33 : index
    %c0_28 = arith.constant 0 : index
    %23 = vector.load %arg2[%c0_26, %c0_27, %c33, %c0_28] : memref<1x1x352x4xbf16, #tpu.memory_space<vmem>>, vector<1x1x256x4xbf16>
    %24 = vector.shape_cast %23 : vector<1x1x256x4xbf16> to vector<256x4xbf16>
    %c4 = arith.constant 4 : index
    %c0_29 = arith.constant 0 : index
    %c0_30 = arith.constant 0 : index
    %25 = vector.load %arg3[%c4, %c0_29, %c0_30] : memref<9x4x32xbf16, #tpu.memory_space<vmem>>, vector<1x4x32xbf16>
    %26 = vector.shape_cast %25 : vector<1x4x32xbf16> to vector<4x32xbf16>
    %cst_31 = arith.constant dense<0.000000e+00> : vector<256x32xf32>
    %27 = tpu.matmul %24, %26, %cst_31 {dimension_numbers = #tpu.dot_dimension_numbers<[1], [0], [0], [1], [0, 0, 1, 1], [], []>} : vector<256x4xbf16>, vector<4x32xbf16>, vector<256x32xf32> -> vector<256x32xf32>
    %28 = arith.addf %22, %27 : vector<256x32xf32>
    %c0_32 = arith.constant 0 : index
    %c0_33 = arith.constant 0 : index
    %c34 = arith.constant 34 : index
    %c0_34 = arith.constant 0 : index
    %29 = vector.load %arg2[%c0_32, %c0_33, %c34, %c0_34] : memref<1x1x352x4xbf16, #tpu.memory_space<vmem>>, vector<1x1x256x4xbf16>
    %30 = vector.shape_cast %29 : vector<1x1x256x4xbf16> to vector<256x4xbf16>
    %c5 = arith.constant 5 : index
    %c0_35 = arith.constant 0 : index
    %c0_36 = arith.constant 0 : index
    %31 = vector.load %arg3[%c5, %c0_35, %c0_36] : memref<9x4x32xbf16, #tpu.memory_space<vmem>>, vector<1x4x32xbf16>
    %32 = vector.shape_cast %31 : vector<1x4x32xbf16> to vector<4x32xbf16>
    %cst_37 = arith.constant dense<0.000000e+00> : vector<256x32xf32>
    %33 = tpu.matmul %30, %32, %cst_37 {dimension_numbers = #tpu.dot_dimension_numbers<[1], [0], [0], [1], [0, 0, 1, 1], [], []>} : vector<256x4xbf16>, vector<4x32xbf16>, vector<256x32xf32> -> vector<256x32xf32>
    %34 = arith.addf %28, %33 : vector<256x32xf32>
    %c0_38 = arith.constant 0 : index
    %c0_39 = arith.constant 0 : index
    %c64 = arith.constant 64 : index
    %c0_40 = arith.constant 0 : index
    %35 = vector.load %arg2[%c0_38, %c0_39, %c64, %c0_40] : memref<1x1x352x4xbf16, #tpu.memory_space<vmem>>, vector<1x1x256x4xbf16>
    %36 = vector.shape_cast %35 : vector<1x1x256x4xbf16> to vector<256x4xbf16>
    %c6 = arith.constant 6 : index
    %c0_41 = arith.constant 0 : index
    %c0_42 = arith.constant 0 : index
    %37 = vector.load %arg3[%c6, %c0_41, %c0_42] : memref<9x4x32xbf16, #tpu.memory_space<vmem>>, vector<1x4x32xbf16>
    %38 = vector.shape_cast %37 : vector<1x4x32xbf16> to vector<4x32xbf16>
    %cst_43 = arith.constant dense<0.000000e+00> : vector<256x32xf32>
    %39 = tpu.matmul %36, %38, %cst_43 {dimension_numbers = #tpu.dot_dimension_numbers<[1], [0], [0], [1], [0, 0, 1, 1], [], []>} : vector<256x4xbf16>, vector<4x32xbf16>, vector<256x32xf32> -> vector<256x32xf32>
    %40 = arith.addf %34, %39 : vector<256x32xf32>
    %c0_44 = arith.constant 0 : index
    %c0_45 = arith.constant 0 : index
    %c65 = arith.constant 65 : index
    %c0_46 = arith.constant 0 : index
    %41 = vector.load %arg2[%c0_44, %c0_45, %c65, %c0_46] : memref<1x1x352x4xbf16, #tpu.memory_space<vmem>>, vector<1x1x256x4xbf16>
    %42 = vector.shape_cast %41 : vector<1x1x256x4xbf16> to vector<256x4xbf16>
    %c7 = arith.constant 7 : index
    %c0_47 = arith.constant 0 : index
    %c0_48 = arith.constant 0 : index
    %43 = vector.load %arg3[%c7, %c0_47, %c0_48] : memref<9x4x32xbf16, #tpu.memory_space<vmem>>, vector<1x4x32xbf16>
    %44 = vector.shape_cast %43 : vector<1x4x32xbf16> to vector<4x32xbf16>
    %cst_49 = arith.constant dense<0.000000e+00> : vector<256x32xf32>
    %45 = tpu.matmul %42, %44, %cst_49 {dimension_numbers = #tpu.dot_dimension_numbers<[1], [0], [0], [1], [0, 0, 1, 1], [], []>} : vector<256x4xbf16>, vector<4x32xbf16>, vector<256x32xf32> -> vector<256x32xf32>
    %46 = arith.addf %40, %45 : vector<256x32xf32>
    %c0_50 = arith.constant 0 : index
    %c0_51 = arith.constant 0 : index
    %c66 = arith.constant 66 : index
    %c0_52 = arith.constant 0 : index
    %47 = vector.load %arg2[%c0_50, %c0_51, %c66, %c0_52] : memref<1x1x352x4xbf16, #tpu.memory_space<vmem>>, vector<1x1x256x4xbf16>
    %48 = vector.shape_cast %47 : vector<1x1x256x4xbf16> to vector<256x4xbf16>
    %c8 = arith.constant 8 : index
    %c0_53 = arith.constant 0 : index
    %c0_54 = arith.constant 0 : index
    %49 = vector.load %arg3[%c8, %c0_53, %c0_54] : memref<9x4x32xbf16, #tpu.memory_space<vmem>>, vector<1x4x32xbf16>
    %50 = vector.shape_cast %49 : vector<1x4x32xbf16> to vector<4x32xbf16>
    %cst_55 = arith.constant dense<0.000000e+00> : vector<256x32xf32>
    %51 = tpu.matmul %48, %50, %cst_55 {dimension_numbers = #tpu.dot_dimension_numbers<[1], [0], [0], [1], [0, 0, 1, 1], [], []>} : vector<256x4xbf16>, vector<4x32xbf16>, vector<256x32xf32> -> vector<256x32xf32>
    %52 = arith.addf %46, %51 : vector<256x32xf32>
    %c0_56 = arith.constant 0 : index
    %c0_57 = arith.constant 0 : index
    %53 = vector.load %arg4[%c0_56, %c0_57] : memref<1x32xf32, #tpu.memory_space<vmem>>, vector<1x32xf32>
    %54 = vector.broadcast %53 : vector<1x32xf32> to vector<256x32xf32>
    %55 = arith.addf %52, %54 : vector<256x32xf32>
    %cst_58 = arith.constant 0.000000e+00 : f32
    %56 = vector.broadcast %cst_58 : f32 to vector<256x32xf32>
    %57 = arith.maximumf %55, %56 : vector<256x32xf32>
    %58 = arith.truncf %57 : vector<256x32xf32> to vector<256x32xbf16>
    %c0_59 = arith.constant 0 : index
    %c0_60 = arith.constant 0 : index
    %59 = vector.load %arg5[%c0_59, %c0_60] : memref<18x32xbf16, #tpu.memory_space<vmem>>, vector<18x32xbf16>
    %cst_61 = arith.constant dense<0.000000e+00> : vector<18x256xf32>
    %60 = tpu.matmul %59, %58, %cst_61 {dimension_numbers = #tpu.dot_dimension_numbers<[1], [1], [0], [0], [0, 0, 1, 0], [], []>} : vector<18x32xbf16>, vector<256x32xbf16>, vector<18x256xf32> -> vector<18x256xf32>
    %c0_62 = arith.constant 0 : index
    %c0_63 = arith.constant 0 : index
    %61 = vector.load %arg6[%c0_62, %c0_63] : memref<18x1xf32, #tpu.memory_space<vmem>>, vector<18x1xf32>
    %62 = vector.broadcast %61 : vector<18x1xf32> to vector<18x256xf32>
    %63 = arith.addf %60, %62 : vector<18x256xf32>
    %c0_64 = arith.constant 0 : index
    %c0_65 = arith.constant 0 : index
    %c0_66 = arith.constant 0 : index
    %64 = vector.load %arg7[%c0_64, %c0_65, %c0_66] : memref<1x18x256xf32, #tpu.memory_space<vmem>>, vector<1x18x256xf32>
    %65 = vector.shape_cast %64 : vector<1x18x256xf32> to vector<18x256xf32>
    %66 = vector.shape_cast %63 : vector<18x256xf32> to vector<1x18x256xf32>
    tpu.vector_store %arg7[%c0_64, %c0_65, %c0_66], %66 {strides = array<i32>} : memref<1x18x256xf32, #tpu.memory_space<vmem>>, vector<1x18x256xf32>,
    return
  }
  func.func @transform_0(%arg0: i32, %arg1: i32) -> (i32, i32, i32, i32) {
    %c0_i32 = arith.constant 0 : i32
    %c0_i32_0 = arith.constant 0 : i32
    %c0_i32_1 = arith.constant 0 : i32
    return %arg0, %arg1, %c0_i32, %c0_i32_0 : i32, i32, i32, i32
  }
  func.func @transform_1(%arg0: i32, %arg1: i32) -> (i32, i32, i32) {
    %c0_i32 = arith.constant 0 : i32
    %c0_i32_0 = arith.constant 0 : i32
    %c0_i32_1 = arith.constant 0 : i32
    %c0_i32_2 = arith.constant 0 : i32
    return %c0_i32, %c0_i32_0, %c0_i32_1 : i32, i32, i32
  }
  func.func @transform_2(%arg0: i32, %arg1: i32) -> (i32, i32) {
    %c0_i32 = arith.constant 0 : i32
    %c0_i32_0 = arith.constant 0 : i32
    %c0_i32_1 = arith.constant 0 : i32
    return %c0_i32, %c0_i32_0 : i32, i32
  }
  func.func @transform_3(%arg0: i32, %arg1: i32) -> (i32, i32) {
    %c0_i32 = arith.constant 0 : i32
    %c0_i32_0 = arith.constant 0 : i32
    %c0_i32_1 = arith.constant 0 : i32
    return %c0_i32, %c0_i32_0 : i32, i32
  }
  func.func @transform_4(%arg0: i32, %arg1: i32) -> (i32, i32) {
    %c0_i32 = arith.constant 0 : i32
    %c0_i32_0 = arith.constant 0 : i32
    %c0_i32_1 = arith.constant 0 : i32
    return %c0_i32, %c0_i32_0 : i32, i32
  }
  func.func @transform_5(%arg0: i32, %arg1: i32) -> (i32, i32, i32) {
    %c0_i32 = arith.constant 0 : i32
    %c0_i32_0 = arith.constant 0 : i32
    return %arg0, %c0_i32, %arg1 : i32, i32, i32
  }
}

module attributes {stable_mosaic.version = 11 : i64} {
  func.func @_rpn_head_kernel(%arg0: i32, %arg1: i32, %arg2: memref<1x1x176x4xbf16, #tpu.memory_space<vmem>>, %arg3: memref<9x4x32xbf16, #tpu.memory_space<vmem>>, %arg4: memref<1x32xf32, #tpu.memory_space<vmem>>, %arg5: memref<18x32xbf16, #tpu.memory_space<vmem>>, %arg6: memref<18x1xf32, #tpu.memory_space<vmem>>, %arg7: memref<1x18x128xf32, #tpu.memory_space<vmem>>) attributes {dimension_semantics = [#tpu.dimension_semantics<parallel>, #tpu.dimension_semantics<parallel>], iteration_bounds = array<i64: 2, 1>, scalar_prefetch = 0 : i64, scratch_operands = 0 : i64, tpu.core_type = #tpu.core_type<tc>, window_params = [{transform_indices = @transform_0, window_bounds = array<i64: 1, 1, 176, 4>}, {pipeline_mode = #tpu.pipeline_mode<synchronous>, transform_indices = @transform_1, window_bounds = array<i64: 9, 4, 32>}, {pipeline_mode = #tpu.pipeline_mode<synchronous>, transform_indices = @transform_2, window_bounds = array<i64: 1, 32>}, {pipeline_mode = #tpu.pipeline_mode<synchronous>, transform_indices = @transform_3, window_bounds = array<i64: 18, 32>}, {pipeline_mode = #tpu.pipeline_mode<synchronous>, transform_indices = @transform_4, window_bounds = array<i64: 18, 1>}, {transform_indices = @transform_5, window_bounds = array<i64: 1, 18, 128>}]} {
    %c0 = arith.constant 0 : index
    %c0_0 = arith.constant 0 : index
    %c0_1 = arith.constant 0 : index
    %c0_2 = arith.constant 0 : index
    %0 = vector.load %arg2[%c0, %c0_0, %c0_1, %c0_2] : memref<1x1x176x4xbf16, #tpu.memory_space<vmem>>, vector<1x1x128x4xbf16>
    %1 = vector.shape_cast %0 : vector<1x1x128x4xbf16> to vector<128x4xbf16>
    %c0_3 = arith.constant 0 : index
    %c0_4 = arith.constant 0 : index
    %c0_5 = arith.constant 0 : index
    %2 = vector.load %arg3[%c0_3, %c0_4, %c0_5] : memref<9x4x32xbf16, #tpu.memory_space<vmem>>, vector<1x4x32xbf16>
    %3 = vector.shape_cast %2 : vector<1x4x32xbf16> to vector<4x32xbf16>
    %cst = arith.constant dense<0.000000e+00> : vector<128x32xf32>
    %4 = tpu.matmul %1, %3, %cst {dimension_numbers = #tpu.dot_dimension_numbers<[1], [0], [0], [1], [0, 0, 1, 1], [], []>} : vector<128x4xbf16>, vector<4x32xbf16>, vector<128x32xf32> -> vector<128x32xf32>
    %c0_6 = arith.constant 0 : index
    %c0_7 = arith.constant 0 : index
    %c1 = arith.constant 1 : index
    %c0_8 = arith.constant 0 : index
    %5 = vector.load %arg2[%c0_6, %c0_7, %c1, %c0_8] : memref<1x1x176x4xbf16, #tpu.memory_space<vmem>>, vector<1x1x128x4xbf16>
    %6 = vector.shape_cast %5 : vector<1x1x128x4xbf16> to vector<128x4xbf16>
    %c1_9 = arith.constant 1 : index
    %c0_10 = arith.constant 0 : index
    %c0_11 = arith.constant 0 : index
    %7 = vector.load %arg3[%c1_9, %c0_10, %c0_11] : memref<9x4x32xbf16, #tpu.memory_space<vmem>>, vector<1x4x32xbf16>
    %8 = vector.shape_cast %7 : vector<1x4x32xbf16> to vector<4x32xbf16>
    %cst_12 = arith.constant dense<0.000000e+00> : vector<128x32xf32>
    %9 = tpu.matmul %6, %8, %cst_12 {dimension_numbers = #tpu.dot_dimension_numbers<[1], [0], [0], [1], [0, 0, 1, 1], [], []>} : vector<128x4xbf16>, vector<4x32xbf16>, vector<128x32xf32> -> vector<128x32xf32>
    %10 = arith.addf %4, %9 : vector<128x32xf32>
    %c0_13 = arith.constant 0 : index
    %c0_14 = arith.constant 0 : index
    %c2 = arith.constant 2 : index
    %c0_15 = arith.constant 0 : index
    %11 = vector.load %arg2[%c0_13, %c0_14, %c2, %c0_15] : memref<1x1x176x4xbf16, #tpu.memory_space<vmem>>, vector<1x1x128x4xbf16>
    %12 = vector.shape_cast %11 : vector<1x1x128x4xbf16> to vector<128x4xbf16>
    %c2_16 = arith.constant 2 : index
    %c0_17 = arith.constant 0 : index
    %c0_18 = arith.constant 0 : index
    %13 = vector.load %arg3[%c2_16, %c0_17, %c0_18] : memref<9x4x32xbf16, #tpu.memory_space<vmem>>, vector<1x4x32xbf16>
    %14 = vector.shape_cast %13 : vector<1x4x32xbf16> to vector<4x32xbf16>
    %cst_19 = arith.constant dense<0.000000e+00> : vector<128x32xf32>
    %15 = tpu.matmul %12, %14, %cst_19 {dimension_numbers = #tpu.dot_dimension_numbers<[1], [0], [0], [1], [0, 0, 1, 1], [], []>} : vector<128x4xbf16>, vector<4x32xbf16>, vector<128x32xf32> -> vector<128x32xf32>
    %16 = arith.addf %10, %15 : vector<128x32xf32>
    %c0_20 = arith.constant 0 : index
    %c0_21 = arith.constant 0 : index
    %c16 = arith.constant 16 : index
    %c0_22 = arith.constant 0 : index
    %17 = vector.load %arg2[%c0_20, %c0_21, %c16, %c0_22] : memref<1x1x176x4xbf16, #tpu.memory_space<vmem>>, vector<1x1x128x4xbf16>
    %18 = vector.shape_cast %17 : vector<1x1x128x4xbf16> to vector<128x4xbf16>
    %c3 = arith.constant 3 : index
    %c0_23 = arith.constant 0 : index
    %c0_24 = arith.constant 0 : index
    %19 = vector.load %arg3[%c3, %c0_23, %c0_24] : memref<9x4x32xbf16, #tpu.memory_space<vmem>>, vector<1x4x32xbf16>
    %20 = vector.shape_cast %19 : vector<1x4x32xbf16> to vector<4x32xbf16>
    %cst_25 = arith.constant dense<0.000000e+00> : vector<128x32xf32>
    %21 = tpu.matmul %18, %20, %cst_25 {dimension_numbers = #tpu.dot_dimension_numbers<[1], [0], [0], [1], [0, 0, 1, 1], [], []>} : vector<128x4xbf16>, vector<4x32xbf16>, vector<128x32xf32> -> vector<128x32xf32>
    %22 = arith.addf %16, %21 : vector<128x32xf32>
    %c0_26 = arith.constant 0 : index
    %c0_27 = arith.constant 0 : index
    %c17 = arith.constant 17 : index
    %c0_28 = arith.constant 0 : index
    %23 = vector.load %arg2[%c0_26, %c0_27, %c17, %c0_28] : memref<1x1x176x4xbf16, #tpu.memory_space<vmem>>, vector<1x1x128x4xbf16>
    %24 = vector.shape_cast %23 : vector<1x1x128x4xbf16> to vector<128x4xbf16>
    %c4 = arith.constant 4 : index
    %c0_29 = arith.constant 0 : index
    %c0_30 = arith.constant 0 : index
    %25 = vector.load %arg3[%c4, %c0_29, %c0_30] : memref<9x4x32xbf16, #tpu.memory_space<vmem>>, vector<1x4x32xbf16>
    %26 = vector.shape_cast %25 : vector<1x4x32xbf16> to vector<4x32xbf16>
    %cst_31 = arith.constant dense<0.000000e+00> : vector<128x32xf32>
    %27 = tpu.matmul %24, %26, %cst_31 {dimension_numbers = #tpu.dot_dimension_numbers<[1], [0], [0], [1], [0, 0, 1, 1], [], []>} : vector<128x4xbf16>, vector<4x32xbf16>, vector<128x32xf32> -> vector<128x32xf32>
    %28 = arith.addf %22, %27 : vector<128x32xf32>
    %c0_32 = arith.constant 0 : index
    %c0_33 = arith.constant 0 : index
    %c18 = arith.constant 18 : index
    %c0_34 = arith.constant 0 : index
    %29 = vector.load %arg2[%c0_32, %c0_33, %c18, %c0_34] : memref<1x1x176x4xbf16, #tpu.memory_space<vmem>>, vector<1x1x128x4xbf16>
    %30 = vector.shape_cast %29 : vector<1x1x128x4xbf16> to vector<128x4xbf16>
    %c5 = arith.constant 5 : index
    %c0_35 = arith.constant 0 : index
    %c0_36 = arith.constant 0 : index
    %31 = vector.load %arg3[%c5, %c0_35, %c0_36] : memref<9x4x32xbf16, #tpu.memory_space<vmem>>, vector<1x4x32xbf16>
    %32 = vector.shape_cast %31 : vector<1x4x32xbf16> to vector<4x32xbf16>
    %cst_37 = arith.constant dense<0.000000e+00> : vector<128x32xf32>
    %33 = tpu.matmul %30, %32, %cst_37 {dimension_numbers = #tpu.dot_dimension_numbers<[1], [0], [0], [1], [0, 0, 1, 1], [], []>} : vector<128x4xbf16>, vector<4x32xbf16>, vector<128x32xf32> -> vector<128x32xf32>
    %34 = arith.addf %28, %33 : vector<128x32xf32>
    %c0_38 = arith.constant 0 : index
    %c0_39 = arith.constant 0 : index
    %c32 = arith.constant 32 : index
    %c0_40 = arith.constant 0 : index
    %35 = vector.load %arg2[%c0_38, %c0_39, %c32, %c0_40] : memref<1x1x176x4xbf16, #tpu.memory_space<vmem>>, vector<1x1x128x4xbf16>
    %36 = vector.shape_cast %35 : vector<1x1x128x4xbf16> to vector<128x4xbf16>
    %c6 = arith.constant 6 : index
    %c0_41 = arith.constant 0 : index
    %c0_42 = arith.constant 0 : index
    %37 = vector.load %arg3[%c6, %c0_41, %c0_42] : memref<9x4x32xbf16, #tpu.memory_space<vmem>>, vector<1x4x32xbf16>
    %38 = vector.shape_cast %37 : vector<1x4x32xbf16> to vector<4x32xbf16>
    %cst_43 = arith.constant dense<0.000000e+00> : vector<128x32xf32>
    %39 = tpu.matmul %36, %38, %cst_43 {dimension_numbers = #tpu.dot_dimension_numbers<[1], [0], [0], [1], [0, 0, 1, 1], [], []>} : vector<128x4xbf16>, vector<4x32xbf16>, vector<128x32xf32> -> vector<128x32xf32>
    %40 = arith.addf %34, %39 : vector<128x32xf32>
    %c0_44 = arith.constant 0 : index
    %c0_45 = arith.constant 0 : index
    %c33 = arith.constant 33 : index
    %c0_46 = arith.constant 0 : index
    %41 = vector.load %arg2[%c0_44, %c0_45, %c33, %c0_46] : memref<1x1x176x4xbf16, #tpu.memory_space<vmem>>, vector<1x1x128x4xbf16>
    %42 = vector.shape_cast %41 : vector<1x1x128x4xbf16> to vector<128x4xbf16>
    %c7 = arith.constant 7 : index
    %c0_47 = arith.constant 0 : index
    %c0_48 = arith.constant 0 : index
    %43 = vector.load %arg3[%c7, %c0_47, %c0_48] : memref<9x4x32xbf16, #tpu.memory_space<vmem>>, vector<1x4x32xbf16>
    %44 = vector.shape_cast %43 : vector<1x4x32xbf16> to vector<4x32xbf16>
    %cst_49 = arith.constant dense<0.000000e+00> : vector<128x32xf32>
    %45 = tpu.matmul %42, %44, %cst_49 {dimension_numbers = #tpu.dot_dimension_numbers<[1], [0], [0], [1], [0, 0, 1, 1], [], []>} : vector<128x4xbf16>, vector<4x32xbf16>, vector<128x32xf32> -> vector<128x32xf32>
    %46 = arith.addf %40, %45 : vector<128x32xf32>
    %c0_50 = arith.constant 0 : index
    %c0_51 = arith.constant 0 : index
    %c34 = arith.constant 34 : index
    %c0_52 = arith.constant 0 : index
    %47 = vector.load %arg2[%c0_50, %c0_51, %c34, %c0_52] : memref<1x1x176x4xbf16, #tpu.memory_space<vmem>>, vector<1x1x128x4xbf16>
    %48 = vector.shape_cast %47 : vector<1x1x128x4xbf16> to vector<128x4xbf16>
    %c8 = arith.constant 8 : index
    %c0_53 = arith.constant 0 : index
    %c0_54 = arith.constant 0 : index
    %49 = vector.load %arg3[%c8, %c0_53, %c0_54] : memref<9x4x32xbf16, #tpu.memory_space<vmem>>, vector<1x4x32xbf16>
    %50 = vector.shape_cast %49 : vector<1x4x32xbf16> to vector<4x32xbf16>
    %cst_55 = arith.constant dense<0.000000e+00> : vector<128x32xf32>
    %51 = tpu.matmul %48, %50, %cst_55 {dimension_numbers = #tpu.dot_dimension_numbers<[1], [0], [0], [1], [0, 0, 1, 1], [], []>} : vector<128x4xbf16>, vector<4x32xbf16>, vector<128x32xf32> -> vector<128x32xf32>
    %52 = arith.addf %46, %51 : vector<128x32xf32>
    %c0_56 = arith.constant 0 : index
    %c0_57 = arith.constant 0 : index
    %53 = vector.load %arg4[%c0_56, %c0_57] : memref<1x32xf32, #tpu.memory_space<vmem>>, vector<1x32xf32>
    %54 = vector.broadcast %53 : vector<1x32xf32> to vector<128x32xf32>
    %55 = arith.addf %52, %54 : vector<128x32xf32>
    %cst_58 = arith.constant 0.000000e+00 : f32
    %56 = vector.broadcast %cst_58 : f32 to vector<128x32xf32>
    %57 = arith.maximumf %55, %56 : vector<128x32xf32>
    %58 = arith.truncf %57 : vector<128x32xf32> to vector<128x32xbf16>
    %c0_59 = arith.constant 0 : index
    %c0_60 = arith.constant 0 : index
    %59 = vector.load %arg5[%c0_59, %c0_60] : memref<18x32xbf16, #tpu.memory_space<vmem>>, vector<18x32xbf16>
    %cst_61 = arith.constant dense<0.000000e+00> : vector<18x128xf32>
    %60 = tpu.matmul %59, %58, %cst_61 {dimension_numbers = #tpu.dot_dimension_numbers<[1], [1], [0], [0], [0, 0, 1, 0], [], []>} : vector<18x32xbf16>, vector<128x32xbf16>, vector<18x128xf32> -> vector<18x128xf32>
    %c0_62 = arith.constant 0 : index
    %c0_63 = arith.constant 0 : index
    %61 = vector.load %arg6[%c0_62, %c0_63] : memref<18x1xf32, #tpu.memory_space<vmem>>, vector<18x1xf32>
    %62 = vector.broadcast %61 : vector<18x1xf32> to vector<18x128xf32>
    %63 = arith.addf %60, %62 : vector<18x128xf32>
    %c0_64 = arith.constant 0 : index
    %c0_65 = arith.constant 0 : index
    %c0_66 = arith.constant 0 : index
    %64 = vector.load %arg7[%c0_64, %c0_65, %c0_66] : memref<1x18x128xf32, #tpu.memory_space<vmem>>, vector<1x18x128xf32>
    %65 = vector.shape_cast %64 : vector<1x18x128xf32> to vector<18x128xf32>
    %66 = vector.shape_cast %63 : vector<18x128xf32> to vector<1x18x128xf32>
    tpu.vector_store %arg7[%c0_64, %c0_65, %c0_66], %66 {strides = array<i32>} : memref<1x18x128xf32, #tpu.memory_space<vmem>>, vector<1x18x128xf32>,
    return
  }
  func.func @transform_0(%arg0: i32, %arg1: i32) -> (i32, i32, i32, i32) {
    %c0_i32 = arith.constant 0 : i32
    %c0_i32_0 = arith.constant 0 : i32
    %c0_i32_1 = arith.constant 0 : i32
    return %arg0, %arg1, %c0_i32, %c0_i32_0 : i32, i32, i32, i32
  }
  func.func @transform_1(%arg0: i32, %arg1: i32) -> (i32, i32, i32) {
    %c0_i32 = arith.constant 0 : i32
    %c0_i32_0 = arith.constant 0 : i32
    %c0_i32_1 = arith.constant 0 : i32
    %c0_i32_2 = arith.constant 0 : i32
    return %c0_i32, %c0_i32_0, %c0_i32_1 : i32, i32, i32
  }
  func.func @transform_2(%arg0: i32, %arg1: i32) -> (i32, i32) {
    %c0_i32 = arith.constant 0 : i32
    %c0_i32_0 = arith.constant 0 : i32
    %c0_i32_1 = arith.constant 0 : i32
    return %c0_i32, %c0_i32_0 : i32, i32
  }
  func.func @transform_3(%arg0: i32, %arg1: i32) -> (i32, i32) {
    %c0_i32 = arith.constant 0 : i32
    %c0_i32_0 = arith.constant 0 : i32
    %c0_i32_1 = arith.constant 0 : i32
    return %c0_i32, %c0_i32_0 : i32, i32
  }
  func.func @transform_4(%arg0: i32, %arg1: i32) -> (i32, i32) {
    %c0_i32 = arith.constant 0 : i32
    %c0_i32_0 = arith.constant 0 : i32
    %c0_i32_1 = arith.constant 0 : i32
    return %c0_i32, %c0_i32_0 : i32, i32
  }
  func.func @transform_5(%arg0: i32, %arg1: i32) -> (i32, i32, i32) {
    %c0_i32 = arith.constant 0 : i32
    %c0_i32_0 = arith.constant 0 : i32
    return %arg0, %c0_i32, %arg1 : i32, i32, i32
  }
}

</mosaic_0001>

<bundles_post_ra>
// kernel: _lambda_.2
= control target key start
LH: loop header
LB: loop body
LE: loop exit
PB: predicated region body
PF: predicated region fallthrough
CT: control target
= control target key end

     0   :  { %s4796_s18 = smov 0   ;;  %s4798_s19 = smov 0   ;;  %s6085_s0 = inlined_call_operand.vmem [shape: bf16[2,2,352,4], index: 0, kind: input, shape index: {}]   ;;  %s6086_s1 = inlined_call_operand.vmem [shape: bf16[9,4,32], index: 1, kind: input, shape index: {}]   ;;  %s6087_s2 = inlined_call_operand.vmem [shape: f32[1,32], index: 2, kind: input, shape index: {}]   ;;  %s6088_s3 = inlined_call_operand.vmem [shape: bf16[18,32], index: 3, kind: input, shape index: {}]   ;;  %s6089_s4 = inlined_call_operand.vmem [shape: f32[18,1], index: 4, kind: input, shape index: {}]   ;;  %s6090_s5 = inlined_call_operand.vmem [shape: f32[2,18,512], index: 5, kind: output, shape index: {}]  }
   0x1   :  { %s4800_s20 = smov 0   ;;  %s4802_s21 = smov 0  }
   0x2   :  { %s4804_s22 = smov 0   ;;  %s4806_s23 = smov 0  }
   0x3   :  { %s4808_s24 = smov 0  }
   0x4 LB: > { %s24_s25 = sadd.s32 1, %s4755_s22  ;;  %s27_s26 = sadd.s32 1, %s4759_s23  ;;  %s4763_s24 = sphi %s4808_s24, %s15_s24   ;;  %s4759_s23 = sphi %s4806_s23, %s6097_s23   ;;  %s4755_s22 = sphi %s4804_s22, %s6096_s22   ;;  %s4751_s21 = sphi %s4802_s21, %s6095_s21   ;;  %s4747_s20 = sphi %s4800_s20, %s6094_s20   ;;  %s4743_s19 = sphi %s4798_s19, %s6093_s19   ;;  %s4739_s18 = sphi %s4796_s18, %s6092_s18  }
   0x5   : > { %p25_p0 = scmp.ge.s32.totalorder %s24_s25, 2  ;;  %s3806_s27 = sadd.s32 4294967295, %s4763_s24  }
   0x6   : > { %p158_p1 = scmp.ne.s32.totalorder %s4743_s19, %s4739_s18  ;;  %p159_p2 = scmp.eq.s32.totalorder %s3806_s27, 3 }
   0x7   : > { %s6099_s25 = smov (%p25_p0, %s24_s25), 0  ;;  %s6101_s26 = smov (!%p25_p0, %s27_s26), %s4759_s23 }
   0x8   : > { %s144_s28 = ssub.s32 %s4755_s22, %s6099_s25  ;;  %p29_p3 = scmp.ge.s32.totalorder %s6101_s26, 2 }
   0x9   : > { %p3810_p4 = scmp.ge.s32.totalorder %s4763_s24, 1  ;;  %p4842_p5 = por %p159_p2, %p158_p1 }
   0xa   : > { %p207_p6 = scmp.lt.s32.totalorder %s4763_s24, 5  ;;  %s6103_s26 = smov (%p29_p3, %s6101_s26), 0 }
   0xb   : > { %s143_s30 = ssub.s32 %s4759_s23, %s6103_s26  ;;  %s148_s7 = sadd.s32 1, %s4743_s19 }
   0xc   : > { %p208_p7 = pnand %p3810_p4, %p207_p6  ;;  %s145_s6 = sor.u32 %s144_s28, %s143_s30 }
   0xd   : > { %p146_p8 = scmp.eq.s32.totalorder %s145_s6, 0  ;;  %p238_p9 = scmp.lt.s32.totalorder (!%p208_p7), %s4751_s21, 1 }
   0xe   : > { %211 = sbr.rel (%p208_p7) target bundleno = 809 (0x329), region = 40  ;;  %p240_p10 = scmp.lt.s32.totalorder (!%p208_p7), %s4747_s20, 1 }
   0xf   : > { %s4853_s8 = scalar_select %p146_p8, %s4743_s19, %s148_s7  }
  0x13   : > { %v3812_v0 = vld [vmem:[%s6086_s1 + $0x2] sm:$0x3]  ;;  %vm550_vm0 = vcmask 1041408   ;;  %v3862_v2 = vld [vmem:[%s6086_s1 + $0x4] sm:$0x3]  ;;  %s239_s13 = scalar_select %p238_p9, %s4751_s21, 1 }
  0x14   : > { %4540 = vmatprep.subr.msk.bf16.mxu0 %vm550_vm0, %v3812_v0  ;;  %4541 = vmatprep.subr.msk.bf16.mxu1 %vm550_vm0, %v3812_v0  ;;  %v552_v1 = vsel %vm550_vm0, %v3812_v0, 0  ;;  %v281_v3 = vld [vmem:[%s6086_s1] sm:$0x3]  ;;  %s241_s16 = scalar_select %p240_p10, %s4747_s20, 1  ;;  %vm368_vm1 = vsmask.f32 7424 }
  0x15   : > { %4233 = vmatpush3.bf16.msra.mxu0 %v552_v1  ;;  %4539 = vmatpush3.bf16.msra.mxu1 %v552_v1  ;;  %s4560_s17 = smul.u32 88, %s239_s13  ;;  %vm501_vm2 = vcmask 31744   ;;  %v1000_v8 = vsel %vm550_vm0, %v3862_v2, 0  ;;  %v748_v16 = vsel %vm550_vm0, %v281_v3, 0  ;;  %v4921_v33 = vld [vmem:[%s6086_s1 + $0x8] sm:$0x3] }
  0x16   : > { %4543 = vmatprep.subr.msk.bf16.mxu0 %vm550_vm0, %v3862_v2  ;;  %4542 = vmatprep.subr.msk.bf16.mxu1 %vm550_vm0, %v281_v3  ;;  %s4559_s27 = smul.u32 44, %s241_s16  ;;  %v4941_v45 = vld [vmem:[%s6086_s1 + $0x6] sm:$0x3]  ;;  %vm917_vm3 = vcmask 1046528   ;;  %vm3581_vm4 = vcmask 261120  }
  0x18   : > { %s244_s28 = sadd.s32 %s4560_s17, %s4559_s27 }
  0x19   : > { %s3811_s30 = sshll.u32 %s244_s28, 2 }
  0x1a   : > { %s4876_s9 = scalar_lea.vmem %s6085_s0, %s3811_s30  ;;  %s235_s30 = sand.u32 1, %s4739_s18  }
  0x1b   : > { %v249_v4 = vld [vmem:[%s4876_s9] sm:$0xf]  ;;  %v4880_v5 = vld [vmem:[%s4876_s9 + $0x4] sm:$0xf]  ;;  %v4886_v7 = vld [vmem:[%s4876_s9 + $0x8] sm:$0xff]   ;;  %s4558_s6 = smul.u32 48, %s235_s30 }
  0x1c   : > { %v4883_v6 = vcombine.low %v249_v4, %v4880_v5  ;;  %v377_v11 = vshll.u32 %v4886_v7, 16  ;;  %v381_v12 = vshrl.u32 %v4886_v7, 16  ;;  %v4894_v13 = vld [vmem:[%s4876_s9 + $0x50] sm:$0xff]   ;;  %v4897_v14 = vld [vmem:[%s4876_s9 + $0x58] sm:$0xff]   ;;  %v4909_v24 = vld [vmem:[%s4876_s9 + $0x60] sm:$0xff]   ;;  %s4055_s18 = sshll.u32 (%p4842_p5), %s4747_s20, 1 }
  0x1d   : > { %v4900_v15 = vld [vmem:[%s4876_s9 + $0x10] sm:$0xff]   ;;  %v449_v19 = vshll.u32 %v4894_v13, 16  ;;  %v453_v20 = vshrl.u32 %v4894_v13, 16  ;;  %v457_v21 = vshll.u32 %v4897_v14, 16  ;;  %v461_v22 = vshrl.u32 %v4897_v14, 16  ;;  %v4914_v28 = vld [vmem:[%s4876_s9 + $0x18] sm:$0xff]  }
  0x1e   : > { %v370_v9 = vshrl.u32 %v4883_v6, 16  ;;  %v372_v10 = vshll.u32 %v4883_v6, 16  ;;  %v379_v18 = vrot.slane %v377_v11, 1  ;;  %v385_v23 = vshll.u32 %v4900_v15, 16  ;;  %v4927_v37 = vld [vmem:[%s4876_s9 + $0x68] sm:$0xff]   ;;  %v4931_v39 = vld [vmem:[%s4876_s9 + $0x20] sm:$0xff]  }
  0x1f   : > { %v4911_v27 = vrot.slane %v449_v19, 1  ;;  %v459_v29 = vrot.slane %v457_v21, 1  ;;  %v465_v31 = vshll.u32 %v4909_v24, 16  ;;  %v389_v32 = vshrl.u32 %v4900_v15, 16  ;;  %v4936_v44 = vld [vmem:[%s4876_s9 + $0x70] sm:$0xff]   ;;  %v4948_v50 = vld [vmem:[%s4876_s9 + $0x28] sm:$0xff]  }
  0x20   : > { %v374_v17 = vrot.slane %v372_v10, 1  ;;  %v383_v26 = vor.u32 %v381_v12, %v379_v18  ;;  %v387_v30 = vrot.slane %v385_v23, 1  ;;  %v393_v36 = vshll.u32 %v4914_v28, 16  ;;  %v4963_v62 = vld [vmem:[%s4876_s9 + $0x78] sm:$0xff]   ;;  %v4973_v10 = vld [vmem:[%s4876_s9 + $0x30] sm:$0xff]   ;;  %s237_s7 = scalar_lea.vmem [#allocation2], %s4558_s6 }
  0x21   : > { %v455_v35 = vor.u32 %v453_v20, %v4911_v27  ;;  %v469_v38 = vshrl.u32 %v4909_v24, 16  ;;  %v463_v40 = vor.u32 %v461_v22, %v459_v29  ;;  %v467_v42 = vrot.slane %v465_v31, 1  ;;  %v4976_v11 = vld [vmem:[%s4876_s9 + $0x38] sm:$0xff]  }
  0x22   : > { %v375_v25 = vor.u32 %v374_v17, %v370_v9  ;;  %v388_v41 = vsel %vm368_vm1, %v383_v26, %v387_v30  ;;  %v391_v43 = vor.u32 %v389_v32, %v387_v30  ;;  %v395_v47 = vrot.slane %v393_v36, 1  ;;  %v4980_v17 = vld [vmem:[%s4876_s9 + $0x80] ss:$0 sps:$4 sm:$0x11]  }
  0x23   : > { %v460_v46 = vsel %vm368_vm1, %v455_v35, %v459_v29  ;;  %v473_v48 = vshll.u32 %v4927_v37, 16  ;;  %v397_v49 = vshrl.u32 %v4914_v28, 16  ;;  %v468_v51 = vsel %vm368_vm1, %v463_v40, %v467_v42  ;;  %v4991_v29 = vld [vmem:[%s4876_s9 + $0x40] sm:$0xff]   ;;  %v4997_v35 = vld [vmem:[%s4876_s9 + $0x48] sm:$0xff]  }
  0x24   : > { %v380_v34 = vsel %vm368_vm1, %v375_v25, %v379_v18  ;;  %4254 = vmatprep.mubr.msk.bf16.mxu1 %vm501_vm2, %v460_v46  ;;  %v471_v52 = vor.u32 %v469_v38, %v467_v42  ;;  %v401_v53 = vshll.u32 %v4931_v39, 16  ;;  %v477_v54 = vshrl.u32 %v4927_v37, 16 }
  0x25   : > { %4234 = vmatprep.mubr.msk.bf16.mxu0 %vm501_vm2, %v380_v34  ;;  %4255 = vmatmul.mubr.msk.bf16.vlgmr.msra.gmra.mxu1 %vm501_vm2, %v468_v51  ;;  %v396_v55 = vsel %vm368_vm1, %v391_v43, %v395_v47  ;;  %v475_v56 = vrot.slane %v473_v48, 1  ;;  %v399_v57 = vor.u32 %v397_v49, %v395_v47  ;;  %v481_v58 = vshll.u32 %v4936_v44, 16 }
  0x26   : > { %4235 = vmatmul.mubr.msk.bf16.vlgmr.msra.gmra.mxu0 %vm501_vm2, %v388_v41  ;;  %v403_v59 = vrot.slane %v401_v53, 1  ;;  %v405_v60 = vshrl.u32 %v4931_v39, 16  ;;  %v409_v61 = vshll.u32 %v4948_v50, 16  ;;  %4267 = vmatpush3.bf16.msra.mxu1 %v748_v16  ;;  %v485_v2 = vshrl.u32 %v4936_v44, 16 }
  0x27   : > { %4301 = vmatpush3.bf16.msra.mxu0 %v1000_v8  ;;  %4238 = vmatprep.mubr.msk.bf16.mxu0 %vm501_vm2, %v396_v55  ;;  %v476_v63 = vsel %vm368_vm1, %v471_v52, %v475_v56  ;;  %v479_v0 = vor.u32 %v477_v54, %v475_v56  ;;  %v483_v1 = vrot.slane %v481_v58, 1  ;;  %v489_v9 = vshll.u32 %v4963_v62, 16  ;;  %v911_v55 = vld [vmem:[%s4876_s9] sm:$0xe] }
  0x28   : > { %4545 = vmatprep.subr.msk.bf16.mxu0 %vm550_vm0, %v4921_v33  ;;  %4544 = vmatprep.subr.msk.bf16.mxu1 %vm550_vm0, %v4941_v45  ;;  %v404_v3 = vsel %vm368_vm1, %v399_v57, %v403_v59  ;;  %v407_v4 = vor.u32 %v405_v60, %v403_v59  ;;  %v411_v8 = vrot.slane %v409_v61, 1  ;;  %v413_v16 = vshrl.u32 %v4948_v50, 16 }
  0x29   : > { %4258 = vmatprep.mubr.msk.bf16.mxu1 %vm501_vm2, %v476_v63  ;;  %v487_v12 = vor.u32 %v485_v2, %v483_v1  ;;  %v493_v18 = vshrl.u32 %v4963_v62, 16  ;;  %v484_v19 = vsel %vm368_vm1, %v479_v0, %v483_v1  ;;  %v491_v21 = vrot.slane %v489_v9, 1 }
  0x2a   : > { %v412_v20 = vsel %vm368_vm1, %v407_v4, %v411_v8  ;;  %v417_v22 = vshll.u32 %v4973_v10, 16  ;;  %v497_v23 = vshll.u32 %v4980_v17, 16  ;;  %v421_v25 = vshrl.u32 %v4973_v10, 16  ;;  %v5051_v4 = vld [vmem:[%s6086_s1 + $0xc] sm:$0x3] }
  0x2b   : > { %v425_v26 = vshll.u32 %v4976_v11, 16  ;;  %v492_v30 = vsel %vm368_vm1, %v487_v12, %v491_v21  ;;  %v415_v31 = vor.u32 %v413_v16, %v411_v8  ;;  %v495_v36 = vor.u32 %v493_v18, %v491_v21 }
  0x2c   : > { %v419_v32 = vrot.slane %v417_v22, 1  ;;  %v499_v38 = vrot.slane %v497_v23, 1  ;;  %v433_v41 = vshll.u32 %v4991_v29, 16  ;;  %v429_v43 = vshrl.u32 %v4976_v11, 16 }
  0x2d   : > { %4259 = vmatmul.mubr.msk.bf16.gmra.mxu1 %vm501_vm2, %v484_v19  ;;  %v427_v34 = vrot.slane %v425_v26, 1  ;;  %v437_v47 = vshrl.u32 %v4991_v29, 16  ;;  %v441_v48 = vshll.u32 %v4997_v35, 16  ;;  %v445_v57 = vshrl.u32 %v4997_v35, 16  ;;  %v5101_v26 = vld [vmem:[%s4876_s9 + $0x14] sm:$0xf] }
  0x2e   : > { %4239 = vmatmul.mubr.msk.bf16.gmra.mxu0 %vm501_vm2, %v404_v3  ;;  %4262 = vmatprep.mubr.msk.bf16.mxu1 %vm501_vm2, %v492_v30  ;;  %v423_v40 = vor.u32 %v421_v25, %v419_v32  ;;  %v420_v42 = vsel %vm368_vm1, %v415_v31, %v419_v32  ;;  %v500_v49 = vsel %vm368_vm1, %v495_v36, %v499_v38  ;;  %v435_v51 = vrot.slane %v433_v41, 1  ;;  %v1553_v25 = vld [vmem:[%s4876_s9 + $0x10] sm:$0xf]  ;;  %v5118_v32 = vld [vmem:[%s4876_s9 + $0x18] sm:$0xff]  }
  0x2f   : > { %4242 = vmatprep.mubr.msk.bf16.mxu0 %vm501_vm2, %v412_v20  ;;  %v431_v52 = vor.u32 %v429_v43, %v427_v34  ;;  %v443_v54 = vrot.slane %v441_v48, 1  ;;  %v3863_v59 = vcombine.low %v911_v55, %v4880_v5  ;;  %v1358_v60 = vsel %vm550_vm0, %v4941_v45, 0  ;;  %v4640_v36 = vld [vmem:[%s4876_s9 + $0x18] sm:$0xff]   ;;  %v5130_v43 = vld [vmem:[%s4876_s9 + $0x20] sm:$0xff]  }
  0x30   : > { %v428_v46 = vsel %vm368_vm1, %v423_v40, %v427_v34  ;;  %v439_v53 = vor.u32 %v437_v47, %v435_v51  ;;  %v919_v0 = vrot.slane %v4886_v7, 1  ;;  %v921_v1 = vrot.slane %v4900_v15, 1  ;;  %v5137_v47 = vld [vmem:[%s6086_s1 + $0xe] sm:$0x3] }
  0x31   : > { %v436_v56 = vsel %vm368_vm1, %v431_v52, %v435_v51  ;;  %v447_v61 = vor.u32 %v445_v57, %v443_v54  ;;  %v918_v63 = vrot.slane %v3863_v59, 1  ;;  %v933_v16 = vrot.slane %v4991_v29, 1  ;;  %v5141_v51 = vld [vmem:[%s4876_s9 + $0x28] sm:$0xff]  }
  0x32   : > { %v444_v58 = vsel %vm368_vm1, %v439_v53, %v443_v54  ;;  %v922_v2 = vsel %vm917_vm3, %v919_v0, %v921_v1  ;;  %v937_v19 = vrot.slane %v4894_v13, 1  ;;  %v939_v20 = vrot.slane %v4897_v14, 1  ;;  %v4642_v54 = vld [vmem:[%s4876_s9 + $0x28] sm:$0xff]  }
  0x33   : > { %v452_v5 = vsel %vm368_vm1, %v447_v61, %v4911_v27  ;;  %v920_v45 = vsel %vm917_vm3, %v918_v63, %v919_v0  ;;  %v1852_v27 = vsel %vm550_vm0, %v4921_v33, 0  ;;  %v943_v23 = vrot.slane %v4927_v37, 1  ;;  %v5161_v0 = vld [vmem:[%s4876_s9 + $0x38] sm:$0xff]  }
  0x34   : > { %v940_v22 = vsel %vm917_vm3, %v937_v19, %v939_v20  ;;  %v3914_v30 = vcombine.low %v1553_v25, %v5101_v26  ;;  %v945_v31 = vrot.slane %v4936_v44, 1  ;;  %v1687_v52 = vshll.u32 %v5130_v43, 16 }
  0x35   : > { %4263 = vmatmul.mubr.msk.bf16.gmra.mxu1 %vm501_vm2, %v500_v49  ;;  %v1683_v53 = vshrl.u32 %v5118_v32, 16  ;;  %v1695_v57 = vshll.u32 %v5141_v51, 16 }
  0x36   : > { %4243 = vmatmul.mubr.msk.bf16.gmra.mxu0 %vm501_vm2, %v420_v42  ;;  %4268 = vmatprep.mubr.msk.bf16.mxu1 %vm501_vm2, %v4883_v6  ;;  %v5024_v6 = vld [vmem:[%s6086_s1 + $0xa] sm:$0x3]  ;;  %v1674_v34 = vshll.u32 %v3914_v30, 16  ;;  %v1672_v40 = vshrl.u32 %v3914_v30, 16  ;;  %v4641_v42 = vld [vmem:[%s4876_s9 + $0x20] sm:$0xff]   ;;  %v1689_v59 = vrot.slane %v1687_v52, 1 }
  0x37   : > { %4246 = vmatprep.mubr.msk.bf16.mxu0 %vm501_vm2, %v428_v46  ;;  %v949_v46 = vrot.slane %v4980_v17, 1  ;;  %v1697_v63 = vrot.slane %v1695_v57, 1  ;;  %v5206_v30 = vld [vmem:[%s4876_s9 + $0x58] sm:$0xff]   ;;  %v4660_v57 = vld [vmem:[%s4876_s9 + $0x70] sm:$0xff]  }
  0x38   : > { %v1676_v41 = vrot.slane %v1674_v34, 1  ;;  %v4654_v34 = vld [vmem:[%s4876_s9 + $0x58] sm:$0xff]  }
  0x3a   : > { %v1677_v48 = vor.u32 %v1676_v41, %v1672_v40  ;;  %v4656_v40 = vld [vmem:[%s4876_s9 + $0x60] sm:$0xff]  }
  0x3d   : > { %4269 = vmatmul.mubr.msk.bf16.vlgmr.msra.gmra.mxu1 %vm501_vm2, %v4886_v7  ;;  %v923_v7 = vrot.slane %v4914_v28, 1 }
  0x3e   : > { %4247 = vmatmul.mubr.msk.bf16.gmra.mxu0 %vm501_vm2, %v436_v56  ;;  %4272 = vmatprep.mubr.msk.bf16.mxu1 %vm501_vm2, %v4900_v15  ;;  %v925_v15 = vrot.slane %v4931_v39, 1  ;;  %v1691_v56 = vshrl.u32 %v5130_v43, 16 }
  0x3f   : > { %4250 = vmatprep.mubr.msk.bf16.mxu0 %vm501_vm2, %v444_v58  ;;  %4335 = vmatpush3.bf16.msra.mxu1 %v1358_v60  ;;  %v924_v3 = vsel %vm917_vm3, %v921_v1, %v923_v7  ;;  %v4643_v58 = vld [vmem:[%s4876_s9 + $0x30] sm:$0xff]   ;;  %v1699_v1 = vshrl.u32 %v5141_v51, 16 }
  0x40   : > { %4546 = vmatprep.subr.msk.bf16.mxu1 %vm550_vm0, %v5024_v6  ;;  %v926_v33 = vsel %vm917_vm3, %v923_v7, %v925_v15  ;;  %v5156_v60 = vld [vmem:[%s4876_s9 + $0x30] sm:$0xff]   ;;  %v4646_v7 = vld [vmem:[%s4876_s9 + $0x38] sm:$0xff]  }
  0x45   : > { %4273 = vmatmul.mubr.msk.bf16.gmra.mxu1 %vm501_vm2, %v4914_v28  ;;  %v927_v28 = vrot.slane %v4948_v50, 1 }
  0x46   : > { %4251 = vmatmul.mubr.msk.bf16.gmra.mxu0 %vm501_vm2, %v452_v5  ;;  %4276 = vmatprep.mubr.msk.bf16.mxu1 %vm501_vm2, %v4931_v39  ;;  %v929_v39 = vrot.slane %v4973_v10, 1  ;;  %v1703_v5 = vshll.u32 %v5156_v60, 16 }
  0x47   : > { %4302 = vmatprep.mubr.msk.bf16.mxu0 %vm501_vm2, %v920_v45  ;;  %v928_v8 = vsel %vm917_vm3, %v925_v15, %v927_v28  ;;  %v1711_v15 = vshll.u32 %v5161_v0, 16 }
  0x48   : > { %v930_v9 = vsel %vm917_vm3, %v927_v28, %v929_v39  ;;  %v4648_v28 = vld [vmem:[%s4876_s9 + $0x40] sm:$0xff]  }
  0x4d   : > { %4277 = vmatmul.mubr.msk.bf16.gmra.mxu1 %vm501_vm2, %v4948_v50  ;;  %v931_v50 = vrot.slane %v4976_v11, 1 }
  0x4e   : > { %4303 = vmatmul.mubr.msk.bf16.vlgmr.msra.gmra.mxu0 %vm501_vm2, %v922_v2  ;;  %4280 = vmatprep.mubr.msk.bf16.mxu1 %vm501_vm2, %v4973_v10  ;;  %v935_v10 = vrot.slane %v4997_v35, 1  ;;  %v2493_v2 = vsel %vm550_vm0, %v5051_v4, 0 }
  0x4f   : > { %4369 = vmatpush3.bf16.msra.mxu0 %v1852_v27  ;;  %4306 = vmatprep.mubr.msk.bf16.mxu0 %vm501_vm2, %v924_v3  ;;  %v932_v12 = vsel %vm917_vm3, %v929_v39, %v931_v50  ;;  %v1707_v3 = vshrl.u32 %v5156_v60, 16  ;;  %v5181_v39 = vld [vmem:[%s4876_s9 + $0x40] sm:$0xff]  }
  0x50   : > { %4547 = vmatprep.subr.msk.bf16.mxu0 %vm550_vm0, %v5051_v4  ;;  %v936_v18 = vsel %vm917_vm3, %v933_v16, %v935_v10  ;;  %v938_v21 = vsel %vm917_vm3, %v935_v10, %v937_v19  ;;  %v1701_v4 = vor.u32 %v1699_v1, %v1697_v63 }
  0x55   : > { %4281 = vmatmul.mubr.msk.bf16.gmra.mxu1 %vm501_vm2, %v4976_v11  ;;  %v934_v11 = vsel %vm917_vm3, %v931_v50, %v933_v16  ;;  %v1719_v16 = vshll.u32 %v5181_v39, 16 }
  0x56   : > { %4307 = vmatmul.mubr.msk.bf16.gmra.mxu0 %vm501_vm2, %v926_v33  ;;  %4284 = vmatprep.mubr.msk.bf16.mxu1 %vm501_vm2, %v4991_v29  ;;  %v5177_v33 = vld [vmem:[%s6086_s1 + $0x10] sm:$0x3] }
  0x57   : > { %4310 = vmatprep.mubr.msk.bf16.mxu0 %vm501_vm2, %v928_v8  ;;  %v1705_v8 = vrot.slane %v1703_v5, 1  ;;  %v5242_v5 = vld [vmem:[%s4876_s9 + $0x78] sm:$0xff]  }
  0x59   : > { %v1709_v50 = vor.u32 %v1707_v3, %v1705_v8  ;;  %v1706_v10 = vsel %vm368_vm1, %v1701_v4, %v1705_v8  ;;  %v4664_v8 = vld [vmem:[%s4876_s9 + $0x80] sm:$0xff]  }
  0x5d   : > { %4285 = vmatmul.mubr.msk.bf16.gmra.mxu1 %vm501_vm2, %v4997_v35  ;;  %v946_v35 = vsel %vm917_vm3, %v943_v23, %v945_v31 }
  0x5e   : > { %4311 = vmatmul.mubr.msk.bf16.gmra.mxu0 %vm501_vm2, %v930_v9  ;;  %4288 = vmatprep.mubr.msk.bf16.mxu1 %vm501_vm2, %v4894_v13  ;;  %v941_v13 = vrot.slane %v4909_v24, 1  ;;  %v1713_v9 = vrot.slane %v1711_v15, 1 }
  0x5f   : > { %4314 = vmatprep.mubr.msk.bf16.mxu0 %vm501_vm2, %v932_v12  ;;  %v5186_v12 = vld [vmem:[%s4876_s9 + $0x48] sm:$0xff]  }
  0x60   : > { %v944_v29 = vsel %vm917_vm3, %v941_v13, %v943_v23  ;;  %v1714_v19 = vsel %vm368_vm1, %v1709_v50, %v1713_v9  ;;  %v5201_v23 = vld [vmem:[%s4876_s9 + $0x50] sm:$0xff]  }
  0x65   : > { %4289 = vmatmul.mubr.msk.bf16.gmra.mxu1 %vm501_vm2, %v4897_v14  ;;  %v942_v14 = vsel %vm917_vm3, %v939_v20, %v941_v13  ;;  %v1723_v20 = vshrl.u32 %v5181_v39, 16  ;;  %v1721_v13 = vrot.slane %v1719_v16, 1 }
  0x66   : > { %4315 = vmatmul.mubr.msk.bf16.gmra.mxu0 %vm501_vm2, %v934_v11  ;;  %4292 = vmatprep.mubr.msk.bf16.mxu1 %vm501_vm2, %v4909_v24  ;;  %v4639_v24 = vld [vmem:[%s4876_s9 + $0x10] sm:$0xff]   ;;  %v1715_v11 = vshrl.u32 %v5161_v0, 16 }
  0x67   : > { %4318 = vmatprep.mubr.msk.bf16.mxu0 %vm501_vm2, %v936_v18  ;;  %v4650_v18 = vld [vmem:[%s4876_s9 + $0x48] sm:$0xff]  }
  0x68   : > { %v1717_v25 = vor.u32 %v1715_v11, %v1713_v9  ;;  %v5257_v9 = vld [vmem:[%s4876_s9 + $0x80] sm:$0xff]  }
  0x6d   : > { %4293 = vmatmul.mubr.msk.bf16.gmra.mxu1 %vm501_vm2, %v4927_v37  ;;  %v947_v37 = vrot.slane %v4963_v62, 1 }
  0x6e   : > { %4319 = vmatmul.mubr.msk.bf16.gmra.mxu0 %vm501_vm2, %v938_v21  ;;  %4296 = vmatprep.mubr.msk.bf16.mxu1 %vm501_vm2, %v4936_v44  ;;  %v1679_v44 = vshll.u32 %v5118_v32, 16  ;;  %v1727_v21 = vshll.u32 %v5186_v12, 16 }
  0x6f   : > { %4322 = vmatprep.mubr.msk.bf16.mxu0 %vm501_vm2, %v940_v22  ;;  %v948_v38 = vsel %vm917_vm3, %v945_v31, %v947_v37  ;;  %v950_v17 = vsel %vm917_vm3, %v947_v37, %v949_v46  ;;  %v4652_v22 = vld [vmem:[%s4876_s9 + $0x50] sm:$0xff]   ;;  %v1722_v31 = vsel %vm368_vm1, %v1717_v25, %v1721_v13  ;;  %v1731_v37 = vshrl.u32 %v5186_v12, 16 }
  0x70   : > { %v1681_v49 = vrot.slane %v1679_v44, 1  ;;  %v5219_v44 = vld [vmem:[%s4876_s9 + $0x60] sm:$0xff]  }
  0x72   : > { %v1682_v55 = vsel %vm368_vm1, %v1677_v48, %v1681_v49  ;;  %v1685_v61 = vor.u32 %v1683_v53, %v1681_v49  ;;  %v5224_v48 = vld [vmem:[%s4876_s9 + $0x68] sm:$0xff]   ;;  %v1751_v49 = vshll.u32 %v5219_v44, 16 }
  0x73   : > { %v4658_v53 = vld [vmem:[%s4876_s9 + $0x68] sm:$0xff]  }
  0x74   : > { %v1690_v45 = vsel %vm368_vm1, %v1685_v61, %v1689_v59 }
  0x75   : > { %4297 = vmatmul.mubr.msk.bf16.gmra.mxu1 %vm501_vm2, %v4963_v62  ;;  %v2135_v62 = vsel %vm550_vm0, %v5024_v6, 0  ;;  %v1693_v6 = vor.u32 %v1691_v56, %v1689_v59  ;;  %v1759_v56 = vshll.u32 %v5224_v48, 16  ;;  %v5237_v59 = vld [vmem:[%s4876_s9 + $0x70] sm:$0xff]  }
  0x76   : > { %4323 = vmatmul.mubr.msk.bf16.gmra.mxu0 %vm501_vm2, %v942_v14  ;;  %4336 = vmatprep.mubr.msk.bf16.mxu1 %vm501_vm2, %v4639_v24  ;;  %v1725_v14 = vor.u32 %v1723_v20, %v1721_v13  ;;  %v1735_v24 = vshll.u32 %v5201_v23, 16  ;;  %v1771_v15 = vshrl.u32 %v5237_v59, 16  ;;  %v2054_v20 = vrot.slane %v5118_v32, 1  ;;  %v4666_v13 = vld [vmem:[%s4876_s9 + $0x88] sm:$0xff]  }
  0x77   : > { %4326 = vmatprep.mubr.msk.bf16.mxu0 %vm501_vm2, %v944_v29  ;;  %v1698_v27 = vsel %vm368_vm1, %v1693_v6, %v1697_v63  ;;  %v1729_v29 = vrot.slane %v1727_v21, 1  ;;  %v1761_v63 = vrot.slane %v1759_v56, 1  ;;  %v1783_v21 = vshll.u32 %v5257_v9, 16 }
  0x78   : > { %v1737_v41 = vrot.slane %v1735_v24, 1 }
  0x7d   : > { %4337 = vmatmul.mubr.msk.bf16.vlgmr.msra.gmra.mxu1 %vm501_vm2, %v4640_v36  ;;  %v1739_v36 = vshrl.u32 %v5201_v23, 16 }
  0x7e   : > { %4327 = vmatmul.mubr.msk.bf16.gmra.mxu0 %vm501_vm2, %v946_v35  ;;  %4340 = vmatprep.mubr.msk.bf16.mxu1 %vm501_vm2, %v4641_v42  ;;  %v1730_v35 = vsel %vm368_vm1, %v1725_v14, %v1729_v29  ;;  %v1733_v42 = vor.u32 %v1731_v37, %v1729_v29  ;;  %v1787_v14 = vshrl.u32 %v5257_v9, 16  ;;  %v5277_v37 = vld [vmem:[%s4876_s9 + $0x90] ss:$0 sps:$4 sm:$0x11]  }
  0x7f   : > { %4330 = vmatprep.mubr.msk.bf16.mxu0 %vm501_vm2, %v948_v38  ;;  %4403 = vmatpush3.bf16.msra.mxu1 %v2135_v62  ;;  %v1743_v38 = vshll.u32 %v5206_v30, 16  ;;  %v1741_v62 = vor.u32 %v1739_v36, %v1737_v41  ;;  %v2056_v36 = vrot.slane %v5130_v43, 1  ;;  %v2987_v43 = vsel %vm550_vm0, %v5137_v47, 0 }
  0x80   : > { %4548 = vmatprep.subr.msk.bf16.mxu1 %vm550_vm0, %v5137_v47  ;;  %v1738_v52 = vsel %vm368_vm1, %v1733_v42, %v1737_v41  ;;  %v1799_v42 = vshll.u32 %v5277_v37, 16 }
  0x81   : > { %v1745_v46 = vrot.slane %v1743_v38, 1  ;;  %v2058_v38 = vrot.slane %v5141_v51, 1 }
  0x85   : > { %4341 = vmatmul.mubr.msk.bf16.gmra.mxu1 %vm501_vm2, %v4642_v54  ;;  %v1746_v54 = vsel %vm368_vm1, %v1741_v62, %v1745_v46 }
  0x86   : > { %4331 = vmatmul.mubr.msk.bf16.gmra.mxu0 %vm501_vm2, %v950_v17  ;;  %4344 = vmatprep.mubr.msk.bf16.mxu1 %vm501_vm2, %v4643_v58  ;;  %v1747_v17 = vshrl.u32 %v5206_v30, 16  ;;  %v1753_v58 = vrot.slane %v1751_v49, 1  ;;  %v2059_v49 = vsel %vm917_vm3, %v2056_v36, %v2058_v38 }
  0x87   : > { %4370 = vmatprep.mubr.msk.bf16.mxu0 %vm501_vm2, %v1682_v55  ;;  %v1755_v55 = vshrl.u32 %v5219_v44, 16 }
  0x88   : > { %v1749_v61 = vor.u32 %v1747_v17, %v1745_v46  ;;  %v2057_v46 = vsel %vm917_vm3, %v2054_v20, %v2056_v36  ;;  %v2060_v17 = vrot.slane %v5156_v60, 1  ;;  %v2064_v60 = vrot.slane %v5181_v39, 1 }
  0x89   : > { %v1757_v6 = vor.u32 %v1755_v55, %v1753_v58  ;;  %v4673_v55 = vld [vmem:[%s4876_s9 + $0x20] sm:$0xff]   ;;  %v2068_v39 = vrot.slane %v5201_v23, 1  ;;  %v2072_v23 = vrot.slane %v5219_v44, 1  ;;  %v2078_v44 = vrot.slane %v5242_v5, 1 }
  0x8a   : > { %v1754_v1 = vsel %vm368_vm1, %v1749_v61, %v1753_v58  ;;  %v2061_v47 = vsel %vm917_vm3, %v2058_v38, %v2060_v17  ;;  %v4675_v58 = vld [vmem:[%s4876_s9 + $0x30] sm:$0xff]   ;;  %v3270_v61 = vsel %vm550_vm0, %v5177_v33, 0 }
  0x8b   : > { %v1762_v3 = vsel %vm368_vm1, %v1757_v6, %v1761_v63 }
  0x8d   : > { %4345 = vmatmul.mubr.msk.bf16.gmra.mxu1 %vm501_vm2, %v4646_v7  ;;  %v1763_v7 = vshrl.u32 %v5224_v48, 16 }
  0x8e   : > { %4371 = vmatmul.mubr.msk.bf16.vlgmr.msra.gmra.mxu0 %vm501_vm2, %v1690_v45  ;;  %4348 = vmatprep.mubr.msk.bf16.mxu1 %vm501_vm2, %v4648_v28  ;;  %v1767_v45 = vshll.u32 %v5237_v59, 16  ;;  %v1775_v28 = vshll.u32 %v5242_v5, 16 }
  0x8f   : > { %4437 = vmatpush3.bf16.msra.mxu0 %v2493_v2  ;;  %4374 = vmatprep.mubr.msk.bf16.mxu0 %vm501_vm2, %v1698_v27  ;;  %v2047_v2 = vld [vmem:[%s4876_s9 + $0x10] sm:$0xe]  ;;  %v4662_v27 = vld [vmem:[%s4876_s9 + $0x78] sm:$0xff]   ;;  %v1765_v16 = vor.u32 %v1763_v7, %v1761_v63 }
  0x90   : > { %4549 = vmatprep.subr.msk.bf16.mxu0 %vm550_vm0, %v5177_v33  ;;  %v1769_v4 = vrot.slane %v1767_v45, 1  ;;  %v3948_v50 = vcombine.low %v2047_v2, %v5101_v26  ;;  %v1777_v11 = vrot.slane %v1775_v28, 1  ;;  %v2070_v33 = vrot.slane %v5206_v30, 1  ;;  %v4677_v45 = vld [vmem:[%s4876_s9 + $0x40] sm:$0xff]   ;;  %v4678_v30 = vld [vmem:[%s4876_s9 + $0x48] sm:$0xff]  }
  0x91   : > { %v2074_v2 = vrot.slane %v5224_v48, 1  ;;  %v2076_v28 = vrot.slane %v5237_v59, 1  ;;  %v2688_v48 = vld [vmem:[%s4876_s9 + $0x20] sm:$0xf] }
  0x92   : > { %v1770_v26 = vsel %vm368_vm1, %v1765_v16, %v1769_v4  ;;  %v2071_v7 = vsel %vm917_vm3, %v2068_v39, %v2070_v33 }
  0x93   : > { %v2077_v16 = vsel %vm917_vm3, %v2074_v2, %v2076_v28 }
  0x95   : > { %4349 = vmatmul.mubr.msk.bf16.gmra.mxu1 %vm501_vm2, %v4650_v18  ;;  %v5262_v18 = vld [vmem:[%s4876_s9 + $0x88] sm:$0xff]  }
  0x96   : > { %4375 = vmatmul.mubr.msk.bf16.gmra.mxu0 %vm501_vm2, %v1706_v10  ;;  %4352 = vmatprep.mubr.msk.bf16.mxu1 %vm501_vm2, %v4652_v22  ;;  %v1773_v10 = vor.u32 %v1771_v15, %v1769_v4  ;;  %v1779_v22 = vshrl.u32 %v5242_v5, 16  ;;  %v1791_v29 = vshll.u32 %v5262_v18, 16  ;;  %v1795_v41 = vshrl.u32 %v5262_v18, 16  ;;  %v4681_v4 = vld [vmem:[%s4876_s9 + $0x60] sm:$0xff]  }
  0x97   : > { %4378 = vmatprep.mubr.msk.bf16.mxu0 %vm501_vm2, %v1714_v19  ;;  %v2053_v19 = vrot.slane %v3948_v50, 1  ;;  %v2075_v15 = vsel %vm917_vm3, %v2072_v23, %v2074_v2  ;;  %v5343_v50 = vld [vmem:[%s4876_s9 + $0x24] sm:$0xf] }
  0x98   : > { %v1778_v25 = vsel %vm368_vm1, %v1773_v10, %v1777_v11  ;;  %v1781_v32 = vor.u32 %v1779_v22, %v1777_v11  ;;  %v2079_v11 = vsel %vm917_vm3, %v2076_v28, %v2078_v44  ;;  %v3999_v59 = vcombine.low %v2688_v48, %v5343_v50  ;;  %v4682_v22 = vld [vmem:[%s4876_s9 + $0x68] sm:$0xff]  }
  0x99   : > { %v2055_v24 = vsel %vm917_vm3, %v2053_v19, %v2054_v20  ;;  %v2080_v20 = vrot.slane %v5257_v9, 1 }
  0x9d   : > { %4353 = vmatmul.mubr.msk.bf16.gmra.mxu1 %vm501_vm2, %v4654_v34 }
  0x9e   : > { %4379 = vmatmul.mubr.msk.bf16.gmra.mxu0 %vm501_vm2, %v1722_v31  ;;  %4356 = vmatprep.mubr.msk.bf16.mxu1 %vm501_vm2, %v4656_v40  ;;  %v1785_v31 = vrot.slane %v1783_v21, 1 }
  0x9f   : > { %4382 = vmatprep.mubr.msk.bf16.mxu0 %vm501_vm2, %v1730_v35  ;;  %v1793_v35 = vrot.slane %v1791_v29, 1  ;;  %v4683_v29 = vld [vmem:[%s4876_s9 + $0x70] sm:$0xff]  }
  0xa0   : > { %v1789_v34 = vor.u32 %v1787_v14, %v1785_v31  ;;  %v1786_v40 = vsel %vm368_vm1, %v1781_v32, %v1785_v31  ;;  %v2809_v14 = vshll.u32 %v3999_v59, 16  ;;  %v2081_v32 = vsel %vm917_vm3, %v2078_v44, %v2080_v20 }
  0xa1   : > { %v1797_v51 = vor.u32 %v1795_v41, %v1793_v35 }
  0xa2   : > { %v1794_v62 = vsel %vm368_vm1, %v1789_v34, %v1793_v35  ;;  %v2807_v35 = vshrl.u32 %v3999_v59, 16  ;;  %v2811_v36 = vrot.slane %v2809_v14, 1 }
  0xa5   : > { %4357 = vmatmul.mubr.msk.bf16.gmra.mxu1 %vm501_vm2, %v4658_v53  ;;  %v2062_v53 = vrot.slane %v5161_v0, 1  ;;  %v4674_v0 = vld [vmem:[%s4876_s9 + $0x28] sm:$0xff]  }
  0xa6   : > { %4383 = vmatmul.mubr.msk.bf16.gmra.mxu0 %vm501_vm2, %v1738_v52  ;;  %4360 = vmatprep.mubr.msk.bf16.mxu1 %vm501_vm2, %v4660_v57  ;;  %v1801_v52 = vrot.slane %v1799_v42, 1  ;;  %v2066_v57 = vrot.slane %v5186_v12, 1  ;;  %v4676_v12 = vld [vmem:[%s4876_s9 + $0x38] sm:$0xff]   ;;  %v5388_v42 = vld [vmem:[%s4876_s9 + $0x30] sm:$0xff]  }
  0xa7   : > { %4386 = vmatprep.mubr.msk.bf16.mxu0 %vm501_vm2, %v1746_v54  ;;  %v2063_v56 = vsel %vm917_vm3, %v2060_v17, %v2062_v53  ;;  %v2065_v6 = vsel %vm917_vm3, %v2062_v53, %v2064_v60  ;;  %v5398_v17 = vld [vmem:[%s4876_s9 + $0x38] sm:$0xff]   ;;  %v4685_v53 = vld [vmem:[%s4876_s9 + $0x80] sm:$0xff]  }
  0xa8   : > { %v1802_v54 = vsel %vm368_vm1, %v1797_v51, %v1801_v52  ;;  %v2067_v63 = vsel %vm917_vm3, %v2064_v60, %v2066_v57  ;;  %v2812_v51 = vor.u32 %v2811_v36, %v2807_v35  ;;  %v2834_v48 = vshrl.u32 %v5398_v17, 16 }
  0xad   : > { %4361 = vmatmul.mubr.msk.bf16.gmra.mxu1 %vm501_vm2, %v4662_v27  ;;  %v4679_v27 = vld [vmem:[%s4876_s9 + $0x50] sm:$0xff]  }
  0xae   : > { %4387 = vmatmul.mubr.msk.bf16.gmra.mxu0 %vm501_vm2, %v1754_v1  ;;  %4364 = vmatprep.mubr.msk.bf16.mxu1 %vm501_vm2, %v4664_v8  ;;  %v2069_v1 = vsel %vm917_vm3, %v2066_v57, %v2068_v39  ;;  %v4680_v8 = vld [vmem:[%s4876_s9 + $0x58] sm:$0xff]  }
  0xaf   : > { %4390 = vmatprep.mubr.msk.bf16.mxu0 %vm501_vm2, %v1762_v3  ;;  %v2073_v3 = vsel %vm917_vm3, %v2070_v33, %v2072_v23  ;;  %v4688_v23 = vld [vmem:[%s4876_s9 + $0x88] sm:$0xff]  }
  0xb5   : > { %4365 = vmatmul.mubr.msk.bf16.gmra.mxu1 %vm501_vm2, %v4666_v13  ;;  %v2082_v13 = vrot.slane %v5262_v18, 1 }
  0xb6   : > { %4391 = vmatmul.mubr.msk.bf16.gmra.mxu0 %vm501_vm2, %v1770_v26  ;;  %4404 = vmatprep.mubr.msk.bf16.mxu1 %vm501_vm2, %v2055_v24 }
  0xb7   : > { %4394 = vmatprep.mubr.msk.bf16.mxu0 %vm501_vm2, %v1778_v25  ;;  %v5366_v25 = vld [vmem:[%s4876_s9 + $0x28] sm:$0xff]   ;;  %v2083_v18 = vsel %vm917_vm3, %v2080_v20, %v2082_v13 }
  0xb8   : > { %v2814_v38 = vshll.u32 %v5366_v25, 16 }
  0xba   : > { %v2816_v52 = vrot.slane %v2814_v38, 1 }
  0xbc   : > { %v2817_v57 = vsel %vm368_vm1, %v2812_v51, %v2816_v52 }
  0xbd   : > { %4405 = vmatmul.mubr.msk.bf16.vlgmr.msra.gmra.mxu1 %vm501_vm2, %v2057_v46 }
  0xbe   : > { %4395 = vmatmul.mubr.msk.bf16.gmra.mxu0 %vm501_vm2, %v1786_v40  ;;  %4408 = vmatprep.mubr.msk.bf16.mxu1 %vm501_vm2, %v2059_v49 }
  0xbf   : > { %4398 = vmatprep.mubr.msk.bf16.mxu0 %vm501_vm2, %v1794_v62  ;;  %4471 = vmatpush3.bf16.msra.mxu1 %v2987_v43  ;;  %v2084_v62 = vrot.slane %v5277_v37, 1  ;;  %v4684_v43 = vld [vmem:[%s4876_s9 + $0x78] sm:$0xff]   ;;  %v2818_v37 = vshrl.u32 %v5366_v25, 16 }
  0xc1   : > { %v2820_v33 = vor.u32 %v2818_v37, %v2816_v52 }
  0xc5   : > { %4409 = vmatmul.mubr.msk.bf16.gmra.mxu1 %vm501_vm2, %v2061_v47  ;;  %v2822_v47 = vshll.u32 %v5388_v42, 16 }
  0xc6   : > { %4399 = vmatmul.mubr.msk.bf16.gmra.mxu0 %vm501_vm2, %v1802_v54  ;;  %4412 = vmatprep.mubr.msk.bf16.mxu1 %vm501_vm2, %v2063_v56  ;;  %v2085_v56 = vsel %vm917_vm3, %v2082_v13, %v2084_v62 }
  0xc7   : > { %4438 = vmatprep.mubr.msk.bf16.mxu0 %vm501_vm2, %v4673_v55  ;;  %v2824_v39 = vrot.slane %v2822_v47, 1 }
  0xcd   : > { %4413 = vmatmul.mubr.msk.bf16.gmra.mxu1 %vm501_vm2, %v2065_v6 }
  0xce   : > { %4439 = vmatmul.mubr.msk.bf16.vlgmr.msra.gmra.mxu0 %vm501_vm2, %v4674_v0  ;;  %4416 = vmatprep.mubr.msk.bf16.mxu1 %vm501_vm2, %v2067_v63 }
  0xcf   : > { %4505 = vmatpush3.bf16.msra.mxu0 %v3270_v61  ;;  %4442 = vmatprep.mubr.msk.bf16.mxu0 %vm501_vm2, %v4675_v58  ;;  %v2826_v58 = vshrl.u32 %v5388_v42, 16  ;;  %v2830_v61 = vshll.u32 %v5398_v17, 16 }
  0xd1   : > { %v2832_v2 = vrot.slane %v2830_v61, 1 }
  0xd3   : > { %v2836_v36 = vor.u32 %v2834_v48, %v2832_v2 }
  0xd5   : > { %4417 = vmatmul.mubr.msk.bf16.gmra.mxu1 %vm501_vm2, %v2069_v1 }
  0xd6   : > { %4443 = vmatmul.mubr.msk.bf16.gmra.mxu0 %vm501_vm2, %v4676_v12  ;;  %4420 = vmatprep.mubr.msk.bf16.mxu1 %vm501_vm2, %v2071_v7  ;;  %v5423_v12 = vld [vmem:[%s4876_s9 + $0x40] sm:$0xff]  }
  0xd7   : > { %4446 = vmatprep.mubr.msk.bf16.mxu0 %vm501_vm2, %v4677_v45  ;;  %v3182_v45 = vld [vmem:[%s4876_s9 + $0x20] sm:$0xe]  ;;  %v2842_v20 = vshrl.u32 %v5423_v12, 16 }
  0xd8   : > { %v4033_v44 = vcombine.low %v3182_v45, %v5343_v50 }
  0xdd   : > { %4421 = vmatmul.mubr.msk.bf16.gmra.mxu1 %vm501_vm2, %v2073_v3  ;;  %v4690_v3 = vld [vmem:[%s4876_s9 + $0x90] sm:$0xff]  }
  0xde   : > { %4447 = vmatmul.mubr.msk.bf16.gmra.mxu0 %vm501_vm2, %v4678_v30  ;;  %4424 = vmatprep.mubr.msk.bf16.mxu1 %vm501_vm2, %v2075_v15  ;;  %v2828_v30 = vor.u32 %v2826_v58, %v2824_v39 }
  0xdf   : > { %4450 = vmatprep.mubr.msk.bf16.mxu0 %vm501_vm2, %v4679_v27  ;;  %v5433_v27 = vld [vmem:[%s4876_s9 + $0x48] sm:$0xff]  }
  0xe0   : > { %v2833_v59 = vsel %vm368_vm1, %v2828_v30, %v2832_v2  ;;  %v2850_v61 = vshrl.u32 %v5433_v27, 16 }
  0xe5   : > { %v5352_v5 = vpop.f32.mrf.mxu1  ;;  %4425 = vmatmul.mubr.msk.bf16.gmra.mxu1 %vm501_vm2, %v2077_v16 }
  0xe6   : > { %v5346_v10 = vpop.f32.mrf.mxu0  ;;  %4451 = vmatmul.mubr.msk.bf16.gmra.mxu0 %vm501_vm2, %v4680_v8  ;;  %4428 = vmatprep.mubr.msk.bf16.mxu1 %vm501_vm2, %v2079_v11  ;;  %v2838_v8 = vshll.u32 %v5423_v12, 16 }
  0xe7   : > { %4454 = vmatprep.mubr.msk.bf16.mxu0 %vm501_vm2, %v4681_v4  ;;  %v5359_v21 = vpop.f32.mrf.mxu1  ;;  %v2825_v4 = vsel %vm368_vm1, %v2820_v33, %v2824_v39 }
  0xe8   : > { %v5355_v19 = vpop.f32.mrf.mxu0  ;;  %v2840_v14 = vrot.slane %v2838_v8, 1 }
  0xe9   : > { %v5369_v24 = vpop.f32.mrf.mxu1 }
  0xea   : > { %v5361_v26 = vpop.f32.mrf.mxu0  ;;  %v2844_v51 = vor.u32 %v2842_v20, %v2840_v14  ;;  %v2841_v58 = vsel %vm368_vm1, %v2836_v36, %v2840_v14 }
  0xeb   : > { %v5374_v34 = vpop.f32.mrf.mxu1 }
  0xec   : > { %v5371_v31 = vpop.f32.mrf.mxu0 }
  0xed   : > { %v5382_v40 = vpop.f32.mrf.mxu1  ;;  %4429 = vmatmul.mubr.msk.bf16.gmra.mxu1 %vm501_vm2, %v2081_v32  ;;  %v3189_v32 = vrot.slane %v5366_v25, 1 }
  0xee   : > { %v5376_v9 = vpop.f32.mrf.mxu0  ;;  %4455 = vmatmul.mubr.msk.bf16.gmra.mxu0 %vm501_vm2, %v4682_v22  ;;  %4432 = vmatprep.mubr.msk.bf16.mxu1 %vm501_vm2, %v2083_v18  ;;  %v2846_v22 = vshll.u32 %v5433_v27, 16  ;;  %v5458_v18 = vld [vmem:[%s4876_s9 + $0x50] sm:$0xff]  }
  0xef   : > { %4458 = vmatprep.mubr.msk.bf16.mxu0 %vm501_vm2, %v4683_v29  ;;  %v5392_v46 = vpop.f32.mrf.mxu1  ;;  %v3188_v29 = vrot.slane %v4033_v44, 1  ;;  %v2858_v45 = vshrl.u32 %v5458_v18, 16  ;;  %v3193_v44 = vrot.slane %v5398_v17, 1 }
  0xf0   : > { %v5385_v41 = vpop.f32.mrf.mxu0  ;;  %v2848_v52 = vrot.slane %v2846_v22, 1 }
  0xf1   : > { %v5401_v54 = vpop.f32.mrf.mxu1  ;;  %v3190_v25 = vsel %vm917_vm3, %v3188_v29, %v3189_v32 }
  0xf2   : > { %v5394_v49 = vpop.f32.mrf.mxu0 }
  0xf3   : > { %v5408_v60 = vpop.f32.mrf.mxu1 }
  0xf4   : > { %v5403_v55 = vpop.f32.mrf.mxu0 }
  0xf5   : > { %v5417_v6 = vpop.f32.mrf.mxu1  ;;  %4433 = vmatmul.mubr.msk.bf16.gmra.mxu1 %vm501_vm2, %v2085_v56 }
  0xf6   : > { %v5410_v0 = vpop.f32.mrf.mxu0  ;;  %4459 = vmatmul.mubr.msk.bf16.gmra.mxu0 %vm501_vm2, %v4684_v43  ;;  %4472 = vmatprep.mubr.msk.bf16.mxu1 %vm501_vm2, %v2817_v57  ;;  %v4692_v43 = vld [vmem:[%s4876_s9 + $0x98] sm:$0xff]  }
  0xf7   : > { %4462 = vmatprep.mubr.msk.bf16.mxu0 %vm501_vm2, %v4685_v53  ;;  %v5427_v1 = vpop.f32.mrf.mxu1  ;;  %v5466_v53 = vld [vmem:[%s4876_s9 + $0x58] sm:$0xff]  }
  0xf8   : > { %v5420_v63 = vpop.f32.mrf.mxu0 }
  0xf9   : > { %v5436_v15 = vpop.f32.mrf.mxu1 }
  0xfa   : > { %v5429_v7 = vpop.f32.mrf.mxu0 }
  0xfb   : > { %v5444_v16 = vpop.f32.mrf.mxu1 }
  0xfc   : > { %v5438_v28 = vpop.f32.mrf.mxu0 }
  0xfd   : > { %v4270_v50 = vpop.f32.mrf.mxu1  ;;  %4473 = vmatmul.mubr.msk.bf16.vlgmr.msra.gmra.mxu1 %vm501_vm2, %v2825_v4  ;;  %v5490_v4 = vld [vmem:[%s4876_s9 + $0x60] sm:$0xff]  }
  0xfe   : > { %v5446_v11 = vpop.f32.mrf.mxu0  ;;  %4463 = vmatmul.mubr.msk.bf16.gmra.mxu0 %vm501_vm2, %v4688_v23  ;;  %v793_v35 = vadd.f32 %v4270_v50, %v5346_v10  ;;  %4476 = vmatprep.mubr.msk.bf16.mxu1 %vm501_vm2, %v2833_v59  ;;  %v2854_v10 = vshll.u32 %v5458_v18, 16  ;;  %v2862_v23 = vshll.u32 %v5466_v53, 16  ;;  %v2852_v59 = vor.u32 %v2850_v61, %v2848_v52  ;;  %v5497_v50 = vld [vmem:[%s4876_s9 + $0x68] sm:$0xff]  }
  0xff   : > { %4466 = vmatprep.mubr.msk.bf16.mxu0 %vm501_vm2, %v4690_v3  ;;  %v784_v38 = vpop.f32.mrf.mxu1  ;;  %v3195_v61 = vrot.slane %v5423_v12, 1 }
 0x100   : > { %v5454_v13 = vpop.f32.mrf.mxu0  ;;  %v785_v47 = vadd.f32 %v784_v38, %v5355_v19  ;;  %v2849_v19 = vsel %vm368_vm1, %v2844_v51, %v2848_v52  ;;  %v2856_v8 = vrot.slane %v2854_v10, 1  ;;  %v2866_v52 = vshrl.u32 %v5466_v53, 16 }
 0x101   : > { %v4271_v56 = vpop.f32.mrf.mxu1  ;;  %v2878_v10 = vshll.u32 %v5497_v50, 16 }
 0x102   : > { %v5462_v62 = vpop.f32.mrf.mxu0  ;;  %v796_v57 = vadd.f32 %v4271_v56, %v5361_v26  ;;  %v3191_v26 = vrot.slane %v5388_v42, 1  ;;  %v2860_v22 = vor.u32 %v2858_v45, %v2856_v8  ;;  %v2864_v42 = vrot.slane %v2862_v23, 1 }
 0x103   : > { %v787_v39 = vpop.f32.mrf.mxu1  ;;  %v2857_v51 = vsel %vm368_vm1, %v2852_v59, %v2856_v8  ;;  %v3197_v23 = vrot.slane %v5433_v27, 1 }
 0x104   : > { %v5469_v37 = vpop.f32.mrf.mxu0  ;;  %v788_v30 = vadd.f32 %v787_v39, %v5371_v31  ;;  %v3192_v29 = vsel %vm917_vm3, %v3189_v32, %v3191_v26  ;;  %v3194_v38 = vsel %vm917_vm3, %v3191_v26, %v3193_v44  ;;  %v2874_v32 = vshrl.u32 %v5490_v4, 16  ;;  %v5524_v26 = vld [vmem:[%s4876_s9 + $0x70] sm:$0xff]  }
 0x105   : > { %v4274_v2 = vpop.f32.mrf.mxu1  ;;  %4477 = vmatmul.mubr.msk.bf16.gmra.mxu1 %vm501_vm2, %v2841_v58 }
 0x106   : > { %v5476_v33 = vpop.f32.mrf.mxu0  ;;  %4467 = vmatmul.mubr.msk.bf16.gmra.mxu0 %vm501_vm2, %v4692_v43  ;;  %v809_v48 = vadd.f32 %v4274_v2, %v5376_v9  ;;  %4480 = vmatprep.mubr.msk.bf16.mxu1 %vm501_vm2, %v2849_v19  ;;  %v2870_v9 = vshll.u32 %v5490_v4, 16 }
 0x107   : > { %4506 = vmatprep.mubr.msk.bf16.mxu0 %vm501_vm2, %v3190_v25  ;;  %v800_v31 = vpop.f32.mrf.mxu1 }
 0x108   : > { %v5486_v3 = vpop.f32.mrf.mxu0  ;;  %v801_v14 = vadd.f32 %v800_v31, %v5385_v41  ;;  %v2865_v41 = vsel %vm368_vm1, %v2860_v22, %v2864_v42  ;;  %v2872_v45 = vrot.slane %v2870_v9, 1  ;;  %v2880_v31 = vrot.slane %v2878_v10, 1  ;;  %v5533_v22 = vld [vmem:[%s4876_s9 + $0x78] sm:$0xff]  }
 0x109   : > { %v4275_v36 = vpop.f32.mrf.mxu1 }
 0x10a   : > { %v5494_v20 = vpop.f32.mrf.mxu0  ;;  %v5506_v43 = vadd.f32 %v4275_v36, %v5394_v49  ;;  %v2876_v12 = vor.u32 %v2874_v32, %v2872_v45  ;;  %v3196_v36 = vsel %vm917_vm3, %v3193_v44, %v3195_v61  ;;  %v3199_v32 = vrot.slane %v5458_v18, 1 }
 0x10b   : > { %v803_v56 = vpop.f32.mrf.mxu1 }
 0x10c   : > { %v5501_v17 = vpop.f32.mrf.mxu0  ;;  %v5515_v58 = vadd.f32 %v803_v56, %v5403_v55  ;;  %v2881_v44 = vsel %vm368_vm1, %v2876_v12, %v2880_v31 }
 0x10d   : > { %v4278_v39 = vpop.f32.mrf.mxu1  ;;  %4481 = vmatmul.mubr.msk.bf16.gmra.mxu1 %vm501_vm2, %v2857_v51 }
 0x10e   : > { %v4304_v25 = vpop.f32.mrf.mxu0  ;;  %4507 = vmatmul.mubr.msk.bf16.vlgmr.msra.gmra.mxu0 %vm501_vm2, %v3192_v29  ;;  %v5527_v2 = vadd.f32 %v4278_v39, %v5410_v0  ;;  %4484 = vmatprep.mubr.msk.bf16.mxu1 %vm501_vm2, %v2865_v41  ;;  %v2894_v41 = vshll.u32 %v5533_v22, 16 }
 0x10f   : > { %v5517_v49 = vadd.f32 %v4304_v25, %v793_v35  ;;  %4510 = vmatprep.mubr.msk.bf16.mxu0 %vm501_vm2, %v3194_v38  ;;  %v2868_v35 = vor.u32 %v2866_v52, %v2864_v42  ;;  %v816_v8 = vpop.f32.mrf.mxu1  ;;  %v2886_v42 = vshll.u32 %v5524_v26, 16  ;;  %v2890_v25 = vshrl.u32 %v5524_v26, 16 }
 0x110   : > { %v1036_v19 = vpop.f32.mrf.mxu0  ;;  %v5536_v29 = vadd.f32 %v816_v8, %v5420_v63  ;;  %v2882_v63 = vshrl.u32 %v5497_v50, 16  ;;  %v2896_v18 = vrot.slane %v2894_v41, 1 }
 0x111   : > { %v5529_v55 = vadd.f32 %v1036_v19, %v785_v47  ;;  %v4279_v0 = vpop.f32.mrf.mxu1  ;;  %v3198_v47 = vsel %vm917_vm3, %v3195_v61, %v3197_v23  ;;  %v2873_v52 = vsel %vm368_vm1, %v2868_v35, %v2872_v45  ;;  %v2888_v39 = vrot.slane %v2886_v42, 1  ;;  %v5564_v45 = vld [vmem:[%s4876_s9 + $0x80] sm:$0xff]  }
 0x112   : > { %v4305_v59 = vpop.f32.mrf.mxu0  ;;  %v5544_v9 = vadd.f32 %v4279_v0, %v5429_v7  ;;  %v3201_v19 = vrot.slane %v5466_v53, 1 }
 0x113   : > { %v5538_v27 = vadd.f32 %v4305_v59, %v796_v57  ;;  %v819_v57 = vpop.f32.mrf.mxu1  ;;  %v2892_v12 = vor.u32 %v2890_v25, %v2888_v39  ;;  %v3203_v25 = vrot.slane %v5490_v4, 1 }
 0x114   : > { %v1039_v38 = vpop.f32.mrf.mxu0  ;;  %v5555_v7 = vadd.f32 %v819_v57, %v5438_v28 }
 0x115   : > { %v5546_v51 = vadd.f32 %v1039_v38, %v788_v30  ;;  %v4282_v10 = vpop.f32.mrf.mxu1  ;;  %4485 = vmatmul.mubr.msk.bf16.gmra.mxu1 %vm501_vm2, %v2873_v52  ;;  %v3200_v38 = vsel %vm917_vm3, %v3197_v23, %v3199_v32  ;;  %v2897_v23 = vsel %vm368_vm1, %v2892_v12, %v2896_v18 }
 0x116   : > { %v4308_v56 = vpop.f32.mrf.mxu0  ;;  %4511 = vmatmul.mubr.msk.bf16.gmra.mxu0 %vm501_vm2, %v3196_v36  ;;  %v841_v35 = vadd.f32 %v4282_v10, %v5446_v11  ;;  %4488 = vmatprep.mubr.msk.bf16.mxu1 %vm501_vm2, %v2881_v44  ;;  %v5571_v36 = vld [vmem:[%s4876_s9 + $0x88] sm:$0xff]  }
 0x117   : > { %v5557_v30 = vadd.f32 %v4308_v56, %v809_v48  ;;  %4514 = vmatprep.mubr.msk.bf16.mxu0 %vm501_vm2, %v3198_v47  ;;  %v2884_v48 = vor.u32 %v2882_v63, %v2880_v31  ;;  %v832_v8 = vpop.f32.mrf.mxu1  ;;  %v3202_v31 = vsel %vm917_vm3, %v3199_v32, %v3201_v19  ;;  %v2902_v47 = vshll.u32 %v5564_v45, 16 }
 0x118   : > { %v1052_v61 = vpop.f32.mrf.mxu0  ;;  %v5574_v0 = vadd.f32 %v832_v8, %v5454_v13  ;;  %v2898_v63 = vshrl.u32 %v5533_v22, 16  ;;  %v2906_v56 = vshrl.u32 %v5564_v45, 16  ;;  %v2910_v44 = vshll.u32 %v5571_v36, 16 }
 0x119   : > { %v5567_v28 = vadd.f32 %v1052_v61, %v801_v14  ;;  %v4283_v11 = vpop.f32.mrf.mxu1  ;;  %v2889_v13 = vsel %vm368_vm1, %v2884_v48, %v2888_v39  ;;  %v2904_v10 = vrot.slane %v2902_v47, 1  ;;  %v3205_v61 = vrot.slane %v5497_v50, 1  ;;  %v5603_v39 = vld [vmem:[%s4876_s9 + $0x90] sm:$0xff]  }
 0x11a   : > { %v4309_v59 = vpop.f32.mrf.mxu0  ;;  %v5583_v42 = vadd.f32 %v4283_v11, %v5462_v62  ;;  %v2912_v12 = vrot.slane %v2910_v44, 1  ;;  %v2918_v47 = vshll.u32 %v5603_v39, 16 }
 0x11b   : > { %v5577_v53 = vadd.f32 %v4309_v59, %v5506_v43  ;;  %v835_v43 = vpop.f32.mrf.mxu1  ;;  %v2908_v4 = vor.u32 %v2906_v56, %v2904_v10 }
 0x11c   : > { %v1055_v14 = vpop.f32.mrf.mxu0  ;;  %v836_v62 = vadd.f32 %v835_v43, %v5469_v37 }
 0x11d   : > { %v5586_v52 = vadd.f32 %v1055_v14, %v5515_v58  ;;  %v4286_v41 = vpop.f32.mrf.mxu1  ;;  %4489 = vmatmul.mubr.msk.bf16.gmra.mxu1 %vm501_vm2, %v2889_v13  ;;  %v3204_v14 = vsel %vm917_vm3, %v3201_v19, %v3203_v25  ;;  %v2913_v19 = vsel %vm368_vm1, %v2908_v4, %v2912_v12 }
 0x11e   : > { %v4312_v57 = vpop.f32.mrf.mxu0  ;;  %4515 = vmatmul.mubr.msk.bf16.gmra.mxu0 %vm501_vm2, %v3200_v38  ;;  %v857_v48 = vadd.f32 %v4286_v41, %v5476_v33  ;;  %4492 = vmatprep.mubr.msk.bf16.mxu1 %vm501_vm2, %v2897_v23  ;;  %v5611_v38 = vld [vmem:[%s4876_s9 + $0x98] sm:$0xff]   ;;  %v2920_v41 = vrot.slane %v2918_v47, 1 }
 0x11f   : > { %v5596_v58 = vadd.f32 %v4312_v57, %v5527_v2  ;;  %4518 = vmatprep.mubr.msk.bf16.mxu0 %vm501_vm2, %v3202_v31  ;;  %v2900_v2 = vor.u32 %v2898_v63, %v2896_v18  ;;  %v848_v8 = vpop.f32.mrf.mxu1  ;;  %v3206_v18 = vsel %vm917_vm3, %v3203_v25, %v3205_v61  ;;  %v2922_v57 = vshrl.u32 %v5603_v39, 16 }
 0x120   : > { %v1068_v32 = vpop.f32.mrf.mxu0  ;;  %v849_v11 = vadd.f32 %v848_v8, %v5486_v3  ;;  %v2926_v23 = vshll.u32 %v5611_v38, 16  ;;  %v2930_v47 = vshrl.u32 %v5611_v38, 16 }
 0x121   : > { %v5607_v37 = vadd.f32 %v1068_v32, %v5536_v29  ;;  %v4287_v33 = vpop.f32.mrf.mxu1  ;;  %v2914_v29 = vshrl.u32 %v5571_v36, 16  ;;  %v2905_v3 = vsel %vm368_vm1, %v2900_v2, %v2904_v10  ;;  %v3209_v32 = vrot.slane %v5533_v22, 1 }
 0x122   : > { %v4313_v59 = vpop.f32.mrf.mxu0  ;;  %v860_v13 = vadd.f32 %v4287_v33, %v5494_v20  ;;  %v3207_v20 = vrot.slane %v5524_v26, 1  ;;  %v2924_v26 = vor.u32 %v2922_v57, %v2920_v41  ;;  %v2928_v4 = vrot.slane %v2926_v23, 1 }
 0x123   : > { %v5615_v50 = vadd.f32 %v4313_v59, %v5544_v9  ;;  %v851_v43 = vpop.f32.mrf.mxu1  ;;  %v2916_v25 = vor.u32 %v2914_v29, %v2912_v12 }
 0x124   : > { %v1071_v31 = vpop.f32.mrf.mxu0  ;;  %v3208_v22 = vsel %vm917_vm3, %v3205_v61, %v3207_v20 }
 0x125   : > { %v5623_v63 = vadd.f32 %v1071_v31, %v5555_v7  ;;  %v4290_v7 = vpop.f32.mrf.mxu1  ;;  %4493 = vmatmul.mubr.msk.bf16.gmra.mxu1 %vm501_vm2, %v2905_v3  ;;  %v3210_v31 = vsel %vm917_vm3, %v3207_v20, %v3209_v32 }
 0x126   : > { %v4316_v9 = vpop.f32.mrf.mxu0  ;;  %4519 = vmatmul.mubr.msk.bf16.gmra.mxu0 %vm501_vm2, %v3204_v14  ;;  %v873_v10 = vadd.f32 %v4290_v7, %v5352_v5  ;;  %4496 = vmatprep.mubr.msk.bf16.mxu1 %vm501_vm2, %v2913_v19  ;;  %v3211_v19 = vrot.slane %v5564_v45, 1  ;;  %v2932_v7 = vor.u32 %v2930_v47, %v2928_v4 }
 0x127   : > { %v5630_v56 = vadd.f32 %v4316_v9, %v841_v35  ;;  %4522 = vmatprep.mubr.msk.bf16.mxu0 %vm501_vm2, %v3206_v18  ;;  %v5642_v35 = vld [vmem:[%s4876_s9 + $0xa0] ss:$0 sps:$4 sm:$0x11]   ;;  %v864_v8 = vpop.f32.mrf.mxu1  ;;  %s4561_s9 = smul.u32 (%p4842_p5), 12, %s4751_s21 }
 0x128   : > { %v1084_v44 = vpop.f32.mrf.mxu0  ;;  %v865_v14 = vadd.f32 %v864_v8, %v5359_v21  ;;  %v2934_v3 = vshll.u32 %v5642_v35, 16 }
 0x129   : > { %v5638_v2 = vadd.f32 %v1084_v44, %v5574_v0  ;;  %v4291_v33 = vpop.f32.mrf.mxu1  ;;  %v2921_v0 = vsel %vm368_vm1, %v2916_v25, %v2920_v41  ;;  %v852_v41 = vadd.f32 %v851_v43, %v5501_v17  ;;  %s3702_s10 = sadd.s32 (%p4842_p5), %s4561_s9, %s4055_s18 }
 0x12a   : > { %v4317_v59 = vpop.f32.mrf.mxu0  ;;  %v876_v29 = vadd.f32 %v4291_v33, %v5369_v24  ;;  %v2936_v44 = vrot.slane %v2934_v3, 1  ;;  %s4056_s11 = sshll.u32 (%p4842_p5), %s3702_s10, 3 }
 0x12b   : > { %v5646_v12 = vadd.f32 %v4317_v59, %v5583_v42  ;;  %v867_v21 = vpop.f32.mrf.mxu1  ;;  %v2929_v42 = vsel %vm368_vm1, %v2924_v26, %v2928_v4  ;;  %v3212_v59 = vsel %vm917_vm3, %v3209_v32, %v3211_v19  ;;  %v3217_v32 = vrot.slane %v5611_v38, 1  ;;  %s3704_s14 = scalar_lea.vmem (%p4842_p5), %s6090_s5, %s4056_s11 }
 0x12c   : > { %v1087_v5 = vpop.f32.mrf.mxu0 }
 0x12d   : > { %v5652_v18 = vadd.f32 %v1087_v5, %v836_v62  ;;  %v4294_v57 = vpop.f32.mrf.mxu1  ;;  %4497 = vmatmul.mubr.msk.bf16.gmra.mxu1 %vm501_vm2, %v2921_v0  ;;  %v3213_v62 = vrot.slane %v5571_v36, 1 }
 0x12e   : > { %v4320_v9 = vpop.f32.mrf.mxu0  ;;  %4523 = vmatmul.mubr.msk.bf16.gmra.mxu0 %vm501_vm2, %v3208_v22  ;;  %v889_v23 = vadd.f32 %v4294_v57, %v5382_v40  ;;  %4500 = vmatprep.mubr.msk.bf16.mxu1 %vm501_vm2, %v2929_v42  ;;  %v2937_v22 = vsel %vm368_vm1, %v2932_v7, %v2936_v44 }
 0x12f   : > { %v5658_v61 = vadd.f32 %v4320_v9, %v857_v48  ;;  %4526 = vmatprep.mubr.msk.bf16.mxu0 %vm501_vm2, %v3210_v31  ;;  %v880_v48 = vpop.f32.mrf.mxu1  ;;  %v3214_v40 = vsel %vm917_vm3, %v3211_v19, %v3213_v62 }
 0x130   : > { %v1100_v24 = vpop.f32.mrf.mxu0  ;;  %v881_v45 = vadd.f32 %v880_v48, %v5392_v46 }
 0x131   : > { %v5665_v20 = vadd.f32 %v1100_v24, %v849_v11  ;;  %v4295_v26 = vpop.f32.mrf.mxu1 }
 0x132   : > { %v4321_v25 = vpop.f32.mrf.mxu0  ;;  %v892_v11 = vadd.f32 %v4295_v26, %v5401_v54 }
 0x133   : > { %v5670_v8 = vadd.f32 %v4321_v25, %v860_v13  ;;  %v883_v33 = vpop.f32.mrf.mxu1  ;;  %v3215_v13 = vrot.slane %v5603_v39, 1 }
 0x134   : > { %v1103_v36 = vpop.f32.mrf.mxu0  ;;  %v884_v46 = vadd.f32 %v883_v33, %v5408_v60  ;;  %v868_v60 = vadd.f32 %v867_v21, %v5374_v34 }
 0x135   : > { %v5675_v4 = vadd.f32 %v1103_v36, %v852_v41  ;;  %v4298_v43 = vpop.f32.mrf.mxu1  ;;  %4501 = vmatmul.mubr.msk.bf16.gmra.mxu1 %vm501_vm2, %v2937_v22  ;;  %v3216_v39 = vsel %vm917_vm3, %v3213_v62, %v3215_v13  ;;  %v3218_v57 = vsel %vm917_vm3, %v3215_v13, %v3217_v32 }
 0x136   : > { %v4324_v5 = vpop.f32.mrf.mxu0  ;;  %4527 = vmatmul.mubr.msk.bf16.gmra.mxu0 %vm501_vm2, %v3212_v59  ;;  %v905_v0 = vadd.f32 %v4298_v43, %v5417_v6 }
 0x137   : > { %v5680_v17 = vadd.f32 %v4324_v5, %v873_v10  ;;  %4530 = vmatprep.mubr.msk.bf16.mxu0 %vm501_vm2, %v3214_v40  ;;  %v896_v47 = vpop.f32.mrf.mxu1 }
 0x138   : > { %v1116_v54 = vpop.f32.mrf.mxu0  ;;  %v897_v10 = vadd.f32 %v896_v47, %v5427_v1  ;;  %v3219_v1 = vrot.slane %v5642_v35, 1 }
 0x139   : > { %v5687_v31 = vadd.f32 %v1116_v54, %v865_v14  ;;  %v4299_v42 = vpop.f32.mrf.mxu1 }
 0x13a   : > { %v4325_v3 = vpop.f32.mrf.mxu0  ;;  %v908_v38 = vadd.f32 %v4299_v42, %v5436_v15 }
 0x13b   : > { %v5691_v9 = vadd.f32 %v4325_v3, %v876_v29  ;;  %v899_v6 = vpop.f32.mrf.mxu1 }
 0x13c   : > { %v1119_v19 = vpop.f32.mrf.mxu0  ;;  %v900_v34 = vadd.f32 %v899_v6, %v5444_v16  ;;  %v3220_v16 = vsel %vm917_vm3, %v3217_v32, %v3219_v1 }
 0x13d   : > { %v5696_v24 = vadd.f32 %v1119_v19, %v868_v60  ;;  %v4338_v29 = vpop.f32.mrf.mxu1 }
 0x13e   : > { %v4328_v14 = vpop.f32.mrf.mxu0  ;;  %4531 = vmatmul.mubr.msk.bf16.gmra.mxu0 %vm501_vm2, %v3216_v39  ;;  %v1523_v7 = vadd.f32 %v4338_v29, %v5517_v49 }
 0x13f   : > { %v5700_v21 = vadd.f32 %v4328_v14, %v889_v23  ;;  %4534 = vmatprep.mubr.msk.bf16.mxu0 %vm501_vm2, %v3218_v57  ;;  %v1394_v15 = vpop.f32.mrf.mxu1 }
 0x140   : > { %v1132_v62 = vpop.f32.mrf.mxu0  ;;  %v1521_v25 = vadd.f32 %v1394_v15, %v5529_v55 }
 0x141   : > { %v5705_v44 = vadd.f32 %v1132_v62, %v881_v45  ;;  %v4339_v23 = vpop.f32.mrf.mxu1 }
 0x142   : > { %v4329_v48 = vpop.f32.mrf.mxu0  ;;  %v1524_v26 = vadd.f32 %v4339_v23, %v5538_v27 }
 0x143   : > { %v5708_v41 = vadd.f32 %v4329_v48, %v892_v11  ;;  %v1397_v35 = vpop.f32.mrf.mxu1 }
 0x144   : > { %v1135_v59 = vpop.f32.mrf.mxu0  ;;  %v1522_v49 = vadd.f32 %v1397_v35, %v5546_v51 }
 0x145   : > { %v5712_v36 = vadd.f32 %v1135_v59, %v884_v46  ;;  %v4342_v22 = vpop.f32.mrf.mxu1 }
 0x146   : > { %v4332_v40 = vpop.f32.mrf.mxu0  ;;  %4535 = vmatmul.mubr.msk.bf16.gmra.mxu0 %vm501_vm2, %v3220_v16  ;;  %v1527_v11 = vadd.f32 %v4342_v22, %v5557_v30 }
 0x147   : > { %v5716_v45 = vadd.f32 %v4332_v40, %v905_v0  ;;  %v1410_v5 = vpop.f32.mrf.mxu1 }
 0x148   : > { %v1148_v55 = vpop.f32.mrf.mxu0  ;;  %v1525_v27 = vadd.f32 %v1410_v5, %v5567_v28 }
 0x149   : > { %v5719_v33 = vadd.f32 %v1148_v55, %v897_v10  ;;  %v4343_v43 = vpop.f32.mrf.mxu1 }
 0x14a   : > { %v4333_v13 = vpop.f32.mrf.mxu0  ;;  %v1528_v32 = vadd.f32 %v4343_v43, %v5577_v53 }
 0x14b   : > { %v5722_v46 = vadd.f32 %v4333_v13, %v908_v38  ;;  %v1413_v51 = vpop.f32.mrf.mxu1 }
 0x14c   : > { %v1151_v54 = vpop.f32.mrf.mxu0  ;;  %v1526_v3 = vadd.f32 %v1413_v51, %v5586_v52 }
 0x14d   : > { %v5725_v47 = vadd.f32 %v1151_v54, %v900_v34  ;;  %v4346_v30 = vpop.f32.mrf.mxu1 }
 0x14e   : > { %v4372_v0 = vpop.f32.mrf.mxu0  ;;  %v1531_v39 = vadd.f32 %v4346_v30, %v5596_v58 }
 0x14f   : > { %v5728_v60 = vadd.f32 %v4372_v0, %v1523_v7  ;;  %v1426_v28 = vpop.f32.mrf.mxu1 }
 0x150   : > { %v1888_v10 = vpop.f32.mrf.mxu0  ;;  %v1529_v57 = vadd.f32 %v1426_v28, %v5607_v37 }
 0x151   : > { %v5731_v42 = vadd.f32 %v1888_v10, %v1521_v25  ;;  %v4347_v53 = vpop.f32.mrf.mxu1 }
 0x152   : > { %v4373_v19 = vpop.f32.mrf.mxu0  ;;  %v1532_v14 = vadd.f32 %v4347_v53, %v5615_v50 }
 0x153   : > { %v5734_v38 = vadd.f32 %v4373_v19, %v1524_v26  ;;  %v1429_v52 = vpop.f32.mrf.mxu1 }
 0x154   : > { %v1891_v6 = vpop.f32.mrf.mxu0  ;;  %v1530_v29 = vadd.f32 %v1429_v52, %v5623_v63 }
 0x155   : > { %v5737_v34 = vadd.f32 %v1891_v6, %v1522_v49  ;;  %v4350_v58 = vpop.f32.mrf.mxu1 }
 0x156   : > { %v4376_v1 = vpop.f32.mrf.mxu0  ;;  %v1535_v15 = vadd.f32 %v4350_v58, %v5630_v56 }
 0x157   : > { %v5740_v62 = vadd.f32 %v4376_v1, %v1527_v11  ;;  %v1442_v37 = vpop.f32.mrf.mxu1 }
 0x158   : > { %v1904_v7 = vpop.f32.mrf.mxu0  ;;  %v1533_v16 = vadd.f32 %v1442_v37, %v5638_v2 }
 0x159   : > { %v5743_v48 = vadd.f32 %v1904_v7, %v1525_v27  ;;  %v4351_v50 = vpop.f32.mrf.mxu1 }
 0x15a   : > { %v4377_v25 = vpop.f32.mrf.mxu0  ;;  %v1536_v26 = vadd.f32 %v4351_v50, %v5646_v12 }
 0x15b   : > { %v5746_v23 = vadd.f32 %v4377_v25, %v1528_v32  ;;  %v1445_v63 = vpop.f32.mrf.mxu1 }
 0x15c   : > { %v1907_v59 = vpop.f32.mrf.mxu0  ;;  %v1534_v49 = vadd.f32 %v1445_v63, %v5652_v18 }
 0x15d   : > { %v5749_v35 = vadd.f32 %v1907_v59, %v1526_v3  ;;  %v4354_v56 = vpop.f32.mrf.mxu1 }
 0x15e   : > { %v4380_v40 = vpop.f32.mrf.mxu0  ;;  %v1539_v11 = vadd.f32 %v4354_v56, %v5658_v61 }
 0x15f   : > { %v5752_v22 = vadd.f32 %v4380_v40, %v1531_v39  ;;  %v1458_v2 = vpop.f32.mrf.mxu1 }
 0x160   : > { %v1920_v55 = vpop.f32.mrf.mxu0  ;;  %v1537_v27 = vadd.f32 %v1458_v2, %v5665_v20 }
 0x161   : > { %v5755_v5 = vadd.f32 %v1920_v55, %v1529_v57  ;;  %v4355_v12 = vpop.f32.mrf.mxu1 }
 0x162   : > { %v4381_v13 = vpop.f32.mrf.mxu0  ;;  %v1540_v32 = vadd.f32 %v4355_v12, %v5670_v8 }
 0x163   : > { %v5758_v43 = vadd.f32 %v4381_v13, %v1532_v14  ;;  %v1461_v18 = vpop.f32.mrf.mxu1 }
 0x164   : > { %v1923_v54 = vpop.f32.mrf.mxu0  ;;  %v1538_v3 = vadd.f32 %v1461_v18, %v5675_v4 }
 0x165   : > { %v5761_v51 = vadd.f32 %v1923_v54, %v1530_v29  ;;  %v4358_v61 = vpop.f32.mrf.mxu1 }
 0x166   : > { %v4384_v0 = vpop.f32.mrf.mxu0  ;;  %v1543_v39 = vadd.f32 %v4358_v61, %v5680_v17 }
 0x167   : > { %v5764_v30 = vadd.f32 %v4384_v0, %v1535_v15  ;;  %v1474_v20 = vpop.f32.mrf.mxu1 }
 0x168   : > { %v1936_v10 = vpop.f32.mrf.mxu0  ;;  %v1541_v57 = vadd.f32 %v1474_v20, %v5687_v31 }
 0x169   : > { %v5767_v28 = vadd.f32 %v1936_v10, %v1533_v16  ;;  %v4359_v8 = vpop.f32.mrf.mxu1 }
 0x16a   : > { %v4385_v19 = vpop.f32.mrf.mxu0  ;;  %v1544_v14 = vadd.f32 %v4359_v8, %v5691_v9 }
 0x16b   : > { %v5770_v53 = vadd.f32 %v4385_v19, %v1536_v26  ;;  %v1477_v4 = vpop.f32.mrf.mxu1 }
 0x16c   : > { %v1939_v6 = vpop.f32.mrf.mxu0  ;;  %v1542_v29 = vadd.f32 %v1477_v4, %v5696_v24 }
 0x16d   : > { %v5773_v52 = vadd.f32 %v1939_v6, %v1534_v49  ;;  %v4362_v17 = vpop.f32.mrf.mxu1 }
 0x16e   : > { %v4388_v1 = vpop.f32.mrf.mxu0  ;;  %v1547_v15 = vadd.f32 %v4362_v17, %v5700_v21 }
 0x16f   : > { %v5776_v58 = vadd.f32 %v4388_v1, %v1539_v11  ;;  %v1490_v31 = vpop.f32.mrf.mxu1 }
 0x170   : > { %v1952_v7 = vpop.f32.mrf.mxu0  ;;  %v1545_v16 = vadd.f32 %v1490_v31, %v5705_v44 }
 0x171   : > { %v5779_v37 = vadd.f32 %v1952_v7, %v1537_v27  ;;  %v4363_v9 = vpop.f32.mrf.mxu1 }
 0x172   : > { %v4389_v25 = vpop.f32.mrf.mxu0  ;;  %v1548_v26 = vadd.f32 %v4363_v9, %v5708_v41 }
 0x173   : > { %v5782_v50 = vadd.f32 %v4389_v25, %v1540_v32  ;;  %v1493_v24 = vpop.f32.mrf.mxu1 }
 0x174   : > { %v1955_v59 = vpop.f32.mrf.mxu0  ;;  %v1546_v49 = vadd.f32 %v1493_v24, %v5712_v36 }
 0x175   : > { %v5785_v63 = vadd.f32 %v1955_v59, %v1538_v3  ;;  %v4366_v21 = vpop.f32.mrf.mxu1 }
 0x176   : > { %v4392_v40 = vpop.f32.mrf.mxu0  ;;  %v1551_v11 = vadd.f32 %v4366_v21, %v5716_v45 }
 0x177   : > { %v5788_v56 = vadd.f32 %v4392_v40, %v1543_v39  ;;  %v1506_v44 = vpop.f32.mrf.mxu1 }
 0x178   : > { %v1968_v55 = vpop.f32.mrf.mxu0  ;;  %v1549_v27 = vadd.f32 %v1506_v44, %v5719_v33 }
 0x179   : > { %v5791_v2 = vadd.f32 %v1968_v55, %v1541_v57  ;;  %v4367_v41 = vpop.f32.mrf.mxu1 }
 0x17a   : > { %v4393_v13 = vpop.f32.mrf.mxu0  ;;  %v1552_v32 = vadd.f32 %v4367_v41, %v5722_v46 }
 0x17b   : > { %v5794_v12 = vadd.f32 %v4393_v13, %v1544_v14  ;;  %v1509_v36 = vpop.f32.mrf.mxu1 }
 0x17c   : > { %v1971_v54 = vpop.f32.mrf.mxu0  ;;  %v1550_v3 = vadd.f32 %v1509_v36, %v5725_v47 }
 0x17d   : > { %v5797_v18 = vadd.f32 %v1971_v54, %v1542_v29  ;;  %v4406_v45 = vpop.f32.mrf.mxu1 }
 0x17e   : > { %v4396_v0 = vpop.f32.mrf.mxu0  ;;  %v2300_v39 = vadd.f32 %v4406_v45, %v5728_v60 }
 0x17f   : > { %v5800_v61 = vadd.f32 %v4396_v0, %v1547_v15  ;;  %v2171_v33 = vpop.f32.mrf.mxu1 }
 0x180   : > { %v1984_v10 = vpop.f32.mrf.mxu0  ;;  %v2298_v57 = vadd.f32 %v2171_v33, %v5731_v42 }
 0x181   : > { %v5803_v20 = vadd.f32 %v1984_v10, %v1545_v16  ;;  %v4407_v46 = vpop.f32.mrf.mxu1 }
 0x182   : > { %v4397_v19 = vpop.f32.mrf.mxu0  ;;  %v2301_v14 = vadd.f32 %v4407_v46, %v5734_v38 }
 0x183   : > { %v5806_v8 = vadd.f32 %v4397_v19, %v1548_v26  ;;  %v2174_v47 = vpop.f32.mrf.mxu1 }
 0x184   : > { %v1987_v6 = vpop.f32.mrf.mxu0  ;;  %v2299_v29 = vadd.f32 %v2174_v47, %v5737_v34 }
 0x185   : > { %v5809_v4 = vadd.f32 %v1987_v6, %v1546_v49  ;;  %v4410_v60 = vpop.f32.mrf.mxu1 }
 0x186   : > { %v4400_v1 = vpop.f32.mrf.mxu0  ;;  %v2304_v15 = vadd.f32 %v4410_v60, %v5740_v62 }
 0x187   : > { %v5812_v17 = vadd.f32 %v4400_v1, %v1551_v11  ;;  %v2187_v42 = vpop.f32.mrf.mxu1 }
 0x188   : > { %v2000_v7 = vpop.f32.mrf.mxu0  ;;  %v2302_v16 = vadd.f32 %v2187_v42, %v5743_v48 }
 0x189   : > { %v5815_v31 = vadd.f32 %v2000_v7, %v1549_v27  ;;  %v4411_v38 = vpop.f32.mrf.mxu1 }
 0x18a   : > { %v4401_v25 = vpop.f32.mrf.mxu0  ;;  %v2305_v26 = vadd.f32 %v4411_v38, %v5746_v23 }
 0x18b   : > { %v5818_v9 = vadd.f32 %v4401_v25, %v1552_v32  ;;  %v2190_v34 = vpop.f32.mrf.mxu1 }
 0x18c   : > { %v2003_v59 = vpop.f32.mrf.mxu0  ;;  %v2303_v49 = vadd.f32 %v2190_v34, %v5749_v35 }
 0x18d   : > { %v5821_v24 = vadd.f32 %v2003_v59, %v1550_v3  ;;  %v4414_v62 = vpop.f32.mrf.mxu1 }
 0x18e   : > { %v4440_v40 = vpop.f32.mrf.mxu0  ;;  %v2308_v11 = vadd.f32 %v4414_v62, %v5752_v22 }
 0x18f   : > { %v5824_v21 = vadd.f32 %v4440_v40, %v2300_v39  ;;  %v2203_v48 = vpop.f32.mrf.mxu1 }
 0x190   : > { %v2529_v55 = vpop.f32.mrf.mxu0  ;;  %v2306_v27 = vadd.f32 %v2203_v48, %v5755_v5 }
 0x191   : > { %v5827_v44 = vadd.f32 %v2529_v55, %v2298_v57  ;;  %v4415_v23 = vpop.f32.mrf.mxu1 }
 0x192   : > { %v4441_v13 = vpop.f32.mrf.mxu0  ;;  %v2309_v32 = vadd.f32 %v4415_v23, %v5758_v43 }
 0x193   : > { %v5830_v41 = vadd.f32 %v4441_v13, %v2301_v14  ;;  %v2206_v35 = vpop.f32.mrf.mxu1 }
 0x194   : > { %v2532_v54 = vpop.f32.mrf.mxu0  ;;  %v2307_v3 = vadd.f32 %v2206_v35, %v5761_v51 }
 0x195   : > { %v5833_v36 = vadd.f32 %v2532_v54, %v2299_v29  ;;  %v4418_v22 = vpop.f32.mrf.mxu1 }
 0x196   : > { %v4444_v0 = vpop.f32.mrf.mxu0  ;;  %v2312_v39 = vadd.f32 %v4418_v22, %v5764_v30 }
 0x197   : > { %v5836_v45 = vadd.f32 %v4444_v0, %v2304_v15  ;;  %v2219_v5 = vpop.f32.mrf.mxu1 }
 0x198   : > { %v2545_v10 = vpop.f32.mrf.mxu0  ;;  %v2310_v57 = vadd.f32 %v2219_v5, %v5767_v28 }
 0x199   : > { %v5839_v33 = vadd.f32 %v2545_v10, %v2302_v16  ;;  %v4419_v43 = vpop.f32.mrf.mxu1 }
 0x19a   : > { %v4445_v19 = vpop.f32.mrf.mxu0  ;;  %v2313_v14 = vadd.f32 %v4419_v43, %v5770_v53 }
 0x19b   : > { %v5842_v46 = vadd.f32 %v4445_v19, %v2305_v26  ;;  %v2222_v51 = vpop.f32.mrf.mxu1 }
 0x19c   : > { %v2548_v6 = vpop.f32.mrf.mxu0  ;;  %v2311_v29 = vadd.f32 %v2222_v51, %v5773_v52 }
 0x19d   : > { %v5845_v47 = vadd.f32 %v2548_v6, %v2303_v49  ;;  %v4422_v30 = vpop.f32.mrf.mxu1 }
 0x19e   : > { %v4448_v1 = vpop.f32.mrf.mxu0  ;;  %v2316_v15 = vadd.f32 %v4422_v30, %v5776_v58 }
 0x19f   : > { %v5848_v60 = vadd.f32 %v4448_v1, %v2308_v11  ;;  %v2235_v28 = vpop.f32.mrf.mxu1 }
 0x1a0   : > { %v2561_v7 = vpop.f32.mrf.mxu0  ;;  %v2314_v16 = vadd.f32 %v2235_v28, %v5779_v37 }
 0x1a1   : > { %v5851_v42 = vadd.f32 %v2561_v7, %v2306_v27  ;;  %v4423_v53 = vpop.f32.mrf.mxu1 }
 0x1a2   : > { %v4449_v25 = vpop.f32.mrf.mxu0  ;;  %v2317_v26 = vadd.f32 %v4423_v53, %v5782_v50 }
 0x1a3   : > { %v5854_v38 = vadd.f32 %v4449_v25, %v2309_v32  ;;  %v2238_v52 = vpop.f32.mrf.mxu1 }
 0x1a4   : > { %v2564_v59 = vpop.f32.mrf.mxu0  ;;  %v2315_v49 = vadd.f32 %v2238_v52, %v5785_v63 }
 0x1a5   : > { %v5857_v34 = vadd.f32 %v2564_v59, %v2307_v3  ;;  %v4426_v58 = vpop.f32.mrf.mxu1 }
 0x1a6   : > { %v4452_v40 = vpop.f32.mrf.mxu0  ;;  %v2320_v11 = vadd.f32 %v4426_v58, %v5788_v56 }
 0x1a7   : > { %v5860_v62 = vadd.f32 %v4452_v40, %v2312_v39  ;;  %v2251_v37 = vpop.f32.mrf.mxu1 }
 0x1a8   : > { %v2577_v55 = vpop.f32.mrf.mxu0  ;;  %v2318_v27 = vadd.f32 %v2251_v37, %v5791_v2 }
 0x1a9   : > { %v5863_v48 = vadd.f32 %v2577_v55, %v2310_v57  ;;  %v4427_v50 = vpop.f32.mrf.mxu1 }
 0x1aa   : > { %v4453_v13 = vpop.f32.mrf.mxu0  ;;  %v2321_v32 = vadd.f32 %v4427_v50, %v5794_v12 }
 0x1ab   : > { %v5866_v23 = vadd.f32 %v4453_v13, %v2313_v14  ;;  %v2254_v63 = vpop.f32.mrf.mxu1 }
 0x1ac   : > { %v2580_v54 = vpop.f32.mrf.mxu0  ;;  %v2319_v3 = vadd.f32 %v2254_v63, %v5797_v18 }
 0x1ad   : > { %v5869_v35 = vadd.f32 %v2580_v54, %v2311_v29  ;;  %v4430_v56 = vpop.f32.mrf.mxu1 }
 0x1ae   : > { %v4456_v0 = vpop.f32.mrf.mxu0  ;;  %v2324_v39 = vadd.f32 %v4430_v56, %v5800_v61 }
 0x1af   : > { %v5872_v22 = vadd.f32 %v4456_v0, %v2316_v15  ;;  %v2267_v2 = vpop.f32.mrf.mxu1 }
 0x1b0   : > { %v2593_v10 = vpop.f32.mrf.mxu0  ;;  %v2322_v57 = vadd.f32 %v2267_v2, %v5803_v20 }
 0x1b1   : > { %v5875_v5 = vadd.f32 %v2593_v10, %v2314_v16  ;;  %v4431_v12 = vpop.f32.mrf.mxu1 }
 0x1b2   : > { %v4457_v19 = vpop.f32.mrf.mxu0  ;;  %v2325_v14 = vadd.f32 %v4431_v12, %v5806_v8 }
 0x1b3   : > { %v5878_v43 = vadd.f32 %v4457_v19, %v2317_v26  ;;  %v2270_v18 = vpop.f32.mrf.mxu1 }
 0x1b4   : > { %v2596_v6 = vpop.f32.mrf.mxu0  ;;  %v2323_v29 = vadd.f32 %v2270_v18, %v5809_v4 }
 0x1b5   : > { %v5881_v51 = vadd.f32 %v2596_v6, %v2315_v49  ;;  %v4434_v61 = vpop.f32.mrf.mxu1 }
 0x1b6   : > { %v4460_v1 = vpop.f32.mrf.mxu0  ;;  %v2328_v15 = vadd.f32 %v4434_v61, %v5812_v17 }
 0x1b7   : > { %v5884_v30 = vadd.f32 %v4460_v1, %v2320_v11  ;;  %v2283_v20 = vpop.f32.mrf.mxu1 }
 0x1b8   : > { %v2609_v7 = vpop.f32.mrf.mxu0  ;;  %v2326_v16 = vadd.f32 %v2283_v20, %v5815_v31 }
 0x1b9   : > { %v5887_v28 = vadd.f32 %v2609_v7, %v2318_v27  ;;  %v5892_v8 = vpop.f32.mrf.mxu1 }
 0x1ba   : > { %v4461_v25 = vpop.f32.mrf.mxu0 }
 0x1bb   : > { %v5890_v53 = vadd.f32 %v4461_v25, %v2321_v32  ;;  %v5896_v4 = vpop.f32.mrf.mxu1 }
 0x1bc   : > { %v2612_v59 = vpop.f32.mrf.mxu0 }
 0x1bd   : > { %v5894_v26 = vadd.f32 %v2612_v59, %v2319_v3  ;;  %v4474_v49 = vpop.f32.mrf.mxu1 }
 0x1be   : > { %v4464_v52 = vpop.f32.mrf.mxu0  ;;  %v3152_v58 = vadd.f32 %v4474_v49, %v5824_v21 }
 0x1bf   : > { %v5898_v40 = vadd.f32 %v4464_v52, %v2324_v39  ;;  %v3023_v11 = vpop.f32.mrf.mxu1 }
 0x1c0   : > { %v2625_v17 = vpop.f32.mrf.mxu0  ;;  %v3150_v37 = vadd.f32 %v3023_v11, %v5827_v44 }
 0x1c1   : > { %v5901_v55 = vadd.f32 %v2625_v17, %v2322_v57  ;;  %v4475_v27 = vpop.f32.mrf.mxu1 }
 0x1c2   : > { %v4465_v31 = vpop.f32.mrf.mxu0  ;;  %v3153_v54 = vadd.f32 %v4475_v27, %v5830_v41 }
 0x1c3   : > { %v5904_v13 = vadd.f32 %v4465_v31, %v2325_v14  ;;  %v3026_v63 = vpop.f32.mrf.mxu1 }
 0x1c4   : > { %v2628_v50 = vpop.f32.mrf.mxu0  ;;  %v3151_v3 = vadd.f32 %v3026_v63, %v5833_v36  ;;  %v5923_v36 = vld [vmem:[%s6088_s3] sm:$0xff]  }
 0x1c5   : > { %v5907_v32 = vadd.f32 %v2628_v50, %v2323_v29  ;;  %v4478_v21 = vpop.f32.mrf.mxu1  ;;  %4228 = vmatprep.mubr.msk.bf16.mxu1 %vm3581_vm4, %v5923_v36  ;;  %v5932_v29 = vld [vmem:[%s6087_s2] ss:$0 sm:$0xff] }
 0x1c6   : > { %v4468_v0 = vpop.f32.mrf.mxu0  ;;  %v3156_v39 = vadd.f32 %v4478_v21, %v5836_v45 }
 0x1c7   : > { %v5910_v56 = vadd.f32 %v4468_v0, %v2328_v15  ;;  %v3039_v44 = vpop.f32.mrf.mxu1 }
 0x1c8   : > { %v2641_v10 = vpop.f32.mrf.mxu0  ;;  %v3154_v57 = vadd.f32 %v3039_v44, %v5839_v33 }
 0x1c9   : > { %v5913_v2 = vadd.f32 %v2641_v10, %v2326_v16  ;;  %v4479_v41 = vpop.f32.mrf.mxu1 }
 0x1ca   : > { %v5915_v19 = vpop.f32.mrf.mxu0  ;;  %v3157_v6 = vadd.f32 %v4479_v41, %v5842_v46 }
 0x1cb   : > { %v3042_v14 = vpop.f32.mrf.mxu1 }
 0x1cc   : > { %v5918_v12 = vpop.f32.mrf.mxu0  ;;  %v3155_v18 = vadd.f32 %v3042_v14, %v5845_v47 }
 0x1cd   : > { %v4482_v33 = vpop.f32.mrf.mxu1 }
 0x1ce   : > { %v4508_v45 = vpop.f32.mrf.mxu0 }
 0x1cf   : > { %v3435_v1 = vadd.f32 %v4508_v45, %v3152_v58  ;;  %v3055_v15 = vpop.f32.mrf.mxu1 }
 0x1d0   : > { %v3306_v61 = vpop.f32.mrf.mxu0  ;;  %v3158_v25 = vadd.f32 %v3055_v15, %v5851_v42 }
 0x1d1   : > { %v3433_v7 = vadd.f32 %v3306_v61, %v3150_v37  ;;  %v3474_v46 = vadd.f32 %v5932_v29, %v3435_v1  ;;  %v4483_v59 = vpop.f32.mrf.mxu1  ;;  %v3555_v1 = vld [vmem:[%s6089_s4] sm:$0xff]  ;;  %v3160_v61 = vadd.f32 %v4482_v33, %v5848_v60  ;;  %v3556_v60 = vld [vmem:[%s6089_s4 + $0x8] sm:$0xff] }
 0x1d2   : > { %v4509_v20 = vpop.f32.mrf.mxu0  ;;  %v3161_v33 = vadd.f32 %v4483_v59, %v5854_v38 }
 0x1d3   : > { %v3436_v16 = vadd.f32 %v4509_v20, %v3153_v54  ;;  %v3472_v47 = vadd.f32 %v5932_v29, %v3433_v7  ;;  %v3058_v58 = vpop.f32.mrf.mxu1  ;;  %v3506_v31 = vmax.f32 %v3474_v46, 0.0 }
 0x1d4   : > { %v3309_v52 = vpop.f32.mrf.mxu0 }
 0x1d5   : > { %v3475_v49 = vadd.f32 %v5932_v29, %v3436_v16  ;;  %v3434_v17 = vadd.f32 %v3309_v52, %v3151_v3  ;;  %v4486_v63 = vpop.f32.mrf.mxu1  ;;  %v3504_v21 = vmax.f32 %v3472_v47, 0.0  ;;  %v4765_v16 = vmov 0  }
 0x1d6   : > { %v4512_v11 = vpop.f32.mrf.mxu0  ;;  %4619 = vset.pattern.permute.xlu0 %v4765_v16  ;;  %4620 = vset.pattern.permute.xlu1 %v4765_v16 }
 0x1d7   : > { %v3507_v27 = vmax.f32 %v3475_v49, 0.0  ;;  %v3473_v37 = vadd.f32 %v5932_v29, %v3434_v17  ;;  %v3439_v50 = vadd.f32 %v4512_v11, %v3156_v39  ;;  %v3071_v54 = vpop.f32.mrf.mxu1  ;;  %v3557_v39 = vld [vmem:[%s6089_s4 + $0x10] sm:$0x3]  ;;  %3560 = vperm.xlu0 %4619, %v3555_v1   ;;  %v3164_v1 = vadd.f32 %v4486_v63, %v5860_v62 }
 0x1d8   : > { %v3322_v0 = vpop.f32.mrf.mxu0  ;;  %3570 = vperm.xlu1 %4620, %v3557_v39   ;;  %v3162_v62 = vadd.f32 %v3071_v54, %v5863_v48 }
 0x1d9   : > { %v5939_v10 = vpack.c.bf16 %v3507_v27, %v3506_v31  ;;  %v3505_v42 = vmax.f32 %v3473_v37, 0.0  ;;  %v3437_v44 = vadd.f32 %v3322_v0, %v3154_v57  ;;  %v3478_v3 = vadd.f32 %v5932_v29, %v3439_v50  ;;  %v4487_v7 = vpop.f32.mrf.mxu1 }
 0x1da   : > { %v4513_v41 = vpop.f32.mrf.mxu0 }
 0x1db   : > { %v5941_v14 = vpack.c.bf16 %v3505_v42, %v3504_v21  ;;  %v3440_v45 = vadd.f32 %v4513_v41, %v3157_v6  ;;  %v3476_v57 = vadd.f32 %v5932_v29, %v3437_v44  ;;  %v3074_v6 = vpop.f32.mrf.mxu1  ;;  %v3510_v47 = vmax.f32 %v3478_v3, 0.0  ;;  %3565 = vperm.xlu0 %4619, %v3556_v60  }
 0x1dc   : > { %v3325_v15 = vpop.f32.mrf.mxu0  ;;  %v3159_v3 = vadd.f32 %v3058_v58, %v5857_v34 }
 0x1dd   : > { %v3479_v20 = vadd.f32 %v5932_v29, %v3440_v45  ;;  %v3438_v46 = vadd.f32 %v3325_v15, %v3155_v18  ;;  %v4490_v31 = vpop.f32.mrf.mxu1  ;;  %v3508_v27 = vmax.f32 %v3476_v57, 0.0 }
 0x1de   : > { %v4516_v52 = vpop.f32.mrf.mxu0  ;;  %v3168_v0 = vadd.f32 %v4490_v31, %v5872_v22 }
 0x1df   : > { %v3511_v49 = vmax.f32 %v3479_v20, 0.0  ;;  %v3477_v17 = vadd.f32 %v5932_v29, %v3438_v46  ;;  %v3443_v11 = vadd.f32 %v4516_v52, %v3160_v61  ;;  %v3087_v42 = vpop.f32.mrf.mxu1 }
 0x1e0   : > { %v3338_v18 = vpop.f32.mrf.mxu0  ;;  %v3166_v38 = vadd.f32 %v3087_v42, %v5875_v5 }
 0x1e1   : > { %v5958_v37 = vpack.c.bf16 %v3511_v49, %v3510_v47  ;;  %v3509_v50 = vmax.f32 %v3477_v17, 0.0  ;;  %v3482_v21 = vadd.f32 %v5932_v29, %v3443_v11  ;;  %v3441_v44 = vadd.f32 %v3338_v18, %v3158_v25  ;;  %v4491_v39 = vpop.f32.mrf.mxu1 }
 0x1e2   : > { %v4517_v41 = vpop.f32.mrf.mxu0  ;;  %v3169_v22 = vadd.f32 %v4491_v39, %v5878_v43  ;;  %v3165_v49 = vadd.f32 %v4487_v7, %v5866_v23  ;;  %v3163_v18 = vadd.f32 %v3074_v6, %v5869_v35 }
 0x1e3   : > { %v5963_v45 = vpack.c.bf16 %v3509_v50, %v3508_v27  ;;  %v3444_v59 = vadd.f32 %v4517_v41, %v3161_v33  ;;  %v3480_v15 = vadd.f32 %v5932_v29, %v3441_v44  ;;  %v3514_v20 = vmax.f32 %v3482_v21, 0.0  ;;  %v3090_v46 = vpop.f32.mrf.mxu1 }
 0x1e4   : > { %v3341_v61 = vpop.f32.mrf.mxu0  ;;  %v3167_v58 = vadd.f32 %v3090_v46, %v5881_v51 }
 0x1e5   : > { %v3483_v57 = vadd.f32 %v5932_v29, %v3444_v59  ;;  %v3442_v25 = vadd.f32 %v3341_v61, %v3159_v3  ;;  %v4494_v63 = vpop.f32.mrf.mxu1  ;;  %v3512_v17 = vmax.f32 %v3480_v15, 0.0 }
 0x1e6   : > { %v4520_v16 = vpop.f32.mrf.mxu0 }
 0x1e7   : > { %v3515_v34 = vmax.f32 %v3483_v57, 0.0  ;;  %v3481_v5 = vadd.f32 %v5932_v29, %v3442_v25  ;;  %v3447_v52 = vadd.f32 %v4520_v16, %v3164_v1  ;;  %v3103_v60 = vpop.f32.mrf.mxu1 }
 0x1e8   : > { %v3354_v47 = vpop.f32.mrf.mxu0 }
 0x1e9   : > { %v5974_v43 = vpack.c.bf16 %v3515_v34, %v3514_v20  ;;  %v3513_v11 = vmax.f32 %v3481_v5, 0.0  ;;  %v3445_v33 = vadd.f32 %v3354_v47, %v3162_v62  ;;  %v3486_v51 = vadd.f32 %v5932_v29, %v3447_v52  ;;  %v4495_v21 = vpop.f32.mrf.mxu1 }
 0x1ea   : > { %v4521_v31 = vpop.f32.mrf.mxu0  ;;  %v3172_v62 = vadd.f32 %v4494_v63, %v5884_v30 }
 0x1eb   : > { %v5977_v27 = vpack.c.bf16 %v3513_v11, %v3512_v17  ;;  %v3448_v50 = vadd.f32 %v4521_v31, %v3165_v49  ;;  %v3484_v54 = vadd.f32 %v5932_v29, %v3445_v33  ;;  %v3106_v42 = vpop.f32.mrf.mxu1  ;;  %v3518_v41 = vmax.f32 %v3486_v51, 0.0 }
 0x1ec   : > { %v3357_v48 = vpop.f32.mrf.mxu0 }
 0x1ed   : > { %v3487_v23 = vadd.f32 %v5932_v29, %v3448_v50  ;;  %v3446_v7 = vadd.f32 %v3357_v48, %v3163_v18  ;;  %v4498_v35 = vpop.f32.mrf.mxu1  ;;  %v3516_v39 = vmax.f32 %v3484_v54, 0.0  ;;  %v3170_v18 = vadd.f32 %v3103_v60, %v5887_v28 }
 0x1ee   : > { %v4524_v44 = vpop.f32.mrf.mxu0  ;;  %v3176_v28 = vadd.f32 %v4498_v35, %v5898_v40 }
 0x1ef   : > { %v3519_v3 = vmax.f32 %v3487_v23, 0.0  ;;  %v3485_v59 = vadd.f32 %v5932_v29, %v3446_v7  ;;  %v3451_v1 = vadd.f32 %v4524_v44, %v3168_v0  ;;  %v3119_v57 = vpop.f32.mrf.mxu1 }
 0x1f0   : > { %v3370_v6 = vpop.f32.mrf.mxu0 }
 0x1f1   : > { %v5983_v61 = vpack.c.bf16 %v3519_v3, %v3518_v41  ;;  %v3517_v15 = vmax.f32 %v3485_v59, 0.0  ;;  %v3449_v25 = vadd.f32 %v3370_v6, %v3166_v38  ;;  %v3490_v16 = vadd.f32 %v5932_v29, %v3451_v1  ;;  %v4499_v5 = vpop.f32.mrf.mxu1 }
 0x1f2   : > { %v4525_v20 = vpop.f32.mrf.mxu0  ;;  %v3174_v1 = vadd.f32 %v3119_v57, %v5901_v55 }
 0x1f3   : > { %v5985_v46 = vpack.c.bf16 %v3517_v15, %v3516_v39  ;;  %v3452_v34 = vadd.f32 %v4525_v20, %v3169_v22  ;;  %v3488_v0 = vadd.f32 %v5932_v29, %v3449_v25  ;;  %v3522_v11 = vmax.f32 %v3490_v16, 0.0  ;;  %v3122_v51 = vpop.f32.mrf.mxu1 }
 0x1f4   : > { %v3373_v52 = vpop.f32.mrf.mxu0  ;;  %v3173_v22 = vadd.f32 %v4495_v21, %v5890_v53  ;;  %v3177_v25 = vadd.f32 %v4499_v5, %v5904_v13 }
 0x1f5   : > { %v3491_v47 = vadd.f32 %v5932_v29, %v3452_v34  ;;  %v3450_v49 = vadd.f32 %v3373_v52, %v3167_v58  ;;  %v3520_v48 = vmax.f32 %v3488_v0, 0.0  ;;  %v3171_v58 = vadd.f32 %v3106_v42, %v5894_v26  ;;  %v4502_v3 = vpop.f32.mrf.mxu1 }
 0x1f6   : > { %v4528_v17 = vpop.f32.mrf.mxu0  ;;  %v3175_v0 = vadd.f32 %v3122_v51, %v5907_v32  ;;  %v3180_v13 = vadd.f32 %v4502_v3, %v5910_v56 }
 0x1f7   : > { %v3523_v33 = vmax.f32 %v3491_v47, 0.0  ;;  %v3489_v38 = vadd.f32 %v5932_v29, %v3450_v49  ;;  %v3455_v31 = vadd.f32 %v4528_v17, %v3172_v62  ;;  %v3135_v20 = vpop.f32.mrf.mxu1  ;;  %v2329_v49 = vadd.f32 %v5892_v8, %v5818_v9 }
 0x1f8   : > { %v3386_v50 = vpop.f32.mrf.mxu0 }
 0x1f9   : > { %v5994_v54 = vpack.c.bf16 %v3523_v33, %v3522_v11  ;;  %v3521_v30 = vmax.f32 %v3489_v38, 0.0  ;;  %v3453_v63 = vadd.f32 %v3386_v50, %v3170_v18  ;;  %v3494_v44 = vadd.f32 %v5932_v29, %v3455_v31  ;;  %v4503_v17 = vpop.f32.mrf.mxu1 }
 0x1fa   : > { %v4529_v23 = vpop.f32.mrf.mxu0  ;;  %v2327_v31 = vadd.f32 %v5896_v4, %v5821_v24  ;;  %v2687_v32 = vadd.f32 %v5915_v19, %v2329_v49  ;;  %v3178_v18 = vadd.f32 %v3135_v20, %v5913_v2  ;;  %v3601_v20 = vsel %vm3581_vm4, %v5977_v27, 0  ;;  %v4708_v27 = vld [vmem:[%s6088_s3 + $0x8] ss:$0 sps:$4 sm:$0x11]  }
 0x1fb   : > { %v5997_v7 = vpack.c.bf16 %v3521_v30, %v3520_v48  ;;  %v3456_v41 = vadd.f32 %v4529_v23, %v3173_v22  ;;  %v3492_v60 = vadd.f32 %v5932_v29, %v3453_v63  ;;  %v3526_v39 = vmax.f32 %v3494_v44, 0.0  ;;  %v3138_v30 = vpop.f32.mrf.mxu1 }
 0x1fc   : > { %v3389_v59 = vpop.f32.mrf.mxu0  ;;  %v2685_v56 = vadd.f32 %v5918_v12, %v2327_v31  ;;  %v3181_v48 = vadd.f32 %v4503_v17, %v2687_v32 }
 0x1fd   : > { %v3495_v53 = vadd.f32 %v5932_v29, %v3456_v41  ;;  %v3454_v21 = vadd.f32 %v3389_v59, %v3171_v58  ;;  %v3524_v34 = vmax.f32 %v3492_v60, 0.0 }
 0x1fe   : > { %v4532_v6 = vpop.f32.mrf.mxu0  ;;  %v3179_v4 = vadd.f32 %v3138_v30, %v2685_v56 }
 0x1ff   : > { %v3527_v15 = vmax.f32 %v3495_v53, 0.0  ;;  %v3493_v26 = vadd.f32 %v5932_v29, %v3454_v21  ;;  %v3459_v42 = vadd.f32 %v4532_v6, %v3176_v28 }
 0x200   : > { %v3402_v16 = vpop.f32.mrf.mxu0 }
 0x201   : > { %v3547_v52 = vpack.c.bf16 %v3527_v15, %v3526_v39  ;;  %v3525_v40 = vmax.f32 %v3493_v26, 0.0  ;;  %v3457_v35 = vadd.f32 %v3402_v16, %v3174_v1  ;;  %v3498_v55 = vadd.f32 %v5932_v29, %v3459_v42 }
 0x202   : > { %v4533_v62 = vpop.f32.mrf.mxu0  ;;  %v3610_v42 = vsel %vm3581_vm4, %v5983_v61, 0  ;;  %v3598_v61 = vsel %vm3581_vm4, %v5958_v37, 0  ;;  %v3589_v37 = vsel %vm3581_vm4, %v5941_v14, 0 }
 0x203   : > { %v3546_v47 = vpack.c.bf16 %v3525_v40, %v3524_v34  ;;  %v3460_v57 = vadd.f32 %v4533_v62, %v3177_v25  ;;  %v3496_v5 = vadd.f32 %v5932_v29, %v3457_v35  ;;  %v3530_v50 = vmax.f32 %v3498_v55, 0.0 }
 0x204   : > { %v3405_v11 = vpop.f32.mrf.mxu0  ;;  %v3607_v25 = vsel %vm3581_vm4, %v5985_v46, 0  ;;  %v3595_v46 = vsel %vm3581_vm4, %v5963_v45, 0 }
 0x205   : > { %v3499_v33 = vadd.f32 %v5932_v29, %v3460_v57  ;;  %v3458_v38 = vadd.f32 %v3405_v11, %v3175_v0  ;;  %v3528_v23 = vmax.f32 %v3496_v5, 0.0 }
 0x206   : > { %v4536_v51 = vpop.f32.mrf.mxu0 }
 0x207   : > { %v3531_v22 = vmax.f32 %v3499_v33, 0.0  ;;  %v3497_v9 = vadd.f32 %v5932_v29, %v3458_v38  ;;  %v3463_v8 = vadd.f32 %v4536_v51, %v3180_v13 }
 0x208   : > { %v3418_v63 = vpop.f32.mrf.mxu0 }
 0x209   : > { %v3549_v58 = vpack.c.bf16 %v3531_v22, %v3530_v50  ;;  %v3529_v44 = vmax.f32 %v3497_v9, 0.0  ;;  %v3461_v41 = vadd.f32 %v3418_v63, %v3178_v18  ;;  %v3502_v2 = vadd.f32 %v5932_v29, %v3463_v8 }
 0x20a   : > { %v4537_v24 = vpop.f32.mrf.mxu0 }
 0x20b   : > { %v3548_v19 = vpack.c.bf16 %v3529_v44, %v3528_v23  ;;  %v3464_v3 = vadd.f32 %v4537_v24, %v3181_v48  ;;  %v3500_v28 = vadd.f32 %v5932_v29, %v3461_v41  ;;  %v3534_v12 = vmax.f32 %v3502_v2, 0.0 }
 0x20c   : > { %v3421_v59 = vpop.f32.mrf.mxu0 }
 0x20d   : > { %v3503_v60 = vadd.f32 %v5932_v29, %v3464_v3  ;;  %v3462_v53 = vadd.f32 %v3421_v59, %v3179_v4  ;;  %v3532_v6 = vmax.f32 %v3500_v28, 0.0 }
 0x20f   : > { %v3535_v21 = vmax.f32 %v3503_v60, 0.0  ;;  %v3501_v1 = vadd.f32 %v5932_v29, %v3462_v53  ;;  %v3604_v29 = vsel %vm3581_vm4, %v5974_v43, 0  ;;  %v3592_v43 = vsel %vm3581_vm4, %v5939_v10, 0 }
 0x211   : > { %v3551_v39 = vpack.c.bf16 %v3535_v21, %v3534_v12  ;;  %v3533_v15 = vmax.f32 %v3501_v1, 0.0 }
 0x213   : > { %v3550_v26 = vpack.c.bf16 %v3533_v15, %v3532_v6  ;;  %4550 = vmatprep.subr.msk.bf16.mxu1 %vm3581_vm4, %v3551_v39 }
 0x214   : > { %4213 = vmatpush3.bf16.xpose.msra.mxu1 %v3610_v42 }
 0x215   : > { %4551 = vmatprep.subr.msk.bf16.mxu1 %vm3581_vm4, %v3550_v26 }
 0x21c   : > { %4215 = vmatpush3.bf16.xpose.msra.mxu1 %v3607_v25 }
 0x21d   : > { %4552 = vmatprep.subr.msk.bf16.mxu1 %vm3581_vm4, %v3549_v58 }
 0x224   : > { %4217 = vmatpush3.bf16.xpose.msra.mxu1 %v3604_v29 }
 0x225   : > { %4553 = vmatprep.subr.msk.bf16.mxu1 %vm3581_vm4, %v3548_v19 }
 0x22c   : > { %4219 = vmatpush3.bf16.xpose.msra.mxu1 %v3601_v20 }
 0x22d   : > { %4554 = vmatprep.subr.msk.bf16.mxu1 %vm3581_vm4, %v3547_v52 }
 0x234   : > { %4221 = vmatpush3.bf16.xpose.msra.mxu1 %v3598_v61 }
 0x235   : > { %4555 = vmatprep.subr.msk.bf16.mxu1 %vm3581_vm4, %v3546_v47 }
 0x23c   : > { %4223 = vmatpush3.bf16.xpose.msra.mxu1 %v3595_v46 }
 0x23d   : > { %4556 = vmatprep.subr.msk.bf16.mxu1 %vm3581_vm4, %v5994_v54 }
 0x244   : > { %4225 = vmatpush3.bf16.xpose.msra.mxu1 %v3592_v43 }
 0x245   : > { %4557 = vmatprep.subr.msk.bf16.mxu1 %vm3581_vm4, %v5997_v7 }
 0x24c   : > { %4227 = vmatpush3.bf16.xpose.msra.mxu1 %v3589_v37 }
 0x252   : > { %v3561_v10 = vpop.permute.xlu0 %3560 }
 0x253   : > { %4229 = vmatmul.mubr.msk.bf16.vlgmr.msra.gmra.mxu1 %vm3581_vm4, %v5923_v36  ;;  %v3571_v35 = vpop.permute.xlu1 %3570 }
 0x254   : > { %4230 = vmatprep.mubr.msk.bf16.mxu1 %vm3581_vm4, %v4708_v27 }
 0x256   : > { %v3566_v16 = vpop.permute.xlu0 %3565 }
 0x25b   : > { %4231 = vmatmul.mubr.msk.bf16.gmra.mxu1 %vm3581_vm4, %v4708_v27 }
 0x313   : > { %v3670_v45 = vpop.f32.mrf.mxu1 }
 0x314   : > { %v3671_v54 = vadd.f32 %v3670_v45, %v3561_v10 }
 0x315   : > { %v3672_v7 = vpop.f32.mrf.mxu1 }
 0x316   : > { %3687 = vst [vmem:[%s237_s7] sm:$0xff] %v3671_v54  ;;  %v3673_v14 = vadd.f32 %v3672_v7, %v3561_v10 }
 0x317   : > { %v3674_v34 = vpop.f32.mrf.mxu1 }
 0x318   : > { %3688 = vst [vmem:[%s237_s7 + $0x8] sm:$0xff] %v3673_v14  ;;  %v3675_v52 = vadd.f32 %v3674_v34, %v3566_v16 }
 0x319   : > { %v3676_v40 = vpop.f32.mrf.mxu1 }
 0x31a   : > { %3689 = vst [vmem:[%s237_s7 + $0x10] sm:$0xff] %v3675_v52  ;;  %v3677_v36 = vadd.f32 %v3676_v40, %v3566_v16 }
 0x31b   : > { %v3680_v62 = vpop.f32.mrf.mxu1 }
 0x31c   : > { %3690 = vst [vmem:[%s237_s7 + $0x18] sm:$0xff] %v3677_v36  ;;  %v3681_v0 = vadd.f32 %v3680_v62, %v3571_v35 }
 0x31d   : > { %v3682_v47 = vpop.f32.mrf.mxu1  ;;  %3699 = sbr.rel (!%p4842_p5) target bundleno = 809 (0x329), region = 44  ;;  %v3717_v17 = vld [vmem:[%s237_s7] sm:$0xff] (%p4842_p5) }
 0x31e   : > { %3691 = vst [vmem:[%s237_s7 + $0x20] sm:$0x3] %v3681_v0  ;;  %v3683_v55 = vadd.f32 %v3682_v47, %v3571_v35  ;;  %3718 = vst [vmem:[%s3704_s14] sm:$0xff] (%p4842_p5), %v3717_v17 }
 0x31f   : > { %v3684_v57 = vpop.f32.mrf.mxu1  ;;  %v3719_v11 = vld [vmem:[%s237_s7 + $0x8] sm:$0xff] (%p4842_p5) }
 0x320   : > { %3692 = vst [vmem:[%s237_s7 + $0x28] sm:$0x3] %v3683_v55  ;;  %3720 = vst [vmem:[%s3704_s14 + $0x8] sm:$0xff] (%p4842_p5), %v3719_v11 }
 0x321   : > { %v3685_v49 = vpop.f32.mrf.mxu1  ;;  %v3721_v13 = vld [vmem:[%s237_s7 + $0x10] sm:$0xff] (%p4842_p5) }
 0x322   : > { %3722 = vst [vmem:[%s3704_s14 + $0x20] sm:$0xff] %v3721_v13 }
 0x323   : > { %v3723_v5 = vld [vmem:[%s237_s7 + $0x18] sm:$0xff] }
 0x324   : > { %3724 = vst [vmem:[%s3704_s14 + $0x28] sm:$0xff] %v3723_v5 }
 0x325   : > { %v3725_v33 = vld [vmem:[%s237_s7 + $0x20] sm:$0xff] }
 0x326   : > { %3726 = vst [vmem:[%s3704_s14 + $0x40] sm:$0xff] %v3725_v33 }
 0x327   : > { %v3727_v38 = vld [vmem:[%s237_s7 + $0x28] sm:$0xff] }
 0x328   : > { %3728 = vst [vmem:[%s3704_s14 + $0x48] sm:$0xff] %v3727_v38 }
 0x329 PF: > { %s15_s24 = sadd.s32 1, %s4763_s24   ;;  %s6092_s18 = smov %s4743_s19 }
 0x32a   : > { %p12_p11 = scmp.ge.s32.totalorder %s15_s24, 6   ;;  %s6093_s19 = smov %s4853_s8 }
 0x32b   : > { %s6094_s20 = smov %s4755_s22  ;;  %s6095_s21 = smov %s4759_s23 }
 0x32c   : > { %s6096_s22 = smov %s6099_s25  ;;  %s6097_s23 = smov %s6103_s26 }
 0x32d   :  { %14 = sbr.rel (!%p12_p11) target bundleno = 4 (0x4), region = 101 }

// kernel: _lambda_.3
= control target key start
LH: loop header
LB: loop body
LE: loop exit
PB: predicated region body
PF: predicated region fallthrough
CT: control target
= control target key end

     0   :  { %s2866_s18 = smov 0   ;;  %s2868_s19 = smov 0   ;;  %s3511_s0 = inlined_call_operand.vmem [shape: bf16[2,1,176,4], index: 0, kind: input, shape index: {}]   ;;  %s3512_s1 = inlined_call_operand.vmem [shape: bf16[9,4,32], index: 1, kind: input, shape index: {}]   ;;  %s3513_s2 = inlined_call_operand.vmem [shape: f32[1,32], index: 2, kind: input, shape index: {}]   ;;  %s3514_s3 = inlined_call_operand.vmem [shape: bf16[18,32], index: 3, kind: input, shape index: {}]   ;;  %s3515_s4 = inlined_call_operand.vmem [shape: f32[18,1], index: 4, kind: input, shape index: {}]   ;;  %s3516_s5 = inlined_call_operand.vmem [shape: f32[2,18,128], index: 5, kind: output, shape index: {}]  }
   0x1   :  { %s2870_s20 = smov 0  }
   0x2 LB: > { %s27_s21 = sadd.s32 1, %s2829_s19  ;;  %p2308_p0 = scmp.ge.s32.totalorder %s2833_s20, 1  ;;  %s2833_s20 = sphi %s2870_s20, %s15_s20   ;;  %s2829_s19 = sphi %s2868_s19, %s3518_s19   ;;  %s2825_s18 = sphi %s2866_s18, %s3517_s18  }
   0x3   : > { %p29_p1 = scmp.ge.s32.totalorder %s27_s21, 2  ;;  %p207_p2 = scmp.lt.s32.totalorder %s2833_s20, 3 }
   0x5   : > { %s3520_s21 = smov (%p29_p1, %s27_s21), 0  ;;  %p208_p3 = pnand %p2308_p0, %p207_p2 }
   0x6   : > { %p242_p4 = scmp.lt.s32.totalorder (!%p208_p3), %s2825_s18, 1 }
   0x7   : > { %211 = sbr.rel (%p208_p3) target bundleno = 651 (0x28b), region = 40 }
   0xc   : > { %v2311_v0 = vld [vmem:[%s3512_s1 + $0x2] sm:$0x3]  ;;  %vm417_vm0 = vcmask 1041408   ;;  %v276_v1 = vld [vmem:[%s3512_s1] sm:$0x3]  ;;  %s3522_s18 = smov (!%p242_p4, %s2825_s18), 1 }
   0xd   : > { %2717 = vmatprep.subr.msk.bf16.mxu0 %vm417_vm0, %v2311_v0  ;;  %v419_v2 = vsel %vm417_vm0, %v2311_v0, 0  ;;  %2718 = vmatprep.subr.msk.bf16.mxu1 %vm417_vm0, %v276_v1  ;;  %v535_v3 = vsel %vm417_vm0, %v276_v1, 0  ;;  %v2337_v4 = vld [vmem:[%s3512_s1 + $0x4] sm:$0x3]  ;;  %v2347_v5 = vld [vmem:[%s3512_s1 + $0x6] sm:$0x3] }
   0xe   : > { %2536 = vmatpush3.bf16.msra.mxu0 %v419_v2  ;;  %2554 = vmatpush3.bf16.msra.mxu1 %v535_v3  ;;  %s2734_s30 = smul.u32 88, %s3522_s18  ;;  %vm392_vm1 = vcmask 31744   ;;  %v2921_v10 = vld [vmem:[%s3512_s1 + $0xa] sm:$0x3]  ;;  %v881_v12 = vsel %vm417_vm0, %v2347_v5, 0  ;;  %v683_v29 = vsel %vm417_vm0, %v2337_v4, 0 }
   0xf   : > { %2719 = vmatprep.subr.msk.bf16.mxu0 %vm417_vm0, %v2337_v4  ;;  %2720 = vmatprep.subr.msk.bf16.mxu1 %vm417_vm0, %v2347_v5  ;;  %vm323_vm2 = vsmask.f32 7424  ;;  %v2364_v39 = vld [vmem:[%s3512_s1 + $0x8] sm:$0x3]  ;;  %vm640_vm3 = vcmask 1046528   ;;  %v2999_v61 = vsel %vm417_vm0, %v2921_v10, 0 }
  0x10   : > { %s2908_s8 = scalar_lea.vmem %s3511_s0, %s2734_s30  ;;  %v2995_v60 = vsel %vm417_vm0, %v2364_v39, 0  ;;  %vm2136_vm4 = vcmask 261120   ;;  %s2735_s10 = smul.u32 24, %s3522_s18 }
  0x11   : > { %v260_v6 = vld [vmem:[%s2908_s8] sm:$0xf]  ;;  %v2912_v7 = vld [vmem:[%s2908_s8 + $0x4] sm:$0xf]  ;;  %v2916_v9 = vld [vmem:[%s2908_s8 + $0x8] sm:$0xff]  }
  0x12   : > { %v2312_v8 = vcombine.low %v260_v6, %v2912_v7  ;;  %v2924_v11 = vld [vmem:[%s2908_s8 + $0x10] sm:$0xff]   ;;  %v332_v15 = vshll.u32 %v2916_v9, 16  ;;  %v336_v16 = vshrl.u32 %v2916_v9, 16  ;;  %v2934_v18 = vld [vmem:[%s2908_s8 + $0x18] sm:$0xff]   ;;  %v2938_v20 = vld [vmem:[%s2908_s8 + $0x20] sm:$0xff]   ;;  %v642_v6 = vrot.slane %v2916_v9, 1  ;;  %s258_s13 = scalar_lea.vmem %s3516_s5, %s2735_s10 }
  0x13   : > { %v340_v17 = vshll.u32 %v2924_v11, 16  ;;  %v344_v19 = vshrl.u32 %v2924_v11, 16  ;;  %v348_v24 = vshll.u32 %v2934_v18, 16  ;;  %v356_v27 = vshll.u32 %v2938_v20, 16  ;;  %v2947_v28 = vld [vmem:[%s2908_s8 + $0x28] sm:$0xff]   ;;  %v2958_v38 = vld [vmem:[%s2908_s8 + $0x30] sm:$0xff]  }
  0x14   : > { %v325_v13 = vshrl.u32 %v2312_v8, 16  ;;  %v327_v14 = vshll.u32 %v2312_v8, 16  ;;  %2555 = vmatprep.mubr.msk.bf16.mxu1 %vm392_vm1, %v2312_v8  ;;  %v334_v22 = vrot.slane %v332_v15, 1  ;;  %v352_v32 = vshrl.u32 %v2934_v18, 16  ;;  %v2968_v44 = vld [vmem:[%s2908_s8 + $0x38] sm:$0xff]   ;;  %v2992_v59 = vld [vmem:[%s2908_s8 + $0x10] sm:$0xff]  }
  0x15   : > { %2556 = vmatmul.mubr.msk.bf16.vlgmr.msra.gmra.mxu1 %vm392_vm1, %v2916_v9  ;;  %v342_v23 = vrot.slane %v340_v17, 1  ;;  %v350_v31 = vrot.slane %v348_v24, 1  ;;  %v360_v35 = vshrl.u32 %v2938_v20, 16  ;;  %v364_v36 = vshll.u32 %v2947_v28, 16  ;;  %v634_v53 = vld [vmem:[%s2908_s8] sm:$0xe] }
  0x16   : > { %v329_v21 = vrot.slane %v327_v14, 1  ;;  %2559 = vmatprep.mubr.msk.bf16.mxu1 %vm392_vm1, %v2924_v11  ;;  %2590 = vmatpush3.bf16.msra.mxu1 %v881_v12  ;;  %v338_v26 = vor.u32 %v336_v16, %v334_v22  ;;  %v358_v40 = vrot.slane %v356_v27, 1  ;;  %v372_v45 = vshll.u32 %v2958_v38, 16  ;;  %v2975_v46 = vld [vmem:[%s2908_s8 + $0x40] ss:$0 sps:$4 sm:$0x11]  }
  0x17   : > { %2722 = vmatprep.subr.msk.bf16.mxu1 %vm417_vm0, %v2921_v10  ;;  %v346_v30 = vor.u32 %v344_v19, %v342_v23  ;;  %v354_v41 = vor.u32 %v352_v32, %v350_v31  ;;  %v366_v43 = vrot.slane %v364_v36, 1  ;;  %v368_v48 = vshrl.u32 %v2947_v28, 16  ;;  %v3002_v62 = vld [vmem:[%s2908_s8 + $0x18] sm:$0xff]   ;;  %v2773_v1 = vld [vmem:[%s2908_s8 + $0x8] sm:$0xff]   ;;  %v3013_v8 = vld [vmem:[%s2908_s8 + $0x20] sm:$0xff]  }
  0x18   : > { %v330_v25 = vor.u32 %v329_v21, %v325_v13  ;;  %v343_v34 = vsel %vm323_vm2, %v338_v26, %v342_v23  ;;  %v362_v42 = vor.u32 %v360_v35, %v358_v40  ;;  %v376_v50 = vshrl.u32 %v2958_v38, 16  ;;  %v3019_v14 = vld [vmem:[%s2908_s8 + $0x28] sm:$0xff]   ;;  %v3025_v19 = vld [vmem:[%s2908_s8 + $0x30] sm:$0xff]   ;;  %v3047_v35 = vld [vmem:[%s2908_s8 + $0x40] sm:$0xff]  }
  0x19   : > { %v351_v37 = vsel %vm323_vm2, %v346_v30, %v350_v31  ;;  %v359_v47 = vsel %vm323_vm2, %v354_v41, %v358_v40  ;;  %v380_v51 = vshll.u32 %v2968_v44, 16  ;;  %v374_v52 = vrot.slane %v372_v45, 1  ;;  %v3036_v30 = vld [vmem:[%s2908_s8 + $0x38] sm:$0xff]   ;;  %v996_v31 = vld [vmem:[%s2908_s8 + $0x8] sm:$0xf] }
  0x1a   : > { %v335_v33 = vsel %vm323_vm2, %v330_v25, %v334_v22  ;;  %v367_v49 = vsel %vm323_vm2, %v362_v42, %v366_v43  ;;  %v370_v54 = vor.u32 %v368_v48, %v366_v43  ;;  %v388_v57 = vshll.u32 %v2975_v46, 16  ;;  %v3041_v32 = vld [vmem:[%s2908_s8 + $0xc] sm:$0xf]  ;;  %v3054_v40 = vld [vmem:[%s2908_s8 + $0x48] ss:$0 sps:$4 sm:$0x11]  }
  0x1b   : > { %2537 = vmatprep.mubr.msk.bf16.mxu0 %vm392_vm1, %v335_v33  ;;  %v378_v55 = vor.u32 %v376_v50, %v374_v52  ;;  %v382_v56 = vrot.slane %v380_v51, 1  ;;  %v2338_v58 = vcombine.low %v634_v53, %v2912_v7  ;;  %v384_v0 = vshrl.u32 %v2968_v44, 16  ;;  %v2774_v42 = vld [vmem:[%s2908_s8 + $0x10] sm:$0xff]  }
  0x1c   : > { %2538 = vmatmul.mubr.msk.bf16.vlgmr.msra.gmra.mxu0 %vm392_vm1, %v343_v34  ;;  %v375_v63 = vsel %vm323_vm2, %v370_v54, %v374_v52  ;;  %v1066_v2 = vshll.u32 %v2992_v59, 16  ;;  %v1070_v3 = vshrl.u32 %v2992_v59, 16  ;;  %v390_v5 = vrot.slane %v388_v57, 1  ;;  %v3074_v57 = vld [vmem:[%s3512_s1 + $0xe] sm:$0x3] }
  0x1d   : > { %2572 = vmatpush3.bf16.msra.mxu0 %v683_v29  ;;  %2541 = vmatprep.mubr.msk.bf16.mxu0 %vm392_vm1, %v351_v37  ;;  %v383_v4 = vsel %vm323_vm2, %v378_v55, %v382_v56  ;;  %v1074_v7 = vshll.u32 %v3002_v62, 16  ;;  %v641_v10 = vrot.slane %v2338_v58, 1  ;;  %v1078_v13 = vshrl.u32 %v3002_v62, 16 }
  0x1e   : > { %2560 = vmatmul.mubr.msk.bf16.gmra.mxu1 %vm392_vm1, %v2934_v18  ;;  %2721 = vmatprep.subr.msk.bf16.mxu0 %vm417_vm0, %v2364_v39  ;;  %v3015_v12 = vrot.slane %v1066_v2, 1  ;;  %v644_v15 = vrot.slane %v2924_v11, 1  ;;  %v1082_v17 = vshll.u32 %v3013_v8, 16  ;;  %v386_v21 = vor.u32 %v384_v0, %v382_v56  ;;  %v1627_v2 = vld [vmem:[%s2908_s8 + $0x10] sm:$0xf] }
  0x1f   : > { %2563 = vmatprep.mubr.msk.bf16.mxu1 %vm392_vm1, %v2938_v20  ;;  %v1076_v16 = vrot.slane %v1074_v7, 1  ;;  %v1086_v23 = vshrl.u32 %v3013_v8, 16  ;;  %v1090_v24 = vshll.u32 %v3019_v14, 16  ;;  %v646_v25 = vrot.slane %v2934_v18, 1 }
  0x20   : > { %v1072_v22 = vor.u32 %v1070_v3, %v3015_v12  ;;  %v648_v26 = vrot.slane %v2938_v20, 1  ;;  %v1084_v29 = vrot.slane %v1082_v17, 1  ;;  %v1094_v39 = vshrl.u32 %v3019_v14, 16  ;;  %v3085_v3 = vld [vmem:[%s2908_s8 + $0x18] sm:$0xff]  }
  0x21   : > { %v1080_v27 = vor.u32 %v1078_v13, %v1076_v16  ;;  %v1092_v34 = vrot.slane %v1090_v24, 1  ;;  %v391_v41 = vsel %vm323_vm2, %v386_v21, %v390_v5  ;;  %v1098_v43 = vshll.u32 %v3025_v19, 16  ;;  %v3092_v13 = vld [vmem:[%s2908_s8 + $0x14] sm:$0xf] }
  0x22   : > { %v3044_v33 = vsel %vm323_vm2, %v1072_v22, %v1076_v16  ;;  %v1088_v37 = vor.u32 %v1086_v23, %v1084_v29  ;;  %v1102_v45 = vshrl.u32 %v3025_v19, 16  ;;  %v643_v48 = vsel %vm640_vm3, %v641_v10, %v642_v6  ;;  %v3095_v16 = vld [vmem:[%s2908_s8 + $0x20] sm:$0xff]  }
  0x23   : > { %v3050_v36 = vsel %vm323_vm2, %v1080_v27, %v1084_v29  ;;  %v650_v50 = vrot.slane %v2947_v28, 1  ;;  %v1096_v52 = vor.u32 %v1094_v39, %v1092_v34  ;;  %v1100_v53 = vrot.slane %v1098_v43, 1  ;;  %v1266_v39 = vld [vmem:[%s2908_s8 + $0x8] sm:$0xe]  ;;  %v3123_v43 = vld [vmem:[%s3512_s1 + $0xc] sm:$0x3] }
  0x24   : > { %2542 = vmatmul.mubr.msk.bf16.gmra.mxu0 %vm392_vm1, %v359_v47  ;;  %v1106_v47 = vshll.u32 %v3036_v30, 16  ;;  %v3067_v51 = vsel %vm323_vm2, %v1088_v37, %v1092_v34  ;;  %v1110_v55 = vshrl.u32 %v3036_v30, 16  ;;  %v1114_v56 = vshll.u32 %v3047_v35, 16  ;;  %v2776_v37 = vld [vmem:[%s2908_s8 + $0x20] sm:$0xff]  }
  0x25   : > { %2545 = vmatprep.mubr.msk.bf16.mxu0 %vm392_vm1, %v367_v49  ;;  %v2775_v49 = vld [vmem:[%s2908_s8 + $0x18] sm:$0xff]   ;;  %v652_v58 = vrot.slane %v2958_v38, 1  ;;  %v1118_v0 = vshrl.u32 %v3047_v35, 16  ;;  %v1104_v5 = vor.u32 %v1102_v45, %v1100_v53  ;;  %v654_v17 = vrot.slane %v2968_v44, 1 }
  0x26   : > { %2564 = vmatmul.mubr.msk.bf16.gmra.mxu1 %vm392_vm1, %v2947_v28  ;;  %v1108_v54 = vrot.slane %v1106_v47, 1  ;;  %v1116_v10 = vrot.slane %v1114_v56, 1  ;;  %v2410_v23 = vcombine.low %v1627_v2, %v3092_v13  ;;  %v645_v34 = vsel %vm640_vm3, %v642_v6, %v644_v15 }
  0x27   : > { %2567 = vmatprep.mubr.msk.bf16.mxu1 %vm392_vm1, %v2958_v38  ;;  %v1701_v6 = vshrl.u32 %v3085_v3, 16  ;;  %v1705_v47 = vshll.u32 %v3095_v16, 16  ;;  %v2383_v11 = vcombine.low %v1266_v39, %v3041_v32 }
  0x28   : > { %v1112_v7 = vor.u32 %v1110_v55, %v1108_v54  ;;  %v3104_v24 = vsel %vm323_vm2, %v1104_v5, %v1108_v54  ;;  %v1120_v29 = vor.u32 %v1118_v0, %v1116_v10 }
  0x29   : > { %v1707_v55 = vrot.slane %v1705_v47, 1 }
  0x2a   : > { %v3107_v27 = vsel %vm323_vm2, %v1112_v7, %v1116_v10 }
  0x2c   : > { %2546 = vmatmul.mubr.msk.bf16.gmra.mxu0 %vm392_vm1, %v375_v63  ;;  %v3079_v63 = vcombine.low %v996_v31, %v3041_v32  ;;  %v1697_v31 = vshll.u32 %v3085_v3, 16 }
  0x2d   : > { %2549 = vmatprep.mubr.msk.bf16.mxu0 %vm392_vm1, %v383_v4  ;;  %v3089_v4 = vsel %vm323_vm2, %v1096_v52, %v1100_v53  ;;  %v1709_v53 = vshrl.u32 %v3095_v16, 16 }
  0x2e   : > { %2568 = vmatmul.mubr.msk.bf16.gmra.mxu1 %vm392_vm1, %v2968_v44  ;;  %v1059_v21 = vshrl.u32 %v3079_v63, 16  ;;  %v1699_v9 = vrot.slane %v1697_v31, 1  ;;  %v1061_v10 = vshll.u32 %v3079_v63, 16  ;;  %v1279_v44 = vrot.slane %v3019_v14, 1 }
  0x2f   : > { %2591 = vmatprep.mubr.msk.bf16.mxu1 %vm392_vm1, %v2773_v1  ;;  %v1122_v1 = vshll.u32 %v3054_v40, 16  ;;  %v1711_v5 = vor.u32 %v1709_v53, %v1707_v55  ;;  %v2806_v53 = vld [vmem:[%s2908_s8 + $0x48] sm:$0xff]   ;;  %v1283_v14 = vrot.slane %v3036_v30, 1  ;;  %v1287_v30 = vrot.slane %v3054_v40, 1  ;;  %v2792_v40 = vld [vmem:[%s2908_s8 + $0x18] sm:$0xff]  }
  0x30   : > { %v1703_v54 = vor.u32 %v1701_v6, %v1699_v9 }
  0x31   : > { %v1124_v22 = vrot.slane %v1122_v1, 1  ;;  %v3142_v1 = vld [vmem:[%s2908_s8 + $0x30] sm:$0xff]  }
  0x32   : > { %v1725_v31 = vshrl.u32 %v3142_v1, 16 }
  0x33   : > { %v3126_v45 = vsel %vm323_vm2, %v1120_v29, %v1124_v22  ;;  %v1721_v22 = vshll.u32 %v3142_v1, 16  ;;  %v2802_v29 = vld [vmem:[%s2908_s8 + $0x38] sm:$0xff]  }
  0x34   : > { %2550 = vmatmul.mubr.msk.bf16.gmra.mxu0 %vm392_vm1, %v391_v41  ;;  %v1692_v41 = vshll.u32 %v2410_v23, 16  ;;  %v1729_v6 = vshll.u32 %v2802_v29, 16  ;;  %v1733_v47 = vshrl.u32 %v2802_v29, 16 }
  0x35   : > { %2573 = vmatprep.mubr.msk.bf16.mxu0 %vm392_vm1, %v643_v48  ;;  %v3131_v48 = vld [vmem:[%s2908_s8 + $0x28] sm:$0xff]   ;;  %v1723_v39 = vrot.slane %v1721_v22, 1  ;;  %v1906_v22 = vrot.slane %v3095_v16, 1  ;;  %v1910_v16 = vrot.slane %v3142_v1, 1  ;;  %v1916_v1 = vrot.slane %v2806_v53, 1 }
  0x36   : > { %2592 = vmatmul.mubr.msk.bf16.vlgmr.msra.gmra.mxu1 %vm392_vm1, %v2774_v42  ;;  %v2777_v42 = vld [vmem:[%s2908_s8 + $0x28] sm:$0xff]   ;;  %v1694_v52 = vrot.slane %v1692_v41, 1  ;;  %v1713_v56 = vshll.u32 %v3131_v48, 16  ;;  %v1717_v2 = vshrl.u32 %v3131_v48, 16  ;;  %v2779_v41 = vld [vmem:[%s2908_s8 + $0x38] sm:$0xff]  }
  0x37   : > { %2595 = vmatprep.mubr.msk.bf16.mxu1 %vm392_vm1, %v2775_v49  ;;  %2626 = vmatpush3.bf16.msra.mxu1 %v2999_v61  ;;  %v1690_v61 = vshrl.u32 %v2410_v23, 16  ;;  %v647_v49 = vsel %vm640_vm3, %v644_v15, %v646_v25  ;;  %v3149_v15 = vsel %vm323_vm2, %v1703_v54, %v1707_v55  ;;  %v1727_v18 = vor.u32 %v1725_v31, %v1723_v39 }
  0x38   : > { %2724 = vmatprep.subr.msk.bf16.mxu1 %vm417_vm0, %v3074_v57  ;;  %v1715_v7 = vrot.slane %v1713_v56, 1  ;;  %v653_v54 = vsel %vm640_vm3, %v650_v50, %v652_v58  ;;  %v1731_v55 = vrot.slane %v1729_v6, 1 }
  0x39   : > { %v1695_v0 = vor.u32 %v1694_v52, %v1690_v61  ;;  %v2803_v61 = vld [vmem:[%s2908_s8 + $0x40] sm:$0xff]  }
  0x3a   : > { %v3161_v32 = vsel %vm323_vm2, %v1711_v5, %v1715_v7  ;;  %v1719_v23 = vor.u32 %v1717_v2, %v1715_v7  ;;  %v1741_v56 = vshrl.u32 %v2803_v61, 16  ;;  %v1904_v2 = vrot.slane %v3085_v3, 1  ;;  %v2807_v5 = vld [vmem:[%s2908_s8 + $0x50] ss:$0 sps:$4 sm:$0x11]  }
  0x3b   : > { %v3197_v28 = vsel %vm323_vm2, %v1727_v18, %v1731_v55  ;;  %v1897_v7 = vld [vmem:[%s2908_s8 + $0x10] sm:$0xe]  ;;  %v1914_v18 = vrot.slane %v2803_v61, 1 }
  0x3c   : > { %2574 = vmatmul.mubr.msk.bf16.vlgmr.msra.gmra.mxu0 %vm392_vm1, %v645_v34  ;;  %v649_v34 = vsel %vm640_vm3, %v646_v25, %v648_v26  ;;  %v3180_v52 = vsel %vm323_vm2, %v1719_v23, %v1723_v39  ;;  %v1737_v25 = vshll.u32 %v2803_v61, 16  ;;  %v2428_v31 = vcombine.low %v1897_v7, %v3092_v13 }
  0x3d   : > { %2608 = vmatpush3.bf16.msra.mxu0 %v2995_v60  ;;  %2577 = vmatprep.mubr.msk.bf16.mxu0 %vm392_vm1, %v647_v49  ;;  %v3156_v60 = vsel %vm323_vm2, %v1695_v0, %v1699_v9  ;;  %v1272_v9 = vrot.slane %v2383_v11, 1  ;;  %v651_v49 = vsel %vm640_vm3, %v648_v26, %v650_v50  ;;  %v1745_v26 = vshll.u32 %v2806_v53, 16 }
  0x3e   : > { %2596 = vmatmul.mubr.msk.bf16.gmra.mxu1 %vm392_vm1, %v2776_v37  ;;  %2723 = vmatprep.subr.msk.bf16.mxu0 %vm417_vm0, %v3123_v43  ;;  %v2778_v37 = vld [vmem:[%s2908_s8 + $0x30] sm:$0xff]   ;;  %v1739_v20 = vrot.slane %v1737_v25, 1  ;;  %v1749_v0 = vshrl.u32 %v2806_v53, 16  ;;  %v655_v11 = vsel %vm640_vm3, %v652_v58, %v654_v17  ;;  %v1735_v50 = vor.u32 %v1733_v47, %v1731_v55  ;;  %v2780_v25 = vld [vmem:[%s2908_s8 + $0x40] sm:$0xff]  }
  0x3f   : > { %2599 = vmatprep.mubr.msk.bf16.mxu1 %vm392_vm1, %v2777_v42  ;;  %v1273_v42 = vrot.slane %v2992_v59, 1  ;;  %v1747_v3 = vrot.slane %v1745_v26, 1  ;;  %v1753_v58 = vshll.u32 %v2807_v5, 16  ;;  %v3210_v39 = vsel %vm640_vm3, %v1904_v2, %v1906_v22 }
  0x40   : > { %v1743_v23 = vor.u32 %v1741_v56, %v1739_v20  ;;  %v3207_v38 = vsel %vm323_vm2, %v1735_v50, %v1739_v20  ;;  %v1903_v47 = vrot.slane %v2428_v31, 1  ;;  %v1063_v55 = vrot.slane %v1061_v10, 1 }
  0x41   : > { %v1751_v6 = vor.u32 %v1749_v0, %v1747_v3  ;;  %v1918_v20 = vrot.slane %v2807_v5, 1  ;;  %v1274_v10 = vsel %vm640_vm3, %v1272_v9, %v1273_v42  ;;  %v656_v53 = vrot.slane %v2975_v46, 1 }
  0x42   : > { %v3224_v56 = vsel %vm640_vm3, %v1903_v47, %v1904_v2  ;;  %v1064_v2 = vor.u32 %v1063_v55, %v1059_v21  ;;  %v1277_v9 = vrot.slane %v3013_v8, 1  ;;  %v1281_v59 = vrot.slane %v3025_v19, 1 }
  0x43   : > { %v3243_v61 = vsel %vm640_vm3, %v1916_v1, %v1918_v20  ;;  %v657_v5 = vsel %vm640_vm3, %v654_v17, %v656_v53  ;;  %v1512_v8 = vsel %vm417_vm0, %v3123_v43, 0  ;;  %v1285_v19 = vrot.slane %v3047_v35, 1  ;;  %v2801_v43 = vld [vmem:[%s2908_s8 + $0x38] sm:$0xff]  }
  0x44   : > { %2578 = vmatmul.mubr.msk.bf16.gmra.mxu0 %vm392_vm1, %v649_v34  ;;  %v1908_v34 = vrot.slane %v3131_v48, 1  ;;  %v1755_v48 = vrot.slane %v1753_v58, 1  ;;  %v1282_v17 = vsel %vm640_vm3, %v1279_v44, %v1281_v59  ;;  %v1284_v21 = vsel %vm640_vm3, %v1281_v59, %v1283_v14 }
  0x45   : > { %2581 = vmatprep.mubr.msk.bf16.mxu0 %vm392_vm1, %v651_v49  ;;  %v1912_v49 = vrot.slane %v2802_v29, 1  ;;  %v3240_v29 = vsel %vm640_vm3, %v1914_v18, %v1916_v1  ;;  %v1288_v35 = vsel %vm640_vm3, %v1285_v19, %v1287_v30 }
  0x46   : > { %2600 = vmatmul.mubr.msk.bf16.gmra.mxu1 %vm392_vm1, %v2778_v37  ;;  %v3214_v37 = vsel %vm323_vm2, %v1743_v23, %v1747_v3  ;;  %v3217_v13 = vsel %vm640_vm3, %v1906_v22, %v1908_v34  ;;  %v3227_v26 = vsel %vm323_vm2, %v1751_v6, %v1755_v48 }
  0x47   : > { %2603 = vmatprep.mubr.msk.bf16.mxu1 %vm392_vm1, %v2779_v41  ;;  %v3220_v41 = vsel %vm640_vm3, %v1908_v34, %v1910_v16  ;;  %v3230_v0 = vsel %vm640_vm3, %v1910_v16, %v1912_v49  ;;  %v3233_v50 = vsel %vm640_vm3, %v1912_v49, %v1914_v18 }
  0x4c   : > { %2582 = vmatmul.mubr.msk.bf16.gmra.mxu0 %vm392_vm1, %v653_v54  ;;  %v1275_v54 = vrot.slane %v3002_v62, 1  ;;  %v1782_v62 = vsel %vm417_vm0, %v3074_v57, 0  ;;  %v2427_v57 = vld [vmem:[%s3512_s1 + $0x10] sm:$0x3] }
  0x4d   : > { %2585 = vmatprep.mubr.msk.bf16.mxu0 %vm392_vm1, %v655_v11  ;;  %v1069_v11 = vsel %vm323_vm2, %v1064_v2, %v3015_v12  ;;  %v1280_v12 = vsel %vm640_vm3, %v1277_v9, %v1279_v44 }
  0x4e   : > { %2604 = vmatmul.mubr.msk.bf16.gmra.mxu1 %vm392_vm1, %v2780_v25  ;;  %v1276_v46 = vsel %vm640_vm3, %v1273_v42, %v1275_v54  ;;  %v1278_v63 = vsel %vm640_vm3, %v1275_v54, %v1277_v9 }
  0x4f   : > { %2627 = vmatprep.mubr.msk.bf16.mxu1 %vm392_vm1, %v1274_v10 }
  0x54   : > { %2586 = vmatmul.mubr.msk.bf16.gmra.mxu0 %vm392_vm1, %v657_v5 }
  0x55   : > { %2609 = vmatprep.mubr.msk.bf16.mxu0 %vm392_vm1, %v1069_v11 }
  0x56   : > { %2628 = vmatmul.mubr.msk.bf16.vlgmr.msra.gmra.mxu1 %vm392_vm1, %v1276_v46 }
  0x57   : > { %2631 = vmatprep.mubr.msk.bf16.mxu1 %vm392_vm1, %v1278_v63  ;;  %2662 = vmatpush3.bf16.msra.mxu1 %v1782_v62 }
  0x5c   : > { %2610 = vmatmul.mubr.msk.bf16.vlgmr.msra.gmra.mxu0 %vm392_vm1, %v3044_v33  ;;  %v1286_v33 = vsel %vm640_vm3, %v1283_v14, %v1285_v19 }
  0x5d   : > { %2644 = vmatpush3.bf16.msra.mxu0 %v1512_v8  ;;  %2613 = vmatprep.mubr.msk.bf16.mxu0 %vm392_vm1, %v3050_v36  ;;  %v2791_v36 = vld [vmem:[%s2908_s8 + $0x10] sm:$0xff]  }
  0x5e   : > { %2632 = vmatmul.mubr.msk.bf16.gmra.mxu1 %vm392_vm1, %v1280_v12  ;;  %2725 = vmatprep.subr.msk.bf16.mxu0 %vm417_vm0, %v2427_v57 }
  0x5f   : > { %2635 = vmatprep.mubr.msk.bf16.mxu1 %vm392_vm1, %v1282_v17 }
  0x64   : > { %2614 = vmatmul.mubr.msk.bf16.gmra.mxu0 %vm392_vm1, %v3067_v51  ;;  %v2796_v51 = vld [vmem:[%s2908_s8 + $0x20] sm:$0xff]  }
  0x65   : > { %2617 = vmatprep.mubr.msk.bf16.mxu0 %vm392_vm1, %v3089_v4  ;;  %v1945_v4 = vsel %vm417_vm0, %v2427_v57, 0 }
  0x66   : > { %2636 = vmatmul.mubr.msk.bf16.gmra.mxu1 %vm392_vm1, %v1284_v21 }
  0x67   : > { %2639 = vmatprep.mubr.msk.bf16.mxu1 %vm392_vm1, %v1286_v33 }
  0x6c   : > { %2618 = vmatmul.mubr.msk.bf16.gmra.mxu0 %vm392_vm1, %v3104_v24  ;;  %v2797_v24 = vld [vmem:[%s2908_s8 + $0x28] sm:$0xff]  }
  0x6d   : > { %2621 = vmatprep.mubr.msk.bf16.mxu0 %vm392_vm1, %v3107_v27  ;;  %v2800_v27 = vld [vmem:[%s2908_s8 + $0x30] sm:$0xff]  }
  0x6e   : > { %2640 = vmatmul.mubr.msk.bf16.gmra.mxu1 %vm392_vm1, %v1288_v35 }
  0x6f   : > { %2663 = vmatprep.mubr.msk.bf16.mxu1 %vm392_vm1, %v3156_v60 }
  0x74   : > { %2622 = vmatmul.mubr.msk.bf16.gmra.mxu0 %vm392_vm1, %v3126_v45  ;;  %v2804_v45 = vld [vmem:[%s2908_s8 + $0x40] sm:$0xff]  }
  0x75   : > { %2645 = vmatprep.mubr.msk.bf16.mxu0 %vm392_vm1, %v2791_v36 }
  0x76   : > { %2664 = vmatmul.mubr.msk.bf16.vlgmr.msra.gmra.mxu1 %vm392_vm1, %v3149_v15  ;;  %v2805_v15 = vld [vmem:[%s2908_s8 + $0x48] sm:$0xff]  }
  0x77   : > { %2667 = vmatprep.mubr.msk.bf16.mxu1 %vm392_vm1, %v3161_v32 }
  0x7c   : > { %2646 = vmatmul.mubr.msk.bf16.vlgmr.msra.gmra.mxu0 %vm392_vm1, %v2792_v40 }
  0x7d   : > { %2680 = vmatpush3.bf16.msra.mxu0 %v1945_v4  ;;  %2649 = vmatprep.mubr.msk.bf16.mxu0 %vm392_vm1, %v2796_v51 }
  0x7e   : > { %2668 = vmatmul.mubr.msk.bf16.gmra.mxu1 %vm392_vm1, %v3180_v52 }
  0x7f   : > { %2671 = vmatprep.mubr.msk.bf16.mxu1 %vm392_vm1, %v3197_v28 }
  0x84   : > { %2650 = vmatmul.mubr.msk.bf16.gmra.mxu0 %vm392_vm1, %v2797_v24 }
  0x85   : > { %2653 = vmatprep.mubr.msk.bf16.mxu0 %vm392_vm1, %v2800_v27 }
  0x86   : > { %2672 = vmatmul.mubr.msk.bf16.gmra.mxu1 %vm392_vm1, %v3207_v38 }
  0x87   : > { %2675 = vmatprep.mubr.msk.bf16.mxu1 %vm392_vm1, %v3214_v37 }
  0x8c   : > { %2654 = vmatmul.mubr.msk.bf16.gmra.mxu0 %vm392_vm1, %v2801_v43 }
  0x8d   : > { %2657 = vmatprep.mubr.msk.bf16.mxu0 %vm392_vm1, %v2804_v45 }
  0x8e   : > { %2676 = vmatmul.mubr.msk.bf16.gmra.mxu1 %vm392_vm1, %v3227_v26 }
  0x94   : > { %2658 = vmatmul.mubr.msk.bf16.gmra.mxu0 %vm392_vm1, %v2805_v15 }
  0x95   : > { %2681 = vmatprep.mubr.msk.bf16.mxu0 %vm392_vm1, %v3224_v56 }
  0x9c   : > { %2682 = vmatmul.mubr.msk.bf16.vlgmr.msra.gmra.mxu0 %vm392_vm1, %v3210_v39 }
  0x9d   : > { %2685 = vmatprep.mubr.msk.bf16.mxu0 %vm392_vm1, %v3217_v13 }
  0xa4   : > { %2686 = vmatmul.mubr.msk.bf16.gmra.mxu0 %vm392_vm1, %v3220_v41 }
  0xa5   : > { %2689 = vmatprep.mubr.msk.bf16.mxu0 %vm392_vm1, %v3230_v0 }
  0xac   : > { %2690 = vmatmul.mubr.msk.bf16.gmra.mxu0 %vm392_vm1, %v3233_v50 }
  0xad   : > { %2693 = vmatprep.mubr.msk.bf16.mxu0 %vm392_vm1, %v3240_v29 }
  0xb4   : > { %2694 = vmatmul.mubr.msk.bf16.gmra.mxu0 %vm392_vm1, %v3243_v61 }
  0xd5   : > { %v2557_v60 = vpop.f32.mrf.mxu1 }
  0xd7   : > { %v571_v32 = vpop.f32.mrf.mxu1 }
  0xd9   : > { %v2558_v42 = vpop.f32.mrf.mxu1 }
  0xdb   : > { %v574_v52 = vpop.f32.mrf.mxu1 }
  0xdc   : > { %v2539_v28 = vpop.f32.mrf.mxu0 }
  0xdd   : > { %v580_v7 = vadd.f32 %v2557_v60, %v2539_v28 }
  0xde   : > { %v455_v22 = vpop.f32.mrf.mxu0  ;;  %v2561_v23 = vpop.f32.mrf.mxu1 }
  0xdf   : > { %v572_v3 = vadd.f32 %v571_v32, %v455_v22 }
  0xe0   : > { %v2540_v31 = vpop.f32.mrf.mxu0  ;;  %v587_v34 = vpop.f32.mrf.mxu1 }
  0xe1   : > { %v583_v38 = vadd.f32 %v2558_v42, %v2540_v31 }
  0xe2   : > { %v458_v58 = vpop.f32.mrf.mxu0  ;;  %v2562_v39 = vpop.f32.mrf.mxu1 }
  0xe3   : > { %v575_v16 = vadd.f32 %v574_v52, %v458_v58 }
  0xe4   : > { %v2543_v37 = vpop.f32.mrf.mxu0  ;;  %v590_v6 = vpop.f32.mrf.mxu1 }
  0xe5   : > { %v596_v47 = vadd.f32 %v2561_v23, %v2543_v37 }
  0xe6   : > { %v471_v13 = vpop.f32.mrf.mxu0  ;;  %v2565_v48 = vpop.f32.mrf.mxu1 }
  0xe7   : > { %v588_v41 = vadd.f32 %v587_v34, %v471_v13 }
  0xe8   : > { %v2544_v49 = vpop.f32.mrf.mxu0  ;;  %v603_v18 = vpop.f32.mrf.mxu1 }
  0xe9   : > { %v599_v25 = vadd.f32 %v2562_v39, %v2544_v49 }
  0xea   : > { %v474_v55 = vpop.f32.mrf.mxu0  ;;  %v2566_v56 = vpop.f32.mrf.mxu1 }
  0xeb   : > { %v591_v1 = vadd.f32 %v590_v6, %v474_v55 }
  0xec   : > { %v2547_v20 = vpop.f32.mrf.mxu0  ;;  %v606_v26 = vpop.f32.mrf.mxu1 }
  0xed   : > { %v612_v0 = vadd.f32 %v2565_v48, %v2547_v20 }
  0xee   : > { %v487_v50 = vpop.f32.mrf.mxu0  ;;  %v2569_v10 = vpop.f32.mrf.mxu1 }
  0xef   : > { %v604_v29 = vadd.f32 %v603_v18, %v487_v50 }
  0xf0   : > { %v2548_v61 = vpop.f32.mrf.mxu0  ;;  %v619_v53 = vpop.f32.mrf.mxu1 }
  0xf1   : > { %v615_v2 = vadd.f32 %v2566_v56, %v2548_v61 }
  0xf2   : > { %v490_v54 = vpop.f32.mrf.mxu0  ;;  %v2570_v9 = vpop.f32.mrf.mxu1 }
  0xf3   : > { %v607_v5 = vadd.f32 %v606_v26, %v490_v54 }
  0xf4   : > { %v2551_v11 = vpop.f32.mrf.mxu0  ;;  %v622_v46 = vpop.f32.mrf.mxu1 }
  0xf5   : > { %v628_v63 = vadd.f32 %v2569_v10, %v2551_v11 }
  0xf6   : > { %v503_v62 = vpop.f32.mrf.mxu0  ;;  %v2593_v44 = vpop.f32.mrf.mxu1 }
  0xf7   : > { %v620_v59 = vadd.f32 %v619_v53, %v503_v62 }
  0xf8   : > { %v2552_v8 = vpop.f32.mrf.mxu0  ;;  %v917_v12 = vpop.f32.mrf.mxu1 }
  0xf9   : > { %v631_v57 = vadd.f32 %v2570_v9, %v2552_v8 }
  0xfa   : > { %v506_v17 = vpop.f32.mrf.mxu0  ;;  %v2594_v14 = vpop.f32.mrf.mxu1 }
  0xfb   : > { %v623_v19 = vadd.f32 %v622_v46, %v506_v17 }
  0xfc   : > { %v2575_v21 = vpop.f32.mrf.mxu0  ;;  %v920_v33 = vpop.f32.mrf.mxu1 }
  0xfd   : > { %v784_v30 = vadd.f32 %v2575_v21, %v580_v7 }
  0xfe   : > { %v719_v35 = vpop.f32.mrf.mxu0  ;;  %v2597_v36 = vpop.f32.mrf.mxu1 }
  0xff   : > { %v782_v40 = vadd.f32 %v719_v35, %v572_v3  ;;  %v982_v51 = vadd.f32 %v2593_v44, %v784_v30 }
 0x100   : > { %v2576_v4 = vpop.f32.mrf.mxu0  ;;  %v933_v24 = vpop.f32.mrf.mxu1 }
 0x101   : > { %v785_v27 = vadd.f32 %v2576_v4, %v583_v38  ;;  %v980_v43 = vadd.f32 %v917_v12, %v782_v40 }
 0x102   : > { %v722_v45 = vpop.f32.mrf.mxu0  ;;  %v2598_v15 = vpop.f32.mrf.mxu1 }
 0x103   : > { %v783_v60 = vadd.f32 %v722_v45, %v575_v16  ;;  %v983_v32 = vadd.f32 %v2594_v14, %v785_v27 }
 0x104   : > { %v2579_v42 = vpop.f32.mrf.mxu0  ;;  %v936_v52 = vpop.f32.mrf.mxu1 }
 0x105   : > { %v788_v28 = vadd.f32 %v2579_v42, %v596_v47  ;;  %v981_v22 = vadd.f32 %v920_v33, %v783_v60 }
 0x106   : > { %v735_v23 = vpop.f32.mrf.mxu0  ;;  %v2601_v31 = vpop.f32.mrf.mxu1 }
 0x107   : > { %v786_v34 = vadd.f32 %v735_v23, %v588_v41  ;;  %v986_v7 = vadd.f32 %v2597_v36, %v788_v28 }
 0x108   : > { %v2580_v58 = vpop.f32.mrf.mxu0  ;;  %v949_v39 = vpop.f32.mrf.mxu1 }
 0x109   : > { %v789_v3 = vadd.f32 %v2580_v58, %v599_v25  ;;  %v984_v37 = vadd.f32 %v933_v24, %v786_v34 }
 0x10a   : > { %v738_v6 = vpop.f32.mrf.mxu0  ;;  %v2602_v13 = vpop.f32.mrf.mxu1 }
 0x10b   : > { %v787_v38 = vadd.f32 %v738_v6, %v591_v1  ;;  %v987_v48 = vadd.f32 %v2598_v15, %v789_v3 }
 0x10c   : > { %v2583_v49 = vpop.f32.mrf.mxu0  ;;  %v952_v18 = vpop.f32.mrf.mxu1 }
 0x10d   : > { %v792_v16 = vadd.f32 %v2583_v49, %v612_v0  ;;  %v985_v55 = vadd.f32 %v936_v52, %v787_v38 }
 0x10e   : > { %v751_v56 = vpop.f32.mrf.mxu0  ;;  %v3352_v20 = vpop.f32.mrf.mxu1 }
 0x10f   : > { %v790_v47 = vadd.f32 %v751_v56, %v604_v29  ;;  %v990_v26 = vadd.f32 %v2601_v31, %v792_v16 }
 0x110   : > { %v2584_v50 = vpop.f32.mrf.mxu0  ;;  %v3354_v41 = vpop.f32.mrf.mxu1 }
 0x111   : > { %v793_v10 = vadd.f32 %v2584_v50, %v615_v2  ;;  %v988_v61 = vadd.f32 %v949_v39, %v790_v47 }
 0x112   : > { %v754_v25 = vpop.f32.mrf.mxu0  ;;  %v3356_v53 = vpop.f32.mrf.mxu1 }
 0x113   : > { %v791_v54 = vadd.f32 %v754_v25, %v607_v5  ;;  %v991_v1 = vadd.f32 %v2602_v13, %v793_v10 }
 0x114   : > { %v2587_v9 = vpop.f32.mrf.mxu0  ;;  %v3358_v11 = vpop.f32.mrf.mxu1 }
 0x115   : > { %v3360_v0 = vadd.f32 %v2587_v9, %v628_v63  ;;  %v989_v46 = vadd.f32 %v952_v18, %v791_v54 }
 0x116   : > { %v767_v62 = vpop.f32.mrf.mxu0  ;;  %v2629_v44 = vpop.f32.mrf.mxu1 }
 0x117   : > { %v3362_v29 = vadd.f32 %v767_v62, %v620_v59 }
 0x118   : > { %v2588_v8 = vpop.f32.mrf.mxu0  ;;  %v1350_v12 = vpop.f32.mrf.mxu1 }
 0x119   : > { %v3364_v17 = vadd.f32 %v2588_v8, %v631_v57 }
 0x11a   : > { %v770_v2 = vpop.f32.mrf.mxu0  ;;  %v2630_v14 = vpop.f32.mrf.mxu1 }
 0x11b   : > { %v3366_v21 = vadd.f32 %v770_v2, %v623_v19 }
 0x11c   : > { %v2611_v5 = vpop.f32.mrf.mxu0  ;;  %v1353_v33 = vpop.f32.mrf.mxu1 }
 0x11d   : > { %v1252_v30 = vadd.f32 %v2611_v5, %v982_v51 }
 0x11e   : > { %v1187_v35 = vpop.f32.mrf.mxu0  ;;  %v2633_v36 = vpop.f32.mrf.mxu1 }
 0x11f   : > { %v1250_v63 = vadd.f32 %v1187_v35, %v980_v43  ;;  %v1415_v40 = vadd.f32 %v2629_v44, %v1252_v30 }
 0x120   : > { %v2612_v4 = vpop.f32.mrf.mxu0  ;;  %v1366_v24 = vpop.f32.mrf.mxu1 }
 0x121   : > { %v1253_v27 = vadd.f32 %v2612_v4, %v983_v32  ;;  %v1413_v59 = vadd.f32 %v1350_v12, %v1250_v63  ;;  %v2110_v63 = vld [vmem:[%s3515_s4] sm:$0xff]  ;;  %v2112_v4 = vld [vmem:[%s3515_s4 + $0x10] sm:$0x3] }
 0x122   : > { %v1190_v45 = vpop.f32.mrf.mxu0  ;;  %v2634_v15 = vpop.f32.mrf.mxu1 }
 0x123   : > { %v1251_v60 = vadd.f32 %v1190_v45, %v981_v22  ;;  %v1416_v57 = vadd.f32 %v2630_v14, %v1253_v27  ;;  %v2835_v45 = vmov 0  }
 0x124   : > { %v2615_v42 = vpop.f32.mrf.mxu0  ;;  %v1369_v52 = vpop.f32.mrf.mxu1  ;;  %2761 = vset.pattern.permute.xlu0 %v2835_v45  ;;  %2762 = vset.pattern.permute.xlu1 %v2835_v45 }
 0x125   : > { %v1256_v28 = vadd.f32 %v2615_v42, %v986_v7  ;;  %v1414_v19 = vadd.f32 %v1353_v33, %v1251_v60  ;;  %2115 = vperm.xlu0 %2761, %v2110_v63   ;;  %2125 = vperm.xlu1 %2762, %v2112_v4   ;;  %v2111_v60 = vld [vmem:[%s3515_s4 + $0x8] sm:$0xff] }
 0x126   : > { %v1203_v23 = vpop.f32.mrf.mxu0  ;;  %v3368_v31 = vpop.f32.mrf.mxu1 }
 0x127   : > { %v1254_v51 = vadd.f32 %v1203_v23, %v984_v37  ;;  %v1419_v34 = vadd.f32 %v2633_v36, %v1256_v28 }
 0x128   : > { %v2616_v58 = vpop.f32.mrf.mxu0  ;;  %v3370_v43 = vpop.f32.mrf.mxu1 }
 0x129   : > { %v1257_v39 = vadd.f32 %v2616_v58, %v987_v48  ;;  %v1417_v3 = vadd.f32 %v1366_v24, %v1254_v51  ;;  %2120 = vperm.xlu0 %2761, %v2111_v60  }
 0x12a   : > { %v1206_v32 = vpop.f32.mrf.mxu0  ;;  %v3372_v6 = vpop.f32.mrf.mxu1 }
 0x12b   : > { %v1255_v13 = vadd.f32 %v1206_v32, %v985_v55  ;;  %v1420_v22 = vadd.f32 %v2634_v15, %v1257_v39 }
 0x12c   : > { %v2619_v38 = vpop.f32.mrf.mxu0  ;;  %v3374_v49 = vpop.f32.mrf.mxu1 }
 0x12d   : > { %v3376_v7 = vadd.f32 %v2619_v38, %v990_v26  ;;  %v1418_v18 = vadd.f32 %v1369_v52, %v1255_v13 }
 0x12e   : > { %v1219_v16 = vpop.f32.mrf.mxu0  ;;  %v3378_v56 = vpop.f32.mrf.mxu1 }
 0x12f   : > { %v3380_v37 = vadd.f32 %v1219_v16, %v988_v61  ;;  %v1423_v60 = vadd.f32 %v3368_v31, %v3376_v7 }
 0x130   : > { %v2620_v47 = vpop.f32.mrf.mxu0  ;;  %v3382_v50 = vpop.f32.mrf.mxu1 }
 0x131   : > { %v3384_v48 = vadd.f32 %v2620_v47, %v991_v1  ;;  %v2809_v1 = vld [vmem:[%s3514_s3] sm:$0xff]  }
 0x132   : > { %v1222_v10 = vpop.f32.mrf.mxu0  ;;  %v3386_v25 = vpop.f32.mrf.mxu1  ;;  %2713 = vmatprep.mubr.msk.bf16.mxu1 %vm2136_vm4, %v2809_v1 }
 0x133   : > { %v3388_v55 = vadd.f32 %v1222_v10, %v989_v46 }
 0x134   : > { %v3390_v54 = vpop.f32.mrf.mxu0  ;;  %v3392_v26 = vpop.f32.mrf.mxu1 }
 0x136   : > { %v3394_v9 = vpop.f32.mrf.mxu0  ;;  %v2665_v62 = vpop.f32.mrf.mxu1 }
 0x138   : > { %v3396_v44 = vpop.f32.mrf.mxu0  ;;  %v1818_v8 = vpop.f32.mrf.mxu1 }
 0x13a   : > { %v3398_v61 = vpop.f32.mrf.mxu0  ;;  %v2666_v14 = vpop.f32.mrf.mxu1 }
 0x13c   : > { %v2647_v12 = vpop.f32.mrf.mxu0  ;;  %v1821_v27 = vpop.f32.mrf.mxu1 }
 0x13d   : > { %v1613_v46 = vadd.f32 %v2647_v12, %v1415_v40 }
 0x13e   : > { %v1548_v2 = vpop.f32.mrf.mxu0  ;;  %v2669_v58 = vpop.f32.mrf.mxu1 }
 0x13f   : > { %v1611_v5 = vadd.f32 %v1548_v2, %v1413_v59  ;;  %v1883_v33 = vadd.f32 %v2665_v62, %v1613_v46 }
 0x140   : > { %v2648_v30 = vpop.f32.mrf.mxu0 }
 0x141   : > { %v1614_v35 = vadd.f32 %v2648_v30, %v1416_v57  ;;  %v1881_v36 = vadd.f32 %v1818_v8, %v1611_v5 }
 0x142   : > { %v1551_v24 = vpop.f32.mrf.mxu0 }
 0x143   : > { %v1612_v40 = vadd.f32 %v1551_v24, %v1414_v19  ;;  %v1884_v15 = vadd.f32 %v2666_v14, %v1614_v35  ;;  %v1834_v19 = vpop.f32.mrf.mxu1 }
 0x144   : > { %v2651_v59 = vpop.f32.mrf.mxu0 }
 0x145   : > { %v1617_v57 = vadd.f32 %v2651_v59, %v1419_v34  ;;  %v1882_v42 = vadd.f32 %v1821_v27, %v1612_v40  ;;  %v2670_v47 = vpop.f32.mrf.mxu1  ;;  %v994_v59 = vadd.f32 %v3352_v20, %v3360_v0 }
 0x146   : > { %v1564_v52 = vpop.f32.mrf.mxu0 }
 0x147   : > { %v1615_v28 = vadd.f32 %v1564_v52, %v1417_v3  ;;  %v1837_v8 = vpop.f32.mrf.mxu1  ;;  %v1887_v27 = vadd.f32 %v2669_v58, %v1617_v57  ;;  %v992_v57 = vadd.f32 %v3354_v41, %v3362_v29  ;;  %v1421_v58 = vadd.f32 %v3370_v43, %v3380_v37 }
 0x148   : > { %v2652_v23 = vpop.f32.mrf.mxu0  ;;  %v1264_v41 = vadd.f32 %v3390_v54, %v994_v59 }
 0x149   : > { %v1618_v51 = vadd.f32 %v2652_v23, %v1420_v22  ;;  %v2673_v3 = vpop.f32.mrf.mxu1  ;;  %v1885_v52 = vadd.f32 %v1834_v19, %v1615_v28  ;;  %v995_v28 = vadd.f32 %v3356_v53, %v3364_v17  ;;  %v1424_v19 = vadd.f32 %v3372_v6, %v3384_v48 }
 0x14a   : > { %v1567_v39 = vpop.f32.mrf.mxu0  ;;  %v1262_v53 = vadd.f32 %v3394_v9, %v992_v57 }
 0x14b   : > { %v1616_v32 = vadd.f32 %v1567_v39, %v1418_v18  ;;  %v1850_v2 = vpop.f32.mrf.mxu1  ;;  %v3424_v18 = vld [vmem:[%s3513_s2] ss:$0 sm:$0xff] }
 0x14c   : > { %v2655_v13 = vpop.f32.mrf.mxu0 }
 0x14d   : > { %v2674_v4 = vpop.f32.mrf.mxu1  ;;  %v1886_v43 = vadd.f32 %v1837_v8, %v1616_v32 }
 0x14e   : > { %v1580_v38 = vpop.f32.mrf.mxu0 }
 0x14f   : > { %v1619_v29 = vadd.f32 %v1580_v38, %v1421_v58 }
 0x150   : > { %v2656_v16 = vpop.f32.mrf.mxu0 }
 0x151   : > { %v1622_v17 = vadd.f32 %v2656_v16, %v1424_v19  ;;  %v1425_v16 = vadd.f32 %v3382_v50, %v1262_v53 }
 0x152   : > { %v1583_v10 = vpop.f32.mrf.mxu0 }
 0x154   : > { %v3413_v62 = vpop.f32.mrf.mxu0 }
 0x156   : > { %v3415_v1 = vpop.f32.mrf.mxu0 }
 0x158   : > { %v3417_v34 = vpop.f32.mrf.mxu0 }
 0x15a   : > { %v3419_v12 = vpop.f32.mrf.mxu0 }
 0x15c   : > { %v2683_v22 = vpop.f32.mrf.mxu0 }
 0x15d   : > { %v2046_v46 = vadd.f32 %v2683_v22, %v1883_v33 }
 0x15e   : > { %v1981_v14 = vpop.f32.mrf.mxu0 }
 0x15f   : > { %v2044_v5 = vadd.f32 %v1981_v14, %v1881_v36  ;;  %v2069_v35 = vadd.f32 %v3424_v18, %v2046_v46  ;;  %v1621_v46 = vadd.f32 %v2655_v13, %v1423_v60  ;;  %v1853_v14 = vpop.f32.mrf.mxu1 }
 0x160   : > { %v2684_v30 = vpop.f32.mrf.mxu0 }
 0x161   : > { %v2047_v63 = vadd.f32 %v2684_v30, %v1884_v15  ;;  %v2067_v45 = vadd.f32 %v3424_v18, %v2044_v5  ;;  %v2085_v23 = vmax.f32 %v2069_v35, 0.0  ;;  %v1422_v35 = vadd.f32 %v3374_v49, %v3388_v55  ;;  %v2677_v6 = vpop.f32.mrf.mxu1 }
 0x162   : > { %v1984_v24 = vpop.f32.mrf.mxu0  ;;  %v1891_v54 = vadd.f32 %v2673_v3, %v1621_v46 }
 0x163   : > { %v2070_v40 = vadd.f32 %v3424_v18, %v2047_v63  ;;  %v2045_v33 = vadd.f32 %v1984_v24, %v1882_v42  ;;  %v1888_v42 = vadd.f32 %v2670_v47, %v1618_v51  ;;  %v2083_v0 = vmax.f32 %v2067_v45, 0.0  ;;  %v1866_v59 = vpop.f32.mrf.mxu1 }
 0x164   : > { %v2687_v36 = vpop.f32.mrf.mxu0  ;;  %v993_v47 = vadd.f32 %v3358_v11, %v3366_v21  ;;  %v1427_v63 = vadd.f32 %v3378_v56, %v1264_v41  ;;  %v1265_v24 = vadd.f32 %v3396_v44, %v995_v28  ;;  %v1620_v11 = vadd.f32 %v1583_v10, %v1422_v35 }
 0x165   : > { %v2086_v39 = vmax.f32 %v2070_v40, 0.0  ;;  %v2068_v15 = vadd.f32 %v3424_v18, %v2045_v33  ;;  %v2050_v22 = vadd.f32 %v2687_v36, %v1887_v27  ;;  %v1889_v27 = vadd.f32 %v1850_v2, %v1619_v29 }
 0x166   : > { %v1997_v20 = vpop.f32.mrf.mxu0  ;;  %v1263_v3 = vadd.f32 %v3398_v61, %v993_v47  ;;  %v1892_v40 = vadd.f32 %v2674_v4, %v1622_v17  ;;  %v1625_v33 = vadd.f32 %v3413_v62, %v1427_v63  ;;  %v1428_v10 = vadd.f32 %v3386_v25, %v1265_v24  ;;  %v2678_v4 = vpop.f32.mrf.mxu1 }
 0x167   : > { %v3438_v5 = vpack.c.bf16 %v2086_v39, %v2085_v23  ;;  %v2084_v31 = vmax.f32 %v2068_v15, 0.0  ;;  %v2048_v7 = vadd.f32 %v1997_v20, %v1885_v52  ;;  %v2073_v51 = vadd.f32 %v3424_v18, %v2050_v22 }
 0x168   : > { %v2688_v30 = vpop.f32.mrf.mxu0  ;;  %v1623_v36 = vadd.f32 %v3415_v1, %v1425_v16  ;;  %v1890_v39 = vadd.f32 %v1853_v14, %v1620_v11  ;;  %v1426_v61 = vadd.f32 %v3392_v26, %v1263_v3  ;;  %v1626_v62 = vadd.f32 %v3417_v34, %v1428_v10  ;;  %v1869_v19 = vpop.f32.mrf.mxu1  ;;  %v2810_v3 = vld [vmem:[%s3514_s3 + $0x8] ss:$0 sps:$4 sm:$0x11]  }
 0x169   : > { %v3445_v37 = vpack.c.bf16 %v2084_v31, %v2083_v0  ;;  %v2051_v13 = vadd.f32 %v2688_v30, %v1888_v42  ;;  %v2071_v38 = vadd.f32 %v3424_v18, %v2048_v7  ;;  %v2089_v45 = vmax.f32 %v2073_v51, 0.0 }
 0x16a   : > { %v2000_v48 = vpop.f32.mrf.mxu0  ;;  %v1895_v58 = vadd.f32 %v2677_v6, %v1625_v33  ;;  %v1893_v20 = vadd.f32 %v1866_v59, %v1623_v36  ;;  %v1624_v1 = vadd.f32 %v3419_v12, %v1426_v61  ;;  %v1896_v26 = vadd.f32 %v2678_v4, %v1626_v62 }
 0x16b   : > { %v2074_v32 = vadd.f32 %v3424_v18, %v2051_v13  ;;  %v2049_v8 = vadd.f32 %v2000_v48, %v1886_v43  ;;  %v2087_v56 = vmax.f32 %v2071_v38, 0.0  ;;  %v2144_v16 = vsel %vm2136_vm4, %v3445_v37, 0 }
 0x16c   : > { %v2691_v21 = vpop.f32.mrf.mxu0  ;;  %v1894_v13 = vadd.f32 %v1869_v19, %v1624_v1 }
 0x16d   : > { %v2090_v49 = vmax.f32 %v2074_v32, 0.0  ;;  %v2072_v55 = vadd.f32 %v3424_v18, %v2049_v8  ;;  %v2054_v9 = vadd.f32 %v2691_v21, %v1891_v54 }
 0x16e   : > { %v2013_v60 = vpop.f32.mrf.mxu0 }
 0x16f   : > { %v2102_v52 = vpack.c.bf16 %v2090_v49, %v2089_v45  ;;  %v2088_v44 = vmax.f32 %v2072_v55, 0.0  ;;  %v2052_v2 = vadd.f32 %v2013_v60, %v1889_v27  ;;  %v2077_v50 = vadd.f32 %v3424_v18, %v2054_v9 }
 0x170   : > { %v2692_v23 = vpop.f32.mrf.mxu0  ;;  %v2147_v9 = vsel %vm2136_vm4, %v3438_v5, 0 }
 0x171   : > { %v2101_v15 = vpack.c.bf16 %v2088_v44, %v2087_v56  ;;  %v2055_v22 = vadd.f32 %v2692_v23, %v1892_v40  ;;  %v2075_v42 = vadd.f32 %v3424_v18, %v2052_v2  ;;  %v2093_v0 = vmax.f32 %v2077_v50, 0.0 }
 0x172   : > { %v2016_v57 = vpop.f32.mrf.mxu0  ;;  %v2153_v49 = vsel %vm2136_vm4, %v2102_v52, 0 }
 0x173   : > { %v2078_v46 = vadd.f32 %v3424_v18, %v2055_v22  ;;  %v2053_v25 = vadd.f32 %v2016_v57, %v1890_v39  ;;  %v2091_v41 = vmax.f32 %v2075_v42, 0.0  ;;  %v2150_v55 = vsel %vm2136_vm4, %v2101_v15, 0 }
 0x174   : > { %v2695_v14 = vpop.f32.mrf.mxu0 }
 0x175   : > { %v2094_v31 = vmax.f32 %v2078_v46, 0.0  ;;  %v2076_v7 = vadd.f32 %v3424_v18, %v2053_v25  ;;  %v2058_v28 = vadd.f32 %v2695_v14, %v1895_v58 }
 0x176   : > { %v2029_v34 = vpop.f32.mrf.mxu0 }
 0x177   : > { %v2104_v29 = vpack.c.bf16 %v2094_v31, %v2093_v0  ;;  %v2092_v30 = vmax.f32 %v2076_v7, 0.0  ;;  %v2056_v43 = vadd.f32 %v2029_v34, %v1893_v20  ;;  %v2081_v35 = vadd.f32 %v3424_v18, %v2058_v28 }
 0x178   : > { %v2696_v51 = vpop.f32.mrf.mxu0 }
 0x179   : > { %v2103_v47 = vpack.c.bf16 %v2092_v30, %v2091_v41  ;;  %v2059_v53 = vadd.f32 %v2696_v51, %v1896_v26  ;;  %v2079_v17 = vadd.f32 %v3424_v18, %v2056_v43  ;;  %v2097_v54 = vmax.f32 %v2081_v35, 0.0 }
 0x17a   : > { %v2032_v12 = vpop.f32.mrf.mxu0  ;;  %v2159_v45 = vsel %vm2136_vm4, %v2104_v29, 0 }
 0x17b   : > { %v2082_v6 = vadd.f32 %v3424_v18, %v2059_v53  ;;  %v2057_v48 = vadd.f32 %v2032_v12, %v1894_v13  ;;  %v2095_v8 = vmax.f32 %v2079_v17, 0.0 }
 0x17d   : > { %v2098_v38 = vmax.f32 %v2082_v6, 0.0  ;;  %v2080_v32 = vadd.f32 %v3424_v18, %v2057_v48  ;;  %v2156_v18 = vsel %vm2136_vm4, %v2103_v47, 0 }
 0x17f   : > { %v2106_v63 = vpack.c.bf16 %v2098_v38, %v2097_v54  ;;  %v2096_v24 = vmax.f32 %v2080_v32, 0.0 }
 0x181   : > { %v2105_v27 = vpack.c.bf16 %v2096_v24, %v2095_v8  ;;  %2726 = vmatprep.subr.msk.bf16.mxu1 %vm2136_vm4, %v2106_v63  ;;  %v2165_v11 = vsel %vm2136_vm4, %v2106_v63, 0 }
 0x182   : > { %2698 = vmatpush3.bf16.xpose.msra.mxu1 %v2165_v11 }
 0x183   : > { %2727 = vmatprep.subr.msk.bf16.mxu1 %vm2136_vm4, %v2105_v27  ;;  %v2162_v21 = vsel %vm2136_vm4, %v2105_v27, 0 }
 0x18a   : > { %2700 = vmatpush3.bf16.xpose.msra.mxu1 %v2162_v21 }
 0x18b   : > { %2728 = vmatprep.subr.msk.bf16.mxu1 %vm2136_vm4, %v2104_v29 }
 0x192   : > { %2702 = vmatpush3.bf16.xpose.msra.mxu1 %v2159_v45 }
 0x193   : > { %2729 = vmatprep.subr.msk.bf16.mxu1 %vm2136_vm4, %v2103_v47 }
 0x19a   : > { %2704 = vmatpush3.bf16.xpose.msra.mxu1 %v2156_v18 }
 0x19b   : > { %2730 = vmatprep.subr.msk.bf16.mxu1 %vm2136_vm4, %v2102_v52 }
 0x1a0   : > { %v2126_v40 = vpop.permute.xlu1 %2125  ;;  %v2116_v33 = vpop.permute.xlu0 %2115 }
 0x1a2   : > { %2706 = vmatpush3.bf16.xpose.msra.mxu1 %v2153_v49 }
 0x1a3   : > { %2731 = vmatprep.subr.msk.bf16.mxu1 %vm2136_vm4, %v2101_v15 }
 0x1a4   : > { %v2121_v52 = vpop.permute.xlu0 %2120 }
 0x1aa   : > { %2708 = vmatpush3.bf16.xpose.msra.mxu1 %v2150_v55 }
 0x1ab   : > { %2732 = vmatprep.subr.msk.bf16.mxu1 %vm2136_vm4, %v3438_v5 }
 0x1b2   : > { %2710 = vmatpush3.bf16.xpose.msra.mxu1 %v2147_v9 }
 0x1b3   : > { %2733 = vmatprep.subr.msk.bf16.mxu1 %vm2136_vm4, %v3445_v37 }
 0x1ba   : > { %2712 = vmatpush3.bf16.xpose.msra.mxu1 %v2144_v16 }
 0x1c1   : > { %2714 = vmatmul.mubr.msk.bf16.vlgmr.msra.gmra.mxu1 %vm2136_vm4, %v2810_v3 }
 0x281   : > { %v2715_v5 = vpop.f32.mrf.mxu1 }
 0x282   : > { %v2210_v59 = vadd.f32 %v2715_v5, %v2126_v40 }
 0x283   : > { %v2201_v60 = vpop.f32.mrf.mxu1 }
 0x284   : > { %2217 = vst [vmem:[%s258_s13 + $0x10] sm:$0x3] %v2210_v59  ;;  %v2202_v56 = vadd.f32 %v2201_v60, %v2116_v33 }
 0x285   : > { %v2716_v37 = vpop.f32.mrf.mxu1 }
 0x286   : > { %2215 = vst [vmem:[%s258_s13] sm:$0xff] %v2202_v56 }
 0x287   : > { %v2204_v44 = vpop.f32.mrf.mxu1 }
 0x288   : > { %v2205_v2 = vadd.f32 %v2204_v44, %v2121_v52 }
 0x28a   : > { %2216 = vst [vmem:[%s258_s13 + $0x8] sm:$0xff] %v2205_v2 }
 0x28b PF: > { %s15_s20 = sadd.s32 1, %s2833_s20   ;;  %s3517_s18 = smov %s2829_s19 }
 0x28c   : > { %p12_p5 = scmp.ge.s32.totalorder %s15_s20, 4   ;;  %s3518_s19 = smov %s3520_s21 }
 0x28e   :  { %14 = sbr.rel (!%p12_p5) target bundleno = 2 (0x2), region = 78 }

</bundles_post_ra>
